<compile_context>
chip_gen: v6e
topology: v6e:2x2x1
jax: 0.10.0
libtpu: 0.0.40
codegen_flags: <defaults>
</compile_context>

<pallas_src>
import math
import numpy as np
import jax
import jax.numpy as jnp
from jax.experimental import pallas as pl
from jax.experimental.pallas import tpu as pltpu

# ---------------- hyper-parameters (small, consistent with the module) ----------------
B = 2
UNITS_CONV = 16
UNITS_DENSE = 32
FP_DIM = 1489          # fp_type == 'mixed'
FP_PAD = 1536          # FP_DIM padded up to a multiple of 128 (row FP_DIM carries the bias)
FP_HID = 512           # FPN.fp_2_dim
OUTPUTS = 1
NORM_FACT = 1.0 / math.sqrt(UNITS_DENSE)

# ---------------- parameter-slab layout (all small weights/biases in one array) -------
_WEIGHT_SHAPES = {
    "fpn2_w": (FP_HID, UNITS_DENSE),
    "gat1_w": (UNITS_CONV, UNITS_DENSE), "gat2_w": (UNITS_DENSE, UNITS_DENSE),
    "sco1_w": (UNITS_CONV, UNITS_DENSE), "sco2_w": (UNITS_DENSE, UNITS_DENSE),
    "vco1_w": (UNITS_CONV, UNITS_DENSE), "vco2_w": (UNITS_DENSE, UNITS_DENSE),
    "fc1_w": (4 * UNITS_DENSE, 2 * UNITS_DENSE), "fc2_w": (2 * UNITS_DENSE, UNITS_DENSE),
    "q_w": (UNITS_DENSE, UNITS_DENSE), "k_w": (UNITS_DENSE, UNITS_DENSE),
    "v_w": (UNITS_DENSE, UNITS_DENSE),
    "out1_w": (3 * UNITS_DENSE, UNITS_DENSE), "out2_w": (UNITS_DENSE, UNITS_DENSE),
    "out_w": (UNITS_DENSE, OUTPUTS),
}
_BIAS_NAMES = ["fpn2_b", "gat1_b", "gat2_b", "sco1_b", "sco2_b", "vco1_b", "vco2_b",
               "fc1_b", "fc2_b", "q_b", "k_b", "v_b", "out1_b", "out2_b", "out_b"]


def _build_layout():
    layout, cur = {}, 0
    for name, (rows, _cols) in _WEIGHT_SHAPES.items():
        layout[name] = cur
        cur += -(-rows // 8) * 8          # keep weight blocks 8-sublane aligned
    for name in _BIAS_NAMES:              # one row per bias
        layout[name] = cur
        cur += 1
    return layout, -(-cur // 8) * 8


LAYOUT, SLAB_ROWS = _build_layout()
SLAB_LANES = 128


def _relu(x):
    return jnp.maximum(x, 0.0)


def _dot(a, b):
    return jnp.dot(a, b, preferred_element_type=jnp.float32)


# ---------------- single fused Pallas kernel ----------------
def _fused_forward_kernel(fp_ref, tdim_ref, sc_ref, vc6_ref, slab_ref, fpn1_hbm_ref,
                          o_ref, fpn1_vmem, dma_sem):
    D = UNITS_DENSE
    bb = tdim_ref.shape[0]                                   # static batch size

    # Kick off the only large transfer (1.5 MiB bf16 FPN fc1 weight) and hide all
    # small-branch compute behind it.
    big_copy = pltpu.make_async_copy(fpn1_hbm_ref, fpn1_vmem, dma_sem)
    big_copy.start()

    def wslice(name, rows, cols):
        r = LAYOUT[name]
        return slab_ref[r:r + rows, 0:cols]

    def bias(name, cols):
        r = LAYOUT[name]
        return slab_ref[r:r + 1, 0:cols]

    # --- tdim path: fc_gat1 -> ReLU -> fc_gat2 -> ReLU ---
    h = _relu(_dot(tdim_ref[...], wslice("gat1_w", UNITS_CONV, D)) + bias("gat1_b", D))
    sc_tdim = _relu(_dot(h, wslice("gat2_w", D, D)) + bias("gat2_b", D))

    # --- gcn scalar path: sc_out1 -> ReLU -> sc_out2 -> ReLU ---
    h = _relu(_dot(sc_ref[...], wslice("sco1_w", UNITS_CONV, D)) + bias("sco1_b", D))
    sc_out = _relu(_dot(h, wslice("sco2_w", D, D)) + bias("sco2_b", D))

    # --- gcn vector path: all 3 components batched as one (3B, .) block ---
    hv = _relu(_dot(vc6_ref[...], wslice("vco1_w", UNITS_CONV, D)) + bias("vco1_b", D))
    vco = _relu(_dot(hv, wslice("vco2_w", D, D)) + bias("vco2_b", D))   # (3B, D)

    # --- fc1 with cat([sc_out, flatten(vc_out)]) folded row-wise into the weight ---
    fc1_r = LAYOUT["fc1_w"]
    gcn_pre = _dot(sc_out, slab_ref[fc1_r:fc1_r + D, 0:2 * D]) + bias("fc1_b", 2 * D)
    for j in range(3):
        wj = slab_ref[fc1_r + (j + 1) * D: fc1_r + (j + 2) * D, 0:2 * D]
        gcn_pre = gcn_pre + _dot(vco[j * bb:(j + 1) * bb, :], wj)
    # fc1 -> dropout(identity) -> ReLU -> fc2
    gcn_out = _dot(_relu(gcn_pre), wslice("fc2_w", 2 * D, D)) + bias("fc2_b", D)

    # --- FPN path: wait for the streamed weight, then the one big matmul ---
    big_copy.wait()
    h = _dot(fp_ref[...], fpn1_vmem[...])        # fc1 bias folded into padded row FP_DIM
    sc_fpn = _dot(_relu(h), wslice("fpn2_w", FP_HID, D)) + bias("fpn2_b", D)

    # --- Self_Attention over the 3 branch embeddings, batched as a (3B, D) block ---
    x3 = jnp.concatenate([sc_fpn, sc_tdim, gcn_out], axis=0)            # (3B, D)
    q = _dot(x3, wslice("q_w", D, D)) + bias("q_b", D)
    k = _dot(x3, wslice("k_w", D, D)) + bias("k_b", D)
    v = _dot(x3, wslice("v_w", D, D)) + bias("v_b", D)

    # one (3B,3B) score matmul; same-batch (row%B == col%B) entries selected by mask
    s = jax.lax.dot_general(q, k, (((1,), (1,)), ((), ())),
                            preferred_element_type=jnp.float32)         # (3B, 3B)
    row_b = jax.lax.broadcasted_iota(jnp.int32, (3 * bb, 3 * bb), 0) % bb
    col_b = jax.lax.broadcasted_iota(jnp.int32, (3 * bb, 3 * bb), 1) % bb
    valid = row_b == col_b
    m = jnp.max(jnp.where(valid, s, -1e30), axis=-1, keepdims=True)
    e = jnp.where(valid, jnp.exp(s - m), 0.0)
    den = jnp.sum(e, axis=-1, keepdims=True)
    # matches torch: atten = Softmax(QK^T) * norm_fact (scale applied AFTER softmax)
    a = e * (NORM_FACT / den)
    att = _dot(a, v)                     # (3B, D) per-(branch,batch) attention outputs

    # --- output head: relu(flatten(att)) @ out1 folded row-wise, then out2, out ---
    out1_r = LAYOUT["out1_w"]
    head = bias("out1_b", D)
    for i in range(3):
        wi = slab_ref[out1_r + i * D: out1_r + (i + 1) * D, 0:D]
        head = head + _dot(_relu(att[i * bb:(i + 1) * bb, :]), wi)
    h = _relu(head)
    h = _relu(_dot(h, wslice("out2_w", D, D)) + bias("out2_b", D))
    o_ref[...] = _dot(h, wslice("out_w", D, OUTPUTS)) + bias("out_b", OUTPUTS)


# ---------------- parameter construction (deterministic) ----------------
def _pack_slab(p):
    slab = np.zeros((SLAB_ROWS, SLAB_LANES), np.float32)
    for name, (rows, cols) in _WEIGHT_SHAPES.items():
        slab[LAYOUT[name]:LAYOUT[name] + rows, :cols] = np.asarray(p[name])
    for name in _BIAS_NAMES:
        bvec = np.asarray(p[name]).reshape(-1)
        slab[LAYOUT[name], :bvec.shape[0]] = bvec
    return jnp.asarray(slab)


def make_params(key):
    def lin(key, fan_in, fan_out):
        kw, kb = jax.random.split(key)
        w = jax.random.normal(kw, (fan_in, fan_out), jnp.float32) * (1.0 / math.sqrt(fan_in))
        b = jax.random.normal(kb, (1, fan_out), jnp.float32) * 0.01
        return w, b

    names_and_shapes = [
        ("fpn1", FP_DIM, FP_HID), ("fpn2", FP_HID, UNITS_DENSE),
        ("gat1", UNITS_CONV, UNITS_DENSE), ("gat2", UNITS_DENSE, UNITS_DENSE),
        ("sco1", UNITS_CONV, UNITS_DENSE), ("sco2", UNITS_DENSE, UNITS_DENSE),
        ("vco1", UNITS_CONV, UNITS_DENSE), ("vco2", UNITS_DENSE, UNITS_DENSE),
        ("fc1", 4 * UNITS_DENSE, 2 * UNITS_DENSE), ("fc2", 2 * UNITS_DENSE, UNITS_DENSE),
        ("q", UNITS_DENSE, UNITS_DENSE), ("k", UNITS_DENSE, UNITS_DENSE),
        ("v", UNITS_DENSE, UNITS_DENSE),
        ("out1", 3 * UNITS_DENSE, UNITS_DENSE), ("out2", UNITS_DENSE, UNITS_DENSE),
        ("out", UNITS_DENSE, OUTPUTS),
    ]
    params = {}
    keys = jax.random.split(key, len(names_and_shapes))
    for k, (name, fi, fo) in zip(keys, names_and_shapes):
        w, b = lin(k, fi, fo)
        params[name + "_w"], params[name + "_b"] = w, b

    # Big FPN fc1 weight: pad K 1489 -> 1536, fold the bias into row FP_DIM, store bf16.
    big = np.zeros((FP_PAD, FP_HID), np.float32)
    big[:FP_DIM] = np.asarray(params["fpn1_w"])
    big[FP_DIM] = np.asarray(params["fpn1_b"]).reshape(-1)
    params["fpn1_packed"] = jnp.asarray(big, jnp.bfloat16)

    # All remaining small parameters packed into one DMA slab.
    params["slab"] = _pack_slab(params)
    return params


# ---------------- forward: one fused pallas_call ----------------
def forward(params, fp, tdim_in, sc_pooled, vc_pooled):
    b = fp.shape[0]
    # Pad fingerprint to 1536, column FP_DIM = 1.0 picks up the folded bias row; bits
    # and 1.0 are exact in bf16 (bf16 x bf16 -> f32 accumulate on the MXU).
    fp_pad = jnp.zeros((b, FP_PAD), jnp.float32)
    fp_pad = fp_pad.at[:, :FP_DIM].set(fp).at[:, FP_DIM].set(1.0).astype(jnp.bfloat16)
    # Component-major vector features: (3, B, C) -> (3B, C) so all three GCN-vector
    # MLPs run as one batched block.
    vc6 = jnp.transpose(vc_pooled, (1, 0, 2)).reshape(3 * b, UNITS_CONV)

    return pl.pallas_call(
        _fused_forward_kernel,
        out_shape=jax.ShapeDtypeStruct((b, OUTPUTS), jnp.float32),
        in_specs=[
            pl.BlockSpec(memory_space=pltpu.MemorySpace.VMEM),   # fp_pad
            pl.BlockSpec(memory_space=pltpu.MemorySpace.VMEM),   # tdim_in
            pl.BlockSpec(memory_space=pltpu.MemorySpace.VMEM),   # sc_pooled
            pl.BlockSpec(memory_space=pltpu.MemorySpace.VMEM),   # vc6
            pl.BlockSpec(memory_space=pltpu.MemorySpace.VMEM),   # parameter slab
            pl.BlockSpec(memory_space=pl.ANY),                   # fpn1_w stays in HBM
        ],
        out_specs=pl.BlockSpec(memory_space=pltpu.MemorySpace.VMEM),
        scratch_shapes=[
            pltpu.VMEM((FP_PAD, FP_HID), jnp.bfloat16),          # manual DMA landing buffer
            pltpu.SemaphoreType.DMA(()),
        ],
    )(fp_pad, tdim_in, sc_pooled, vc6, params["slab"], params["fpn1_packed"])


# ---------------- pure-JAX reference for verification ----------------
def forward_ref(params, fp, tdim_in, sc_pooled, vc_pooled):
    p = params
    relu = lambda z: jnp.maximum(z, 0.0)
    b = fp.shape[0]
    # mirror the kernel's bf16 big weight (with folded bias row) and f32 accumulation
    w1 = p["fpn1_packed"]
    h = jnp.dot(fp.astype(jnp.bfloat16), w1[:FP_DIM],
                preferred_element_type=jnp.float32) + w1[FP_DIM:FP_DIM + 1].astype(jnp.float32)
    sc_fpn = relu(h) @ p["fpn2_w"] + p["fpn2_b"]
    sc_tdim = relu(relu(tdim_in @ p["gat1_w"] + p["gat1_b"]) @ p["gat2_w"] + p["gat2_b"])
    sc_out = relu(relu(sc_pooled @ p["sco1_w"] + p["sco1_b"]) @ p["sco2_w"] + p["sco2_b"])
    vc_out = relu(relu(vc_pooled @ p["vco1_w"] + p["vco1_b"]) @ p["vco2_w"] + p["vco2_b"])
    vc_out = vc_out.reshape(b, -1)
    gcn_in = jnp.concatenate([sc_out, vc_out], axis=-1)
    gcn_out = relu(gcn_in @ p["fc1_w"] + p["fc1_b"]) @ p["fc2_w"] + p["fc2_b"]
    seq = jnp.stack([sc_fpn, sc_tdim, gcn_out], axis=1)
    q = seq @ p["q_w"] + p["q_b"]
    k = seq @ p["k_w"] + p["k_b"]
    v = seq @ p["v_w"] + p["v_b"]
    atten = jax.nn.softmax(jnp.einsum("bnd,bmd->bnm", q, k), axis=-1) * NORM_FACT
    out = jnp.einsum("bnm,bmd->bnd", atten, v).reshape(b, -1)
    out = relu(out)
    out = relu(out @ p["out1_w"] + p["out1_b"])
    out = relu(out @ p["out2_w"] + p["out2_b"])
    return out @ p["out_w"] + p["out_b"]


if __name__ == "__main__":
    key = jax.random.PRNGKey(0)
    k_par, k_fp, k_td, k_sc, k_vc = jax.random.split(key, 5)

    params = make_params(k_par)

    # deterministic synthetic inputs (stand-ins for the graph / RDKit stages)
    fp = (jax.random.uniform(k_fp, (B, FP_DIM)) > 0.5).astype(jnp.float32)  # fingerprint bits
    tdim_in = jax.random.normal(k_td, (B, UNITS_CONV), jnp.float32)
    sc_pooled = jax.random.normal(k_sc, (B, UNITS_CONV), jnp.float32)
    vc_pooled = jax.random.normal(k_vc, (B, 3, UNITS_CONV), jnp.float32)

    fwd = jax.jit(forward)
    out = jax.block_until_ready(fwd(params, fp, tdim_in, sc_pooled, vc_pooled))

    ref = forward_ref(params, fp, tdim_in, sc_pooled, vc_pooled)
    np.testing.assert_allclose(np.asarray(out), np.asarray(ref), rtol=2e-4, atol=2e-4)

    assert out.shape == (B, OUTPUTS)
    print("KERNEL_OK")
</pallas_src>

<mosaic_0001>
module attributes {stable_mosaic.version = 11 : i64} {
  func.func @_fused_forward_kernel(%arg0: memref<2x1536xbf16, #tpu.memory_space<vmem>>, %arg1: memref<2x16xf32, #tpu.memory_space<vmem>>, %arg2: memref<2x16xf32, #tpu.memory_space<vmem>>, %arg3: memref<6x16xf32, #tpu.memory_space<vmem>>, %arg4: memref<1120x128xf32, #tpu.memory_space<vmem>>, %arg5: memref<1536x512xbf16, #tpu.memory_space<any>>, %arg6: memref<2x1xf32, #tpu.memory_space<vmem>>, %arg7: memref<1536x512xbf16, #tpu.memory_space<vmem>>, %arg8: memref<!tpu.dma_semaphore, #tpu.memory_space<semaphore_mem>>) attributes {dimension_semantics = [], scalar_prefetch = 0 : i64, scratch_operands = 2 : i64, tpu.core_type = #tpu.core_type<tc>} {
    tpu.enqueue_dma source(%arg5 : memref<1536x512xbf16, #tpu.memory_space<any>>) target(%arg7 : memref<1536x512xbf16, #tpu.memory_space<vmem>>) target_semaphore(%arg8 : memref<!tpu.dma_semaphore, #tpu.memory_space<semaphore_mem>>)
    %c0 = arith.constant 0 : index
    %c0_0 = arith.constant 0 : index
    %0 = vector.load %arg1[%c0, %c0_0] : memref<2x16xf32, #tpu.memory_space<vmem>>, vector<2x16xf32>
    %c512 = arith.constant 512 : index
    %c0_1 = arith.constant 0 : index
    %1 = vector.load %arg4[%c512, %c0_1] : memref<1120x128xf32, #tpu.memory_space<vmem>>, vector<16x32xf32>
    %cst = arith.constant dense<0.000000e+00> : vector<2x32xf32>
    %2 = tpu.matmul %0, %1, %cst {dimension_numbers = #tpu.dot_dimension_numbers<[1], [0], [0], [1], [0, 0, 1, 1], [], []>} : vector<2x16xf32>, vector<16x32xf32>, vector<2x32xf32> -> vector<2x32xf32>
    %c1105 = arith.constant 1105 : index
    %c0_2 = arith.constant 0 : index
    %3 = vector.load %arg4[%c1105, %c0_2] : memref<1120x128xf32, #tpu.memory_space<vmem>>, vector<1x32xf32>
    %4 = vector.broadcast %3 : vector<1x32xf32> to vector<2x32xf32>
    %5 = arith.addf %2, %4 : vector<2x32xf32>
    %cst_3 = arith.constant 0.000000e+00 : f32
    %6 = vector.broadcast %cst_3 : f32 to vector<2x32xf32>
    %7 = arith.maximumf %5, %6 : vector<2x32xf32>
    %c528 = arith.constant 528 : index
    %c0_4 = arith.constant 0 : index
    %8 = vector.load %arg4[%c528, %c0_4] : memref<1120x128xf32, #tpu.memory_space<vmem>>, vector<32x32xf32>
    %cst_5 = arith.constant dense<0.000000e+00> : vector<2x32xf32>
    %9 = tpu.matmul %7, %8, %cst_5 {dimension_numbers = #tpu.dot_dimension_numbers<[1], [0], [0], [1], [0, 0, 1, 1], [], []>} : vector<2x32xf32>, vector<32x32xf32>, vector<2x32xf32> -> vector<2x32xf32>
    %c1106 = arith.constant 1106 : index
    %c0_6 = arith.constant 0 : index
    %10 = vector.load %arg4[%c1106, %c0_6] : memref<1120x128xf32, #tpu.memory_space<vmem>>, vector<1x32xf32>
    %11 = vector.broadcast %10 : vector<1x32xf32> to vector<2x32xf32>
    %12 = arith.addf %9, %11 : vector<2x32xf32>
    %cst_7 = arith.constant 0.000000e+00 : f32
    %13 = vector.broadcast %cst_7 : f32 to vector<2x32xf32>
    %14 = arith.maximumf %12, %13 : vector<2x32xf32>
    %c0_8 = arith.constant 0 : index
    %c0_9 = arith.constant 0 : index
    %15 = vector.load %arg2[%c0_8, %c0_9] : memref<2x16xf32, #tpu.memory_space<vmem>>, vector<2x16xf32>
    %c560 = arith.constant 560 : index
    %c0_10 = arith.constant 0 : index
    %16 = vector.load %arg4[%c560, %c0_10] : memref<1120x128xf32, #tpu.memory_space<vmem>>, vector<16x32xf32>
    %cst_11 = arith.constant dense<0.000000e+00> : vector<2x32xf32>
    %17 = tpu.matmul %15, %16, %cst_11 {dimension_numbers = #tpu.dot_dimension_numbers<[1], [0], [0], [1], [0, 0, 1, 1], [], []>} : vector<2x16xf32>, vector<16x32xf32>, vector<2x32xf32> -> vector<2x32xf32>
    %c1107 = arith.constant 1107 : index
    %c0_12 = arith.constant 0 : index
    %18 = vector.load %arg4[%c1107, %c0_12] : memref<1120x128xf32, #tpu.memory_space<vmem>>, vector<1x32xf32>
    %19 = vector.broadcast %18 : vector<1x32xf32> to vector<2x32xf32>
    %20 = arith.addf %17, %19 : vector<2x32xf32>
    %cst_13 = arith.constant 0.000000e+00 : f32
    %21 = vector.broadcast %cst_13 : f32 to vector<2x32xf32>
    %22 = arith.maximumf %20, %21 : vector<2x32xf32>
    %c576 = arith.constant 576 : index
    %c0_14 = arith.constant 0 : index
    %23 = vector.load %arg4[%c576, %c0_14] : memref<1120x128xf32, #tpu.memory_space<vmem>>, vector<32x32xf32>
    %cst_15 = arith.constant dense<0.000000e+00> : vector<2x32xf32>
    %24 = tpu.matmul %22, %23, %cst_15 {dimension_numbers = #tpu.dot_dimension_numbers<[1], [0], [0], [1], [0, 0, 1, 1], [], []>} : vector<2x32xf32>, vector<32x32xf32>, vector<2x32xf32> -> vector<2x32xf32>
    %c1108 = arith.constant 1108 : index
    %c0_16 = arith.constant 0 : index
    %25 = vector.load %arg4[%c1108, %c0_16] : memref<1120x128xf32, #tpu.memory_space<vmem>>, vector<1x32xf32>
    %26 = vector.broadcast %25 : vector<1x32xf32> to vector<2x32xf32>
    %27 = arith.addf %24, %26 : vector<2x32xf32>
    %cst_17 = arith.constant 0.000000e+00 : f32
    %28 = vector.broadcast %cst_17 : f32 to vector<2x32xf32>
    %29 = arith.maximumf %27, %28 : vector<2x32xf32>
    %c0_18 = arith.constant 0 : index
    %c0_19 = arith.constant 0 : index
    %30 = vector.load %arg3[%c0_18, %c0_19] : memref<6x16xf32, #tpu.memory_space<vmem>>, vector<6x16xf32>
    %c608 = arith.constant 608 : index
    %c0_20 = arith.constant 0 : index
    %31 = vector.load %arg4[%c608, %c0_20] : memref<1120x128xf32, #tpu.memory_space<vmem>>, vector<16x32xf32>
    %cst_21 = arith.constant dense<0.000000e+00> : vector<6x32xf32>
    %32 = tpu.matmul %30, %31, %cst_21 {dimension_numbers = #tpu.dot_dimension_numbers<[1], [0], [0], [1], [0, 0, 1, 1], [], []>} : vector<6x16xf32>, vector<16x32xf32>, vector<6x32xf32> -> vector<6x32xf32>
    %c1109 = arith.constant 1109 : index
    %c0_22 = arith.constant 0 : index
    %33 = vector.load %arg4[%c1109, %c0_22] : memref<1120x128xf32, #tpu.memory_space<vmem>>, vector<1x32xf32>
    %34 = vector.broadcast %33 : vector<1x32xf32> to vector<6x32xf32>
    %35 = arith.addf %32, %34 : vector<6x32xf32>
    %cst_23 = arith.constant 0.000000e+00 : f32
    %36 = vector.broadcast %cst_23 : f32 to vector<6x32xf32>
    %37 = arith.maximumf %35, %36 : vector<6x32xf32>
    %c624 = arith.constant 624 : index
    %c0_24 = arith.constant 0 : index
    %38 = vector.load %arg4[%c624, %c0_24] : memref<1120x128xf32, #tpu.memory_space<vmem>>, vector<32x32xf32>
    %cst_25 = arith.constant dense<0.000000e+00> : vector<6x32xf32>
    %39 = tpu.matmul %37, %38, %cst_25 {dimension_numbers = #tpu.dot_dimension_numbers<[1], [0], [0], [1], [0, 0, 1, 1], [], []>} : vector<6x32xf32>, vector<32x32xf32>, vector<6x32xf32> -> vector<6x32xf32>
    %c1110 = arith.constant 1110 : index
    %c0_26 = arith.constant 0 : index
    %40 = vector.load %arg4[%c1110, %c0_26] : memref<1120x128xf32, #tpu.memory_space<vmem>>, vector<1x32xf32>
    %41 = vector.broadcast %40 : vector<1x32xf32> to vector<6x32xf32>
    %42 = arith.addf %39, %41 : vector<6x32xf32>
    %cst_27 = arith.constant 0.000000e+00 : f32
    %43 = vector.broadcast %cst_27 : f32 to vector<6x32xf32>
    %44 = arith.maximumf %42, %43 : vector<6x32xf32>
    %c656 = arith.constant 656 : index
    %c0_28 = arith.constant 0 : index
    %45 = vector.load %arg4[%c656, %c0_28] : memref<1120x128xf32, #tpu.memory_space<vmem>>, vector<32x64xf32>
    %cst_29 = arith.constant dense<0.000000e+00> : vector<2x64xf32>
    %46 = tpu.matmul %29, %45, %cst_29 {dimension_numbers = #tpu.dot_dimension_numbers<[1], [0], [0], [1], [0, 0, 1, 1], [], []>} : vector<2x32xf32>, vector<32x64xf32>, vector<2x64xf32> -> vector<2x64xf32>
    %c1111 = arith.constant 1111 : index
    %c0_30 = arith.constant 0 : index
    %47 = vector.load %arg4[%c1111, %c0_30] : memref<1120x128xf32, #tpu.memory_space<vmem>>, vector<1x64xf32>
    %48 = vector.broadcast %47 : vector<1x64xf32> to vector<2x64xf32>
    %49 = arith.addf %46, %48 : vector<2x64xf32>
    %c688 = arith.constant 688 : index
    %c0_31 = arith.constant 0 : index
    %50 = vector.load %arg4[%c688, %c0_31] : memref<1120x128xf32, #tpu.memory_space<vmem>>, vector<32x64xf32>
    %51 = vector.extract_strided_slice %44 {offsets = [0, 0], sizes = [2, 32], strides = [1, 1]} : vector<6x32xf32> to vector<2x32xf32>
    %cst_32 = arith.constant dense<0.000000e+00> : vector<2x64xf32>
    %52 = tpu.matmul %51, %50, %cst_32 {dimension_numbers = #tpu.dot_dimension_numbers<[1], [0], [0], [1], [0, 0, 1, 1], [], []>} : vector<2x32xf32>, vector<32x64xf32>, vector<2x64xf32> -> vector<2x64xf32>
    %53 = arith.addf %49, %52 : vector<2x64xf32>
    %c720 = arith.constant 720 : index
    %c0_33 = arith.constant 0 : index
    %54 = vector.load %arg4[%c720, %c0_33] : memref<1120x128xf32, #tpu.memory_space<vmem>>, vector<32x64xf32>
    %55 = vector.extract_strided_slice %44 {offsets = [2, 0], sizes = [2, 32], strides = [1, 1]} : vector<6x32xf32> to vector<2x32xf32>
    %cst_34 = arith.constant dense<0.000000e+00> : vector<2x64xf32>
    %56 = tpu.matmul %55, %54, %cst_34 {dimension_numbers = #tpu.dot_dimension_numbers<[1], [0], [0], [1], [0, 0, 1, 1], [], []>} : vector<2x32xf32>, vector<32x64xf32>, vector<2x64xf32> -> vector<2x64xf32>
    %57 = arith.addf %53, %56 : vector<2x64xf32>
    %c752 = arith.constant 752 : index
    %c0_35 = arith.constant 0 : index
    %58 = vector.load %arg4[%c752, %c0_35] : memref<1120x128xf32, #tpu.memory_space<vmem>>, vector<32x64xf32>
    %59 = vector.extract_strided_slice %44 {offsets = [4, 0], sizes = [2, 32], strides = [1, 1]} : vector<6x32xf32> to vector<2x32xf32>
    %cst_36 = arith.constant dense<0.000000e+00> : vector<2x64xf32>
    %60 = tpu.matmul %59, %58, %cst_36 {dimension_numbers = #tpu.dot_dimension_numbers<[1], [0], [0], [1], [0, 0, 1, 1], [], []>} : vector<2x32xf32>, vector<32x64xf32>, vector<2x64xf32> -> vector<2x64xf32>
    %61 = arith.addf %57, %60 : vector<2x64xf32>
    %cst_37 = arith.constant 0.000000e+00 : f32
    %62 = vector.broadcast %cst_37 : f32 to vector<2x64xf32>
    %63 = arith.maximumf %61, %62 : vector<2x64xf32>
    %c784 = arith.constant 784 : index
    %c0_38 = arith.constant 0 : index
    %64 = vector.load %arg4[%c784, %c0_38] : memref<1120x128xf32, #tpu.memory_space<vmem>>, vector<64x32xf32>
    %cst_39 = arith.constant dense<0.000000e+00> : vector<2x32xf32>
    %65 = tpu.matmul %63, %64, %cst_39 {dimension_numbers = #tpu.dot_dimension_numbers<[1], [0], [0], [1], [0, 0, 1, 1], [], []>} : vector<2x64xf32>, vector<64x32xf32>, vector<2x32xf32> -> vector<2x32xf32>
    %c1112 = arith.constant 1112 : index
    %c0_40 = arith.constant 0 : index
    %66 = vector.load %arg4[%c1112, %c0_40] : memref<1120x128xf32, #tpu.memory_space<vmem>>, vector<1x32xf32>
    %67 = vector.broadcast %66 : vector<1x32xf32> to vector<2x32xf32>
    %68 = arith.addf %65, %67 : vector<2x32xf32>
    tpu.wait_dma2 semaphore(%arg8 : memref<!tpu.dma_semaphore, #tpu.memory_space<semaphore_mem>>) src(%arg5 : memref<1536x512xbf16, #tpu.memory_space<any>>) dst(%arg7 : memref<1536x512xbf16, #tpu.memory_space<vmem>>)
    %c0_41 = arith.constant 0 : index
    %c0_42 = arith.constant 0 : index
    %69 = vector.load %arg0[%c0_41, %c0_42] : memref<2x1536xbf16, #tpu.memory_space<vmem>>, vector<2x1536xbf16>
    %c0_43 = arith.constant 0 : index
    %c0_44 = arith.constant 0 : index
    %70 = vector.load %arg7[%c0_43, %c0_44] : memref<1536x512xbf16, #tpu.memory_space<vmem>>, vector<1536x512xbf16>
    %cst_45 = arith.constant dense<0.000000e+00> : vector<2x512xf32>
    %71 = tpu.matmul %69, %70, %cst_45 {dimension_numbers = #tpu.dot_dimension_numbers<[1], [0], [0], [1], [0, 0, 1, 1], [], []>} : vector<2x1536xbf16>, vector<1536x512xbf16>, vector<2x512xf32> -> vector<2x512xf32>
    %cst_46 = arith.constant 0.000000e+00 : f32
    %72 = vector.broadcast %cst_46 : f32 to vector<2x512xf32>
    %73 = arith.maximumf %71, %72 : vector<2x512xf32>
    %c0_47 = arith.constant 0 : index
    %c0_48 = arith.constant 0 : index
    %74 = vector.load %arg4[%c0_47, %c0_48] : memref<1120x128xf32, #tpu.memory_space<vmem>>, vector<512x32xf32>
    %cst_49 = arith.constant dense<0.000000e+00> : vector<2x32xf32>
    %75 = tpu.matmul %73, %74, %cst_49 {dimension_numbers = #tpu.dot_dimension_numbers<[1], [0], [0], [1], [0, 0, 1, 1], [], []>} : vector<2x512xf32>, vector<512x32xf32>, vector<2x32xf32> -> vector<2x32xf32>
    %c1104 = arith.constant 1104 : index
    %c0_50 = arith.constant 0 : index
    %76 = vector.load %arg4[%c1104, %c0_50] : memref<1120x128xf32, #tpu.memory_space<vmem>>, vector<1x32xf32>
    %77 = vector.broadcast %76 : vector<1x32xf32> to vector<2x32xf32>
    %78 = arith.addf %75, %77 : vector<2x32xf32>
    %79 = tpu.concatenate %78, %14, %68 in 0 : vector<2x32xf32>, vector<2x32xf32>, vector<2x32xf32> -> vector<6x32xf32>
    %c848 = arith.constant 848 : index
    %c0_51 = arith.constant 0 : index
    %80 = vector.load %arg4[%c848, %c0_51] : memref<1120x128xf32, #tpu.memory_space<vmem>>, vector<32x32xf32>
    %cst_52 = arith.constant dense<0.000000e+00> : vector<6x32xf32>
    %81 = tpu.matmul %79, %80, %cst_52 {dimension_numbers = #tpu.dot_dimension_numbers<[1], [0], [0], [1], [0, 0, 1, 1], [], []>} : vector<6x32xf32>, vector<32x32xf32>, vector<6x32xf32> -> vector<6x32xf32>
    %c1113 = arith.constant 1113 : index
    %c0_53 = arith.constant 0 : index
    %82 = vector.load %arg4[%c1113, %c0_53] : memref<1120x128xf32, #tpu.memory_space<vmem>>, vector<1x32xf32>
    %83 = vector.broadcast %82 : vector<1x32xf32> to vector<6x32xf32>
    %84 = arith.addf %81, %83 : vector<6x32xf32>
    %c880 = arith.constant 880 : index
    %c0_54 = arith.constant 0 : index
    %85 = vector.load %arg4[%c880, %c0_54] : memref<1120x128xf32, #tpu.memory_space<vmem>>, vector<32x32xf32>
    %cst_55 = arith.constant dense<0.000000e+00> : vector<6x32xf32>
    %86 = tpu.matmul %79, %85, %cst_55 {dimension_numbers = #tpu.dot_dimension_numbers<[1], [0], [0], [1], [0, 0, 1, 1], [], []>} : vector<6x32xf32>, vector<32x32xf32>, vector<6x32xf32> -> vector<6x32xf32>
    %c1114 = arith.constant 1114 : index
    %c0_56 = arith.constant 0 : index
    %87 = vector.load %arg4[%c1114, %c0_56] : memref<1120x128xf32, #tpu.memory_space<vmem>>, vector<1x32xf32>
    %88 = vector.broadcast %87 : vector<1x32xf32> to vector<6x32xf32>
    %89 = arith.addf %86, %88 : vector<6x32xf32>
    %c912 = arith.constant 912 : index
    %c0_57 = arith.constant 0 : index
    %90 = vector.load %arg4[%c912, %c0_57] : memref<1120x128xf32, #tpu.memory_space<vmem>>, vector<32x32xf32>
    %cst_58 = arith.constant dense<0.000000e+00> : vector<6x32xf32>
    %91 = tpu.matmul %79, %90, %cst_58 {dimension_numbers = #tpu.dot_dimension_numbers<[1], [0], [0], [1], [0, 0, 1, 1], [], []>} : vector<6x32xf32>, vector<32x32xf32>, vector<6x32xf32> -> vector<6x32xf32>
    %c1115 = arith.constant 1115 : index
    %c0_59 = arith.constant 0 : index
    %92 = vector.load %arg4[%c1115, %c0_59] : memref<1120x128xf32, #tpu.memory_space<vmem>>, vector<1x32xf32>
    %93 = vector.broadcast %92 : vector<1x32xf32> to vector<6x32xf32>
    %94 = arith.addf %91, %93 : vector<6x32xf32>
    %cst_60 = arith.constant dense<0.000000e+00> : vector<6x6xf32>
    %95 = tpu.matmul %84, %89, %cst_60 {dimension_numbers = #tpu.dot_dimension_numbers<[1], [1], [0], [0], [0, 0, 1, 0], [], []>} : vector<6x32xf32>, vector<6x32xf32>, vector<6x6xf32> -> vector<6x6xf32>
    %96 = tpu.iota {dimensions = array<i32: 0>} : vector<6x6xi32>
    %c2_i32 = arith.constant 2 : i32
    %c0_i32 = arith.constant 0 : i32
    %97 = arith.cmpi eq, %c2_i32, %c0_i32 : i32
    %c1_i32 = arith.constant 1 : i32
    %98 = arith.select %97, %c1_i32, %c2_i32 : i32
    %99 = vector.broadcast %98 : i32 to vector<6x6xi32>
    %100 = arith.remsi %96, %99 : vector<6x6xi32>
    %c0_i32_61 = arith.constant 0 : i32
    %101 = vector.broadcast %c0_i32_61 : i32 to vector<6x6xi32>
    %102 = arith.cmpi ne, %100, %101 : vector<6x6xi32>
    %c0_i32_62 = arith.constant 0 : i32
    %103 = vector.broadcast %c0_i32_62 : i32 to vector<6x6xi32>
    %104 = arith.cmpi slt, %100, %103 : vector<6x6xi32>
    %c0_i32_63 = arith.constant 0 : i32
    %105 = arith.cmpi slt, %98, %c0_i32_63 : i32
    %106 = vector.broadcast %105 : i1 to vector<6x6xi1>
    %107 = vector.broadcast %106 : vector<6x6xi1> to vector<6x6xi1>
    %108 = arith.xori %104, %107 : vector<6x6xi1>
    %109 = arith.andi %108, %102 : vector<6x6xi1>
    %110 = vector.broadcast %98 : i32 to vector<6x6xi32>
    %111 = arith.addi %100, %110 : vector<6x6xi32>
    %112 = arith.select %109, %111, %100 : vector<6x6xi1>, vector<6x6xi32>
    %113 = tpu.iota {dimensions = array<i32: 1>} : vector<6x6xi32>
    %c2_i32_64 = arith.constant 2 : i32
    %c0_i32_65 = arith.constant 0 : i32
    %114 = arith.cmpi eq, %c2_i32_64, %c0_i32_65 : i32
    %c1_i32_66 = arith.constant 1 : i32
    %115 = arith.select %114, %c1_i32_66, %c2_i32_64 : i32
    %116 = vector.broadcast %115 : i32 to vector<6x6xi32>
    %117 = arith.remsi %113, %116 : vector<6x6xi32>
    %c0_i32_67 = arith.constant 0 : i32
    %118 = vector.broadcast %c0_i32_67 : i32 to vector<6x6xi32>
    %119 = arith.cmpi ne, %117, %118 : vector<6x6xi32>
    %c0_i32_68 = arith.constant 0 : i32
    %120 = vector.broadcast %c0_i32_68 : i32 to vector<6x6xi32>
    %121 = arith.cmpi slt, %117, %120 : vector<6x6xi32>
    %c0_i32_69 = arith.constant 0 : i32
    %122 = arith.cmpi slt, %115, %c0_i32_69 : i32
    %123 = vector.broadcast %122 : i1 to vector<6x6xi1>
    %124 = vector.broadcast %123 : vector<6x6xi1> to vector<6x6xi1>
    %125 = arith.xori %121, %124 : vector<6x6xi1>
    %126 = arith.andi %125, %119 : vector<6x6xi1>
    %127 = vector.broadcast %115 : i32 to vector<6x6xi32>
    %128 = arith.addi %117, %127 : vector<6x6xi32>
    %129 = arith.select %126, %128, %117 : vector<6x6xi1>, vector<6x6xi32>
    %130 = arith.cmpi eq, %112, %129 : vector<6x6xi32>
    %cst_70 = arith.constant -1.000000e+30 : f32
    %131 = vector.broadcast %cst_70 : f32 to vector<6x6xf32>
    %132 = arith.select %130, %95, %131 : vector<6x6xi1>, vector<6x6xf32>
    %cst_71 = arith.constant dense<0xFF800000> : vector<6xf32>
    %133 = vector.multi_reduction <maximumf>, %132, %cst_71 [1] : vector<6x6xf32> to vector<6xf32>
    %134 = vector.shape_cast %133 : vector<6xf32> to vector<6x1xf32>
    %135 = vector.broadcast %134 : vector<6x1xf32> to vector<6x6xf32>
    %136 = arith.subf %95, %135 : vector<6x6xf32>
    %137 = math.exp %136 : vector<6x6xf32>
    %cst_72 = arith.constant 0.000000e+00 : f32
    %138 = vector.broadcast %cst_72 : f32 to vector<6x6xf32>
    %139 = arith.select %130, %137, %138 : vector<6x6xi1>, vector<6x6xf32>
    %cst_73 = arith.constant dense<0.000000e+00> : vector<6xf32>
    %140 = vector.multi_reduction <add>, %139, %cst_73 [1] : vector<6x6xf32> to vector<6xf32>
    %141 = vector.shape_cast %140 : vector<6xf32> to vector<6x1xf32>
    %cst_74 = arith.constant 0.176776692 : f32
    %142 = vector.broadcast %cst_74 : f32 to vector<6x1xf32>
    %143 = arith.divf %142, %141 : vector<6x1xf32>
    %144 = vector.broadcast %143 : vector<6x1xf32> to vector<6x6xf32>
    %145 = arith.mulf %139, %144 : vector<6x6xf32>
    %cst_75 = arith.constant dense<0.000000e+00> : vector<6x32xf32>
    %146 = tpu.matmul %145, %94, %cst_75 {dimension_numbers = #tpu.dot_dimension_numbers<[1], [0], [0], [1], [0, 0, 1, 1], [], []>} : vector<6x6xf32>, vector<6x32xf32>, vector<6x32xf32> -> vector<6x32xf32>
    %c1116 = arith.constant 1116 : index
    %c0_76 = arith.constant 0 : index
    %147 = vector.load %arg4[%c1116, %c0_76] : memref<1120x128xf32, #tpu.memory_space<vmem>>, vector<1x32xf32>
    %c944 = arith.constant 944 : index
    %c0_77 = arith.constant 0 : index
    %148 = vector.load %arg4[%c944, %c0_77] : memref<1120x128xf32, #tpu.memory_space<vmem>>, vector<32x32xf32>
    %149 = vector.extract_strided_slice %146 {offsets = [0, 0], sizes = [2, 32], strides = [1, 1]} : vector<6x32xf32> to vector<2x32xf32>
    %cst_78 = arith.constant 0.000000e+00 : f32
    %150 = vector.broadcast %cst_78 : f32 to vector<2x32xf32>
    %151 = arith.maximumf %149, %150 : vector<2x32xf32>
    %cst_79 = arith.constant dense<0.000000e+00> : vector<2x32xf32>
    %152 = tpu.matmul %151, %148, %cst_79 {dimension_numbers = #tpu.dot_dimension_numbers<[1], [0], [0], [1], [0, 0, 1, 1], [], []>} : vector<2x32xf32>, vector<32x32xf32>, vector<2x32xf32> -> vector<2x32xf32>
    %153 = vector.broadcast %147 : vector<1x32xf32> to vector<2x32xf32>
    %154 = arith.addf %153, %152 : vector<2x32xf32>
    %c976 = arith.constant 976 : index
    %c0_80 = arith.constant 0 : index
    %155 = vector.load %arg4[%c976, %c0_80] : memref<1120x128xf32, #tpu.memory_space<vmem>>, vector<32x32xf32>
    %156 = vector.extract_strided_slice %146 {offsets = [2, 0], sizes = [2, 32], strides = [1, 1]} : vector<6x32xf32> to vector<2x32xf32>
    %cst_81 = arith.constant 0.000000e+00 : f32
    %157 = vector.broadcast %cst_81 : f32 to vector<2x32xf32>
    %158 = arith.maximumf %156, %157 : vector<2x32xf32>
    %cst_82 = arith.constant dense<0.000000e+00> : vector<2x32xf32>
    %159 = tpu.matmul %158, %155, %cst_82 {dimension_numbers = #tpu.dot_dimension_numbers<[1], [0], [0], [1], [0, 0, 1, 1], [], []>} : vector<2x32xf32>, vector<32x32xf32>, vector<2x32xf32> -> vector<2x32xf32>
    %160 = arith.addf %154, %159 : vector<2x32xf32>
    %c1008 = arith.constant 1008 : index
    %c0_83 = arith.constant 0 : index
    %161 = vector.load %arg4[%c1008, %c0_83] : memref<1120x128xf32, #tpu.memory_space<vmem>>, vector<32x32xf32>
    %162 = vector.extract_strided_slice %146 {offsets = [4, 0], sizes = [2, 32], strides = [1, 1]} : vector<6x32xf32> to vector<2x32xf32>
    %cst_84 = arith.constant 0.000000e+00 : f32
    %163 = vector.broadcast %cst_84 : f32 to vector<2x32xf32>
    %164 = arith.maximumf %162, %163 : vector<2x32xf32>
    %cst_85 = arith.constant dense<0.000000e+00> : vector<2x32xf32>
    %165 = tpu.matmul %164, %161, %cst_85 {dimension_numbers = #tpu.dot_dimension_numbers<[1], [0], [0], [1], [0, 0, 1, 1], [], []>} : vector<2x32xf32>, vector<32x32xf32>, vector<2x32xf32> -> vector<2x32xf32>
    %166 = arith.addf %160, %165 : vector<2x32xf32>
    %cst_86 = arith.constant 0.000000e+00 : f32
    %167 = vector.broadcast %cst_86 : f32 to vector<2x32xf32>
    %168 = arith.maximumf %166, %167 : vector<2x32xf32>
    %c1040 = arith.constant 1040 : index
    %c0_87 = arith.constant 0 : index
    %169 = vector.load %arg4[%c1040, %c0_87] : memref<1120x128xf32, #tpu.memory_space<vmem>>, vector<32x32xf32>
    %cst_88 = arith.constant dense<0.000000e+00> : vector<2x32xf32>
    %170 = tpu.matmul %168, %169, %cst_88 {dimension_numbers = #tpu.dot_dimension_numbers<[1], [0], [0], [1], [0, 0, 1, 1], [], []>} : vector<2x32xf32>, vector<32x32xf32>, vector<2x32xf32> -> vector<2x32xf32>
    %c1117 = arith.constant 1117 : index
    %c0_89 = arith.constant 0 : index
    %171 = vector.load %arg4[%c1117, %c0_89] : memref<1120x128xf32, #tpu.memory_space<vmem>>, vector<1x32xf32>
    %172 = vector.broadcast %171 : vector<1x32xf32> to vector<2x32xf32>
    %173 = arith.addf %170, %172 : vector<2x32xf32>
    %cst_90 = arith.constant 0.000000e+00 : f32
    %174 = vector.broadcast %cst_90 : f32 to vector<2x32xf32>
    %175 = arith.maximumf %173, %174 : vector<2x32xf32>
    %c1072 = arith.constant 1072 : index
    %c0_91 = arith.constant 0 : index
    %176 = vector.load %arg4[%c1072, %c0_91] : memref<1120x128xf32, #tpu.memory_space<vmem>>, vector<32x1xf32>
    %cst_92 = arith.constant dense<0.000000e+00> : vector<2x1xf32>
    %177 = tpu.matmul %175, %176, %cst_92 {dimension_numbers = #tpu.dot_dimension_numbers<[1], [0], [0], [1], [0, 0, 1, 1], [], []>} : vector<2x32xf32>, vector<32x1xf32>, vector<2x1xf32> -> vector<2x1xf32>
    %c1118 = arith.constant 1118 : index
    %c0_93 = arith.constant 0 : index
    %178 = vector.load %arg4[%c1118, %c0_93] : memref<1120x128xf32, #tpu.memory_space<vmem>>, vector<1x1xf32>
    %179 = vector.broadcast %178 : vector<1x1xf32> to vector<2x1xf32>
    %180 = arith.addf %177, %179 : vector<2x1xf32>
    %c0_94 = arith.constant 0 : index
    %c0_95 = arith.constant 0 : index
    %181 = vector.load %arg6[%c0_94, %c0_95] : memref<2x1xf32, #tpu.memory_space<vmem>>, vector<2x1xf32>
    tpu.vector_store %arg6[%c0_94, %c0_95], %180 {strides = array<i32>} : memref<2x1xf32, #tpu.memory_space<vmem>>, vector<2x1xf32>,
    return
  }
}

</mosaic_0001>

<bundles_post_ra>
// kernel: forward.1
= control target key start
LH: loop header
LB: loop body
LE: loop exit
PB: predicated region body
PF: predicated region fallthrough
CT: control target
= control target key end

     0   :  { %11 = vsyncpa [#allocation5], 0  ;;  %s6743_s0 = inlined_call_operand.vmem [shape: bf16[2,1536], index: 0, kind: input, shape index: {}]   ;;  %s6744_s1 = inlined_call_operand.hbm [shape: f32[2,16], index: 1, kind: input, shape index: {}]   ;;  %s6745_s2 = inlined_call_operand.hbm [shape: f32[2,16], index: 2, kind: input, shape index: {}]   ;;  %s6746_s3 = inlined_call_operand.vmem [shape: f32[6,16], index: 3, kind: input, shape index: {}]   ;;  %s6747_s4 = inlined_call_operand.hbm [shape: f32[1120,128], index: 4, kind: input, shape index: {}]   ;;  %s6748_s5 = inlined_call_operand.hbm [shape: bf16[1536,512], index: 5, kind: input, shape index: {}]   ;;  %s6749_s6 = inlined_call_operand.vmem [shape: f32[2,1], index: 6, kind: output, shape index: {}]  }
   0x1   :  { %12 = vsyncpa [#allocation7], 0  ;;  %s6422_s21 = smov [#allocation6]   ;;  %s6423_s23 = smov [#allocation4]  }
   0x2   :  { %s31_s22 = sshll.u32 %s6422_s21, 4  ;;  %s21_s24 = sshll.u32 %s6423_s23, 4  ;;  %s32_s22 = int_to_ptr.vmem [resolvable:$true] %s31_s22  ;;  %s22_s24 = int_to_ptr.vmem [resolvable:$true] %s21_s24 }
   0x3   :  { %s6344_s25 = scalar_lea.vmem %s32_s22, 32  ;;  %p6349_p1 = scmp.lt.s32.totalorder %s32_s22, %s32_s22 }
   0x4   :  { %p6345_p0 = scmp.ne.s32.totalorder %s32_s22, %s6344_s25  ;;  %p6350_p2 = scmp.lt.s32.totalorder %s6344_s25, %s6344_s25 }
   0x6   :  { %p6351_p3 = por %p6350_p2, %p6349_p1 }
   0x8   :  { %p6352_p4 = pnand %p6351_p3, %p6345_p0 }
   0xa   :  { %6355 = shalt.err (!%p6352_p4)
}
   0xb   :  { %34 = dma.hbm_to_vmem [thread:$0]  %s6745_s2, 32, %s32_s22, [#allocation7]  }
   0xc   :  { %s6364_s28 = scalar_lea.vmem %s22_s24, 32  ;;  %p6369_p6 = scmp.lt.s32.totalorder %s22_s24, %s22_s24 }
   0xd   :  { %p6365_p5 = scmp.ne.s32.totalorder %s22_s24, %s6364_s28  ;;  %p6370_p7 = scmp.lt.s32.totalorder %s6364_s28, %s6364_s28 }
   0xf   :  { %p6371_p8 = por %p6370_p7, %p6369_p6 }
  0x11   :  { %p6372_p9 = pnand %p6371_p8, %p6365_p5 }
  0x13   :  { %6375 = shalt.err (!%p6372_p9)
}
  0x14   :  { %24 = dma.hbm_to_vmem [thread:$0]  %s6744_s1, 32, %s22_s24, [#allocation5]  }
  0x15   :  { %s6424_s7 = smov [#allocation8]  }
  0x16   :  { %s42_s8 = sshll.u32 %s6424_s7, 4  ;;  %s43_s8 = int_to_ptr.vmem [resolvable:$true] %s42_s8 }
  0x17   :  { %s6384_s9 = scalar_lea.vmem %s43_s8, 17920  ;;  %p6389_p11 = scmp.lt.s32.totalorder %s43_s8, %s43_s8 }
  0x18   :  { %p6385_p10 = scmp.ne.s32.totalorder %s43_s8, %s6384_s9  ;;  %p6390_p12 = scmp.lt.s32.totalorder %s6384_s9, %s6384_s9 }
  0x1a   :  { %p6391_p13 = por %p6390_p12, %p6389_p11 }
  0x1c   :  { %p6392_p0 = pnand %p6391_p13, %p6385_p10 }
  0x1e   :  { %6395 = shalt.err (!%p6392_p0)
}
  0x1f   :  { %s6425_s2 = smov 128   ;;  %s6426_s10 = smov 8  }
  0x20   :  { %48 = dma.hbm_to_vmem [thread:$0]  %s6747_s4, 17920, %s43_s8, [#allocation7], %s6425_s2, %s6425_s2, %s6426_s10  }
  0x21   :  { %6416 = dma.done.wait [#allocation5], 32  }
  0x22   :  { %6417 = vsyncadd [#allocation5], 4294967264 }
  0x23   :  { %6418 = dma.done.wait [#allocation7], 17952  }
  0x24   :  { %6419 = vsyncadd [#allocation7], 4294949344  ;;  %v6427_v0 = vmov 0.0   ;;  %vm6428_vm0 = vmmov 0   ;;  %v71_v1 = vld [vmem:[#allocation8 + $0x208] sm:$0xff]  ;;  %v70_v2 = vld [vmem:[#allocation8 + $0x200] sm:$0xff] }
  0x25   :  { %5531 = vmatprep.subr.mxu0 %v6427_v0  ;;  %5535 = vmatprep.mubr.msk.f32.mxu0 %vm6428_vm0, %v6427_v0  ;;  %v69_v3 = vld [vmem:[#allocation4] sm:$0x3]  ;;  %vm77_vm1 = vcmask 130048   ;;  %v155_v4 = vld [vmem:[#allocation8 + $0x228] sm:$0xff]  ;;  %v154_v5 = vld [vmem:[#allocation8 + $0x220] sm:$0xff]  ;;  %vm161_vm2 = vcmask 261120  }
  0x26   :  { %5538 = vmatprep.subr.mxu1 %v6427_v0  ;;  %5546 = vmatprep.mubr.msk.f32.mxu1 %vm6428_vm0, %v6427_v0  ;;  %v238_v6 = vld [vmem:[#allocation8 + $0x238] sm:$0xff]  ;;  %v237_v8 = vld [vmem:[#allocation8 + $0x230] sm:$0xff]  ;;  %v403_v18 = vld [vmem:[#allocation8 + $0x268] sm:$0xff]  ;;  %vm896_vm3 = vcmask 523264  }
  0x27   :  { %5532 = vmatpush3.msra.mxu0 %v71_v1  ;;  %5539 = vmatpush3.msra.mxu1 %v155_v4  ;;  %v153_v7 = vld [vmem:[#allocation8 + $0x218] sm:$0xff]  ;;  %v152_v9 = vld [vmem:[#allocation8 + $0x210] sm:$0xff]  ;;  %v402_v19 = vld [vmem:[#allocation8 + $0x260] sm:$0xff] }
  0x28   :  { %5533 = vmatprep.subr.mxu0 %v6427_v0  ;;  %5540 = vmatprep.subr.mxu1 %v6427_v0  ;;  %v236_v10 = vld [vmem:[#allocation6] sm:$0x3]  ;;  %v320_v12 = vld [vmem:[#allocation8 + $0x250] sm:$0xff]  ;;  %v319_v24 = vld [vmem:[#allocation8 + $0x248] sm:$0xff] }
  0x29   :  { %5534 = vmatpush3.msra.mxu0 %v70_v2  ;;  %5541 = vmatpush3.msra.mxu1 %v154_v5  ;;  %v321_v11 = vld [vmem:[#allocation8 + $0x258] sm:$0xff]  ;;  %v4940_v13 = vld [vmem:[#allocation8 + $0x451] ss:$0 sm:$0xff]  ;;  %v4944_v21 = vld [vmem:[#allocation8 + $0x453] ss:$0 sm:$0xff] }
  0x2a   :  { %5536 = vmatmul.mubr.msk.f32.vlgmr.msra.gmra.mxu0 %vm77_vm1, %v69_v3  ;;  %5542 = vmatprep.subr.mxu1 %v6427_v0  ;;  %v401_v20 = vld [vmem:[%s6746_s3] sm:$0x3f]  ;;  %v486_v26 = vld [vmem:[#allocation8 + $0x288] sm:$0xff]  ;;  %v483_v31 = vld [vmem:[#allocation8 + $0x270] sm:$0xff]  ;;  %s6429_s3 = smov [#allocation2]  }
  0x2b   :  { %5549 = vmatprep.subr.mxu0 %v6427_v0  ;;  %5553 = vmatprep.mubr.msk.f32.mxu0 %vm6428_vm0, %v6427_v0  ;;  %v318_v28 = vld [vmem:[#allocation8 + $0x240] sm:$0xff]  ;;  %v484_v30 = vld [vmem:[#allocation8 + $0x278] sm:$0xff]  ;;  %v569_v32 = vld [vmem:[#allocation8 + $0x2a8] sm:$0xff]  ;;  %s65_s13 = sshll.u32 %s6429_s3, 4  ;;  %s66_s13 = int_to_ptr.vmem [resolvable:$true] %s65_s13 }
  0x2c   :  { %5550 = vmatpush3.msra.mxu0 %v238_v6  ;;  %5543 = vmatpush3.msra.mxu1 %v153_v7  ;;  %v485_v29 = vld [vmem:[#allocation8 + $0x280] sm:$0xff]  ;;  %v567_v34 = vld [vmem:[#allocation8 + $0x298] sm:$0xff]  ;;  %v566_v35 = vld [vmem:[#allocation8 + $0x290] sm:$0xff]  ;;  %s6404_s14 = scalar_lea.vmem %s66_s13, 49152  ;;  %p6409_p2 = scmp.lt.s32.totalorder %s66_s13, %s66_s13 }
  0x2d   :  { %5551 = vmatprep.subr.mxu0 %v6427_v0  ;;  %5544 = vmatprep.subr.mxu1 %v6427_v0  ;;  %v568_v33 = vld [vmem:[#allocation8 + $0x2a0] sm:$0xff]  ;;  %v4942_v36 = vld [vmem:[#allocation8 + $0x452] ss:$0 sm:$0xff]  ;;  %v4948_v40 = vld [vmem:[#allocation8 + $0x455] ss:$0 sm:$0xff]  ;;  %p6405_p1 = scmp.ne.s32.totalorder %s66_s13, %s6404_s14  ;;  %p6410_p3 = scmp.lt.s32.totalorder %s6404_s14, %s6404_s14 }
  0x2e   :  { %5552 = vmatpush3.msra.mxu0 %v237_v8  ;;  %5545 = vmatpush3.msra.mxu1 %v152_v9  ;;  %v651_v46 = vld [vmem:[#allocation8 + $0x2c8] sm:$0xff]  ;;  %v650_v47 = vld [vmem:[#allocation8 + $0x2c0] sm:$0xff]  ;;  %v4946_v48 = vld [vmem:[#allocation8 + $0x454] ss:$0 sm:$0xff] }
  0x2f   :  { %5554 = vmatmul.mubr.msk.f32.vlgmr.msra.gmra.mxu0 %vm77_vm1, %v236_v10  ;;  %5567 = vmatprep.subr.mxu1 %v6427_v0  ;;  %v729_v53 = vld [vmem:[#allocation8 + $0x2e8] sm:$0xff]  ;;  %v649_v54 = vld [vmem:[#allocation8 + $0x2b8] sm:$0xff]  ;;  %v728_v55 = vld [vmem:[#allocation8 + $0x2e0] sm:$0xff]  ;;  %p6411_p4 = por %p6410_p3, %p6409_p2 }
  0x30   :  { %5556 = vmatprep.subr.mxu0 %v6427_v0  ;;  %5564 = vmatprep.mubr.msk.f32.mxu0 %vm6428_vm0, %v6427_v0  ;;  %v648_v56 = vld [vmem:[#allocation8 + $0x2b0] sm:$0xff]  ;;  %v727_v57 = vld [vmem:[#allocation8 + $0x2d8] sm:$0xff]  ;;  %v807_v1 = vld [vmem:[#allocation8 + $0x308] sm:$0xff] }
  0x31   :  { %5557 = vmatpush3.msra.mxu0 %v321_v11  ;;  %v726_v58 = vld [vmem:[#allocation8 + $0x2d0] sm:$0xff]  ;;  %v806_v3 = vld [vmem:[#allocation8 + $0x300] sm:$0xff]  ;;  %v890_v4 = vld [vmem:[#allocation8 + $0x348] sm:$0xff]  ;;  %p6412_p5 = pnand %p6411_p4, %p6405_p1 }
  0x32   :  { %5558 = vmatprep.subr.mxu0 %v6427_v0  ;;  %v4950_v59 = vld [vmem:[#allocation8 + $0x456] ss:$0 sm:$0xff]  ;;  %v805_v5 = vld [vmem:[#allocation8 + $0x2f8] sm:$0xff]  ;;  %v889_v6 = vld [vmem:[#allocation8 + $0x340] sm:$0xff] }
  0x33   :  { %5559 = vmatpush3.msra.mxu0 %v320_v12  ;;  %v804_v7 = vld [vmem:[#allocation8 + $0x2f0] sm:$0xff]  ;;  %v888_v11 = vld [vmem:[#allocation8 + $0x338] sm:$0xff] }
  0x34   :  { %5560 = vmatprep.subr.mxu0 %v6427_v0  ;;  %v887_v12 = vld [vmem:[#allocation8 + $0x330] sm:$0xff] }
  0x35   :  { %5561 = vmatpush3.msra.mxu0 %v319_v24 }
  0x36   :  { %5562 = vmatprep.subr.mxu0 %v6427_v0 }
  0x37   :  { %5563 = vmatpush3.msra.mxu0 %v318_v28 }
  0x38   :  { %5585 = vmatprep.subr.mxu0 %v6427_v0 }
  0xea   :  { %v147_v14 = vpop.f32.mrf.mxu0 }
  0xeb   :  { %v148_v15 = vadd.f32 %v4940_v13, %v147_v14  ;;  %v886_v13 = vld [vmem:[#allocation8 + $0x328] sm:$0xff]  ;;  %v885_v14 = vld [vmem:[#allocation8 + $0x320] sm:$0xff] }
  0xec   :  { %v5537_v16 = vpop.f32.mrf.mxu0 }
  0xed   :  { %v151_v17 = vmax.f32 %v148_v15, 0.0  ;;  %v884_v15 = vld [vmem:[#allocation8 + $0x318] sm:$0xff]  ;;  %v883_v16 = vld [vmem:[#allocation8 + $0x310] sm:$0xff] }
  0xef   :  { %5547 = vmatmul.mubr.msk.f32.vlgmr.msra.gmra.mxu1 %vm161_vm2, %v151_v17  ;;  %v313_v22 = vpop.f32.mrf.mxu0  ;;  %v4952_v17 = vld [vmem:[#allocation8 + $0x457] ss:$0 sm:$0xff] }
  0xf0   :  { %5568 = vmatpush3.msra.mxu1 %v403_v18  ;;  %5571 = vmatprep.mubr.msk.f32.mxu1 %vm6428_vm0, %v6427_v0  ;;  %v314_v23 = vadd.f32 %v4944_v21, %v313_v22 }
  0xf1   :  { %5569 = vmatprep.subr.mxu1 %v6427_v0  ;;  %v5555_v25 = vpop.f32.mrf.mxu0 }
  0xf2   :  { %5570 = vmatpush3.msra.mxu1 %v402_v19  ;;  %v317_v27 = vmax.f32 %v314_v23, 0.0 }
  0xf3   :  { %5572 = vmatmul.mubr.msk.f32.vlgmr.msra.gmra.mxu1 %vm77_vm1, %v401_v20  ;;  %5574 = vmatprep.subr.mxu1 %v6427_v0 }
  0xf4   :  { %5582 = vmatprep.mubr.msk.f32.mxu1 %vm6428_vm0, %v6427_v0  ;;  %5575 = vmatpush3.msra.mxu1 %v486_v26 }
  0xf5   :  { %5576 = vmatprep.subr.mxu1 %v6427_v0  ;;  %5565 = vmatmul.mubr.msk.f32.vlgmr.msra.gmra.mxu0 %vm161_vm2, %v317_v27 }
  0xf6   :  { %5577 = vmatpush3.msra.mxu1 %v485_v29  ;;  %5593 = vmatprep.mubr.msk.f32.mxu0 %vm6428_vm0, %v6427_v0 }
  0xf7   :  { %5578 = vmatprep.subr.mxu1 %v6427_v0  ;;  %5586 = vmatpush3.msra.mxu0 %v569_v32 }
  0xf8   :  { %5579 = vmatpush3.msra.mxu1 %v484_v30  ;;  %5587 = vmatprep.subr.mxu0 %v6427_v0 }
  0xf9   :  { %5580 = vmatprep.subr.mxu1 %v6427_v0  ;;  %5588 = vmatpush3.msra.mxu0 %v568_v33 }
  0xfa   :  { %5581 = vmatpush3.msra.mxu1 %v483_v31  ;;  %5589 = vmatprep.subr.mxu0 %v6427_v0 }
  0xfb   :  { %5596 = vmatprep.subr.mxu1 %v6427_v0  ;;  %5590 = vmatpush3.msra.mxu0 %v567_v34 }
  0xfc   :  { %5591 = vmatprep.subr.mxu0 %v6427_v0 }
  0xfd   :  { %5592 = vmatpush3.msra.mxu0 %v566_v35 }
  0xfe   :  { %5607 = vmatprep.subr.mxu0 %v6427_v0 }
 0x1af   :  { %v231_v37 = vpop.f32.mrf.mxu1 }
 0x1b0   :  { %v6521_v38 = vadd.f32 %v4942_v36, %v231_v37 }
 0x1b1   :  { %v5548_v39 = vpop.f32.mrf.mxu1 }
 0x1b2   :  { %v235_v41 = vmax.f32 %v6521_v38, 0.0 }
 0x1b3   :  { %v478_v42 = vpop.f32.mrf.mxu1 }
 0x1b4   :  { %v479_v43 = vadd.f32 %v4948_v40, %v478_v42 }
 0x1b5   :  { %v5573_v44 = vpop.f32.mrf.mxu1  ;;  %v396_v49 = vpop.f32.mrf.mxu0 }
 0x1b6   :  { %v482_v45 = vmax.f32 %v479_v43, 0.0  ;;  %v397_v50 = vadd.f32 %v4946_v48, %v396_v49 }
 0x1b7   :  { %v5566_v51 = vpop.f32.mrf.mxu0 }
 0x1b8   :  { %5583 = vmatmul.mubr.msk.f32.vlgmr.msra.gmra.mxu1 %vm161_vm2, %v482_v45  ;;  %v400_v52 = vmax.f32 %v397_v50, 0.0 }
 0x1b9   :  { %5597 = vmatpush3.msra.mxu1 %v651_v46  ;;  %5604 = vmatprep.mubr.msk.f32.mxu1 %vm6428_vm0, %v6427_v0 }
 0x1ba   :  { %5598 = vmatprep.subr.mxu1 %v6427_v0  ;;  %5594 = vmatmul.mubr.msk.f32.vlgmr.msra.gmra.mxu0 %vm161_vm2, %v400_v52 }
 0x1bb   :  { %5599 = vmatpush3.msra.mxu1 %v650_v47  ;;  %5608 = vmatpush3.msra.mxu0 %v729_v53 }
 0x1bc   :  { %5600 = vmatprep.subr.mxu1 %v6427_v0  ;;  %5609 = vmatprep.subr.mxu0 %v6427_v0 }
 0x1bd   :  { %5601 = vmatpush3.msra.mxu1 %v649_v54  ;;  %5610 = vmatpush3.msra.mxu0 %v728_v55 }
 0x1be   :  { %5602 = vmatprep.subr.mxu1 %v6427_v0  ;;  %5611 = vmatprep.subr.mxu0 %v6427_v0 }
 0x1bf   :  { %5603 = vmatpush3.msra.mxu1 %v648_v56  ;;  %5612 = vmatpush3.msra.mxu0 %v727_v57 }
 0x1c0   :  { %5618 = vmatprep.subr.mxu1 %v6427_v0  ;;  %5615 = vmatprep.mubr.msk.f32.mxu0 %vm6428_vm0, %v6427_v0 }
 0x1c1   :  { %5613 = vmatprep.subr.mxu0 %v6427_v0 }
 0x1c2   :  { %5614 = vmatpush3.msra.mxu0 %v726_v58 }
 0x1c3   :  { %5629 = vmatprep.subr.mxu0 %v6427_v0 }
 0x278   :  { %v561_v60 = vpop.f32.mrf.mxu1 }
 0x279   :  { %v562_v61 = vadd.f32 %v4950_v59, %v561_v60 }
 0x27a   :  { %v5584_v62 = vpop.f32.mrf.mxu1  ;;  %v644_v9 = vpop.f32.mrf.mxu0 }
 0x27b   :  { %v565_v63 = vmax.f32 %v562_v61, 0.0  ;;  %v645_v18 = vadd.f32 %v4952_v17, %v644_v9 }
 0x27c   :  { %v5595_v10 = vpop.f32.mrf.mxu0 }
 0x27d   :  { %v730_v2 = vrot.slane %v565_v63, 2  ;;  %5605 = vmatmul.mubr.msk.f32.vlgmr.msra.gmra.mxu1 %vm161_vm2, %v565_v63  ;;  %v808_v8 = vrot.slane %v565_v63, 4 }
 0x27e   :  { %5619 = vmatpush3.msra.mxu1 %v807_v1  ;;  %5626 = vmatprep.mubr.msk.f32.mxu1 %vm6428_vm0, %v6427_v0 }
 0x27f   :  { %5620 = vmatprep.subr.mxu1 %v6427_v0  ;;  %5616 = vmatmul.mubr.msk.f32.vlgmr.msra.gmra.mxu0 %vm161_vm2, %v730_v2 }
 0x280   :  { %5621 = vmatpush3.msra.mxu1 %v806_v3  ;;  %5630 = vmatpush3.msra.mxu0 %v890_v4 }
 0x281   :  { %5622 = vmatprep.subr.mxu1 %v6427_v0  ;;  %5631 = vmatprep.subr.mxu0 %v6427_v0 }
 0x282   :  { %5623 = vmatpush3.msra.mxu1 %v805_v5  ;;  %5632 = vmatpush3.msra.mxu0 %v889_v6 }
 0x283   :  { %5624 = vmatprep.subr.mxu1 %v6427_v0  ;;  %5633 = vmatprep.subr.mxu0 %v6427_v0 }
 0x284   :  { %5625 = vmatpush3.msra.mxu1 %v804_v7  ;;  %5645 = vmatprep.mubr.msk.f32.mxu0 %vm6428_vm0, %v6427_v0 }
 0x285   :  { %5627 = vmatmul.mubr.msk.f32.vlgmr.msra.gmra.mxu1 %vm161_vm2, %v808_v8  ;;  %5634 = vmatpush3.msra.mxu0 %v888_v11 }
 0x286   :  { %5635 = vmatprep.subr.mxu0 %v6427_v0 }
 0x287   :  { %5636 = vmatpush3.msra.mxu0 %v887_v12 }
 0x288   :  { %5637 = vmatprep.subr.mxu0 %v6427_v0 }
 0x289   :  { %5638 = vmatpush3.msra.mxu0 %v886_v13 }
 0x28a   :  { %5639 = vmatprep.subr.mxu0 %v6427_v0 }
 0x28b   :  { %5640 = vmatpush3.msra.mxu0 %v885_v14 }
 0x28c   :  { %5641 = vmatprep.subr.mxu0 %v6427_v0 }
 0x28d   :  { %5642 = vmatpush3.msra.mxu0 %v884_v15 }
 0x28e   :  { %5643 = vmatprep.subr.mxu0 %v6427_v0 }
 0x28f   :  { %5644 = vmatpush3.msra.mxu0 %v883_v16 }
 0x33d   :  { %v721_v19 = vpop.f32.mrf.mxu1 }
 0x33e   :  { %v725_v22 = vadd.f32 %v721_v19, %v645_v18 }
 0x33f   :  { %v5606_v20 = vpop.f32.mrf.mxu1  ;;  %v799_v21 = vpop.f32.mrf.mxu0 }
 0x340   :  { %v803_v24 = vadd.f32 %v799_v21, %v725_v22 }
 0x341   :  { %v5617_v23 = vpop.f32.mrf.mxu0 }
 0x345   :  { %v877_v25 = vpop.f32.mrf.mxu1 }
 0x346   :  { %v881_v26 = vadd.f32 %v877_v25, %v803_v24 }
 0x347   :  { %v5628_v27 = vpop.f32.mrf.mxu1 }
 0x348   :  { %v882_v28 = vmax.f32 %v881_v26, 0.0 }
 0x34a   :  { %5646 = vmatmul.mubr.msk.f32.vlgmr.msra.gmra.mxu0 %vm896_vm3, %v882_v28 }
 0x34b   :  { %6415 = shalt.err (!%p6412_p5)  }
 0x34c   :  { %68 = dma.hbm_to_vmem [thread:$0]  %s6748_s5, 49152, %s66_s13, [#allocation3]  ;;  %v4957_v29 = vld [vmem:[#allocation8 + $0x458] ss:$0 sm:$0xff] }
 0x40a   :  { %v966_v30 = vpop.f32.mrf.mxu0 }
 0x40b   :  { %v6558_v31 = vadd.f32 %v4957_v29, %v966_v30 }
 0x40c   :  { %v5647_v32 = vpop.f32.mrf.mxu0 }
 0x40d   :  { %6420 = dma.done.wait [#allocation3], 49152 }
 0x40e   :  { %6421 = vsyncadd [#allocation3], 4294918144  ;;  %v5755_v33 = vld [vmem:[#allocation2 + $0xe4] ss:$16 sps:$4 sm:$0xff]   ;;  %v5759_v35 = vld [vmem:[#allocation2 + $0xe0] ss:$16 sps:$4 sm:$0xff]   ;;  %v1366_v10 = vlaneseq }
 0x40f   :  { %v5757_v34 = vld [vmem:[#allocation2 + $0x2e4] ss:$16 sps:$4 sm:$0xff]   ;;  %3367 = vmatprep.subr.bf16.mxu1 %v5755_v33  ;;  %v5760_v36 = vld [vmem:[#allocation2 + $0x2e0] ss:$16 sps:$4 sm:$0xff]   ;;  %v6430_v8 = vmov 1966171168  }
 0x410   :  { %3408 = vmatprep.subr.bf16.mxu0 %v5757_v34  ;;  %v5761_v37 = vld [vmem:[#allocation2 + $0xc4] ss:$16 sps:$4 sm:$0xff]   ;;  %3368 = vmatpush1.bf16.msra.mxu1 %v5759_v35  ;;  %v5765_v40 = vld [vmem:[#allocation2 + $0xc0] ss:$16 sps:$4 sm:$0xff]   ;;  %v1364_v9 = vunpack.c.l.s4 %v6430_v8  ;;  %v6561_v15 = vshrl.u32 %v1366_v10, 7  ;;  %vm4078_vm4 = vcmask 1041408  }
 0x411   :  { %3409 = vmatpush1.bf16.msra.mxu0 %v5760_v36  ;;  %v5763_v39 = vld [vmem:[#allocation2 + $0x2c4] ss:$16 sps:$4 sm:$0xff]   ;;  %3369 = vmatprep.subr.bf16.mxu1 %v5761_v37  ;;  %v5766_v42 = vld [vmem:[#allocation2 + $0x2c0] ss:$16 sps:$4 sm:$0xff]   ;;  %vm4080_vm5 = vcmask 1043456   ;;  %vm4446_vm6 = vcmask 1045504  }
 0x412   :  { %3410 = vmatprep.subr.bf16.mxu0 %v5763_v39  ;;  %v5767_v43 = vld [vmem:[#allocation2 + $0xa4] ss:$16 sps:$4 sm:$0xff]   ;;  %v5771_v45 = vld [vmem:[#allocation2 + $0xa0] ss:$16 sps:$4 sm:$0xff]   ;;  %v1365_v14 = vunpack.c.0.s8 %v1364_v9  ;;  %vm4428_vm8 = vcmask 46080   ;;  %vm4442_vm9 = vcmask 48128  }
 0x413   :  { %v5769_v44 = vld [vmem:[#allocation2 + $0x2a4] ss:$16 sps:$4 sm:$0xff]   ;;  %v5772_v46 = vld [vmem:[#allocation2 + $0x2a0] ss:$16 sps:$4 sm:$0xff]   ;;  %vm4926_vm10 = vcmask 1024  }
 0x414   :  { %3370 = vmatpush1.bf16.msra.mxu1 %v5765_v40  ;;  %v5773_v47 = vld [vmem:[#allocation2 + $0x84] ss:$16 sps:$4 sm:$0xff]   ;;  %v5777_v49 = vld [vmem:[#allocation2 + $0x80] ss:$16 sps:$4 sm:$0xff]   ;;  %v6564_v21 = vsub.s32 %v1365_v14, %v6561_v15 }
 0x415   :  { %3411 = vmatpush1.bf16.msra.mxu0 %v5766_v42  ;;  %3371 = vmatprep.subr.bf16.mxu1 %v5767_v43  ;;  %v5775_v48 = vld [vmem:[#allocation2 + $0x284] ss:$16 sps:$4 sm:$0xff]   ;;  %v5778_v50 = vld [vmem:[#allocation2 + $0x280] ss:$16 sps:$4 sm:$0xff]  }
 0x416   :  { %3412 = vmatprep.subr.bf16.mxu0 %v5769_v44  ;;  %v5779_v51 = vld [vmem:[#allocation2 + $0x64] ss:$16 sps:$4 sm:$0xff]   ;;  %v5783_v53 = vld [vmem:[#allocation2 + $0x60] ss:$16 sps:$4 sm:$0xff]  }
 0x417   :  { %v5781_v52 = vld [vmem:[#allocation2 + $0x264] ss:$16 sps:$4 sm:$0xff]   ;;  %v5784_v54 = vld [vmem:[#allocation2 + $0x260] ss:$16 sps:$4 sm:$0xff]  }
 0x418   :  { %3372 = vmatpush1.bf16.msra.mxu1 %v5771_v45  ;;  %v5785_v55 = vld [vmem:[#allocation2 + $0x44] ss:$16 sps:$4 sm:$0xff]   ;;  %v5789_v57 = vld [vmem:[#allocation2 + $0x40] ss:$16 sps:$4 sm:$0xff]  }
 0x419   :  { %3413 = vmatpush1.bf16.msra.mxu0 %v5772_v46  ;;  %3373 = vmatprep.subr.bf16.mxu1 %v5773_v47  ;;  %v5787_v56 = vld [vmem:[#allocation2 + $0x244] ss:$16 sps:$4 sm:$0xff]   ;;  %v5790_v58 = vld [vmem:[#allocation2 + $0x240] ss:$16 sps:$4 sm:$0xff]  }
 0x41a   :  { %3414 = vmatprep.subr.bf16.mxu0 %v5775_v48  ;;  %v5791_v59 = vld [vmem:[#allocation2 + $0x24] ss:$16 sps:$4 sm:$0xff]   ;;  %v5795_v61 = vld [vmem:[#allocation2 + $0x20] ss:$16 sps:$4 sm:$0xff]  }
 0x41b   :  { %v5793_v60 = vld [vmem:[#allocation2 + $0x224] ss:$16 sps:$4 sm:$0xff]   ;;  %v5796_v62 = vld [vmem:[#allocation2 + $0x220] ss:$16 sps:$4 sm:$0xff]  }
 0x41c   :  { %3374 = vmatpush1.bf16.msra.mxu1 %v5777_v49  ;;  %v5797_v63 = vld [vmem:[#allocation2 + $0x4] ss:$16 sps:$4 sm:$0xff]   ;;  %v5801_v2 = vld [vmem:[#allocation2] ss:$16 sps:$4 sm:$0xff]  }
 0x41d   :  { %3415 = vmatpush1.bf16.msra.mxu0 %v5778_v50  ;;  %3375 = vmatprep.subr.bf16.mxu1 %v5779_v51  ;;  %v5799_v1 = vld [vmem:[#allocation2 + $0x204] ss:$16 sps:$4 sm:$0xff]   ;;  %v5802_v3 = vld [vmem:[#allocation2 + $0x200] ss:$16 sps:$4 sm:$0xff]  }
 0x41e   :  { %3416 = vmatprep.subr.bf16.mxu0 %v5781_v52  ;;  %v5803_v4 = vld [vmem:[#allocation2 + $0x1e4] ss:$16 sps:$4 sm:$0xff]   ;;  %v5807_v6 = vld [vmem:[#allocation2 + $0x1e0] ss:$16 sps:$4 sm:$0xff]  }
 0x41f   :  { %v5805_v5 = vld [vmem:[#allocation2 + $0x3e4] ss:$16 sps:$4 sm:$0xff]   ;;  %v5808_v7 = vld [vmem:[#allocation2 + $0x3e0] ss:$16 sps:$4 sm:$0xff]  }
 0x420   :  { %3376 = vmatpush1.bf16.msra.mxu1 %v5783_v53  ;;  %v5809_v11 = vld [vmem:[#allocation2 + $0x1c4] ss:$16 sps:$4 sm:$0xff]   ;;  %v5813_v13 = vld [vmem:[#allocation2 + $0x1c0] ss:$16 sps:$4 sm:$0xff]  }
 0x421   :  { %3417 = vmatpush1.bf16.msra.mxu0 %v5784_v54  ;;  %3377 = vmatprep.subr.bf16.mxu1 %v5785_v55  ;;  %v5811_v12 = vld [vmem:[#allocation2 + $0x3c4] ss:$16 sps:$4 sm:$0xff]   ;;  %v5814_v16 = vld [vmem:[#allocation2 + $0x3c0] ss:$16 sps:$4 sm:$0xff]  }
 0x422   :  { %3418 = vmatprep.subr.bf16.mxu0 %v5787_v56  ;;  %v5815_v17 = vld [vmem:[#allocation2 + $0x1a4] ss:$16 sps:$4 sm:$0xff]   ;;  %v5819_v19 = vld [vmem:[#allocation2 + $0x1a0] ss:$16 sps:$4 sm:$0xff]  }
 0x423   :  { %v5817_v18 = vld [vmem:[#allocation2 + $0x3a4] ss:$16 sps:$4 sm:$0xff]   ;;  %v5820_v20 = vld [vmem:[#allocation2 + $0x3a0] ss:$16 sps:$4 sm:$0xff]  }
 0x424   :  { %3378 = vmatpush1.bf16.msra.mxu1 %v5789_v57  ;;  %v5821_v22 = vld [vmem:[#allocation2 + $0x184] ss:$16 sps:$4 sm:$0xff]   ;;  %v5825_v25 = vld [vmem:[#allocation2 + $0x180] ss:$16 sps:$4 sm:$0xff]  }
 0x425   :  { %3419 = vmatpush1.bf16.msra.mxu0 %v5790_v58  ;;  %3379 = vmatprep.subr.bf16.mxu1 %v5791_v59  ;;  %v5823_v23 = vld [vmem:[#allocation2 + $0x384] ss:$16 sps:$4 sm:$0xff]   ;;  %v5826_v27 = vld [vmem:[#allocation2 + $0x380] ss:$16 sps:$4 sm:$0xff]  }
 0x426   :  { %3420 = vmatprep.subr.bf16.mxu0 %v5793_v60  ;;  %v974_v24 = vld [vmem:[%s6743_s0] sm:$0xff] }
 0x427   :  { %v1369_v26 = vrot.slane %v974_v24, %v6564_v21  ;;  %v5827_v28 = vld [vmem:[#allocation2 + $0x164] ss:$16 sps:$4 sm:$0xff]   ;;  %v5831_v32 = vld [vmem:[#allocation2 + $0x160] ss:$16 sps:$4 sm:$0xff]   ;;  %v1362_v39 = vcombine.high %v974_v24, %v974_v24 }
 0x428   :  { %3380 = vmatpush1.bf16.msra.mxu1 %v5795_v61  ;;  %v5829_v29 = vld [vmem:[#allocation2 + $0x364] ss:$16 sps:$4 sm:$0xff]   ;;  %v5832_v34 = vld [vmem:[#allocation2 + $0x360] ss:$16 sps:$4 sm:$0xff]  }
 0x429   :  { %3421 = vmatpush1.bf16.msra.mxu0 %v5796_v62  ;;  %3381 = vmatprep.subr.bf16.mxu1 %v5797_v63  ;;  %v1377_v30 = vcombine.high %v1369_v26, %v1369_v26  ;;  %v5833_v35 = vld [vmem:[#allocation2 + $0x144] ss:$16 sps:$4 sm:$0xff]   ;;  %v5837_v40 = vld [vmem:[#allocation2 + $0x140] ss:$16 sps:$4 sm:$0xff]   ;;  %v6580_v45 = vrot.slane %v1362_v39, %v6564_v21  ;;  %v6585_v52 = vrot.slane %v1369_v26, %v6564_v21 }
 0x42a   :  { %3422 = vmatprep.subr.bf16.mxu0 %v5799_v1  ;;  %v5835_v36 = vld [vmem:[#allocation2 + $0x344] ss:$16 sps:$4 sm:$0xff]   ;;  %v5838_v42 = vld [vmem:[#allocation2 + $0x340] ss:$16 sps:$4 sm:$0xff]  }
 0x42b   :  { %v6571_v33 = vrot.slane %v1377_v30, %v6564_v21  ;;  %v5839_v43 = vld [vmem:[#allocation2 + $0x124] ss:$16 sps:$4 sm:$0xff]   ;;  %v5843_v46 = vld [vmem:[#allocation2 + $0x120] ss:$16 sps:$4 sm:$0xff]   ;;  %v1378_v50 = vcombine.high %v6580_v45, %v6580_v45  ;;  %v6592_v57 = vcombine.high %v6585_v52, %v6585_v52 }
 0x42c   :  { %3382 = vmatpush1.bf16.msra.mxu1 %v5801_v2  ;;  %v5841_v44 = vld [vmem:[#allocation2 + $0x324] ss:$16 sps:$4 sm:$0xff]   ;;  %v5844_v47 = vld [vmem:[#allocation2 + $0x320] ss:$16 sps:$4 sm:$0xff]  }
 0x42d   :  { %3423 = vmatpush1.bf16.msra.mxu0 %v5802_v3  ;;  %3383 = vmatprep.subr.bf16.mxu1 %v5803_v4  ;;  %v6575_v37 = vcombine.high %v6571_v33, %v6571_v33  ;;  %v5845_v48 = vld [vmem:[#allocation2 + $0x104] ss:$16 sps:$4 sm:$0xff]   ;;  %v5849_v51 = vld [vmem:[#allocation2 + $0x100] ss:$16 sps:$4 sm:$0xff]   ;;  %v6588_v56 = vrot.slane %v1378_v50, %v6564_v21 }
 0x42e   :  { %3424 = vmatprep.subr.bf16.mxu0 %v5805_v5  ;;  %3399 = vmatprep.mubr.bf16.mxu1 %v6571_v33  ;;  %v5847_v49 = vld [vmem:[#allocation2 + $0x304] ss:$16 sps:$4 sm:$0xff]   ;;  %v5850_v53 = vld [vmem:[#allocation2 + $0x300] ss:$16 sps:$4 sm:$0xff]  }
 0x42f   :  { %3440 = vmatprep.mubr.bf16.mxu0 %v6575_v37  ;;  %v5853_v54 = vld [vmem:[#allocation2 + $0x4e4] ss:$16 sps:$4 sm:$0xff]   ;;  %v5851_v58 = vld [vmem:[#allocation2 + $0x4e0] ss:$16 sps:$4 sm:$0xff]   ;;  %v6596_v62 = vcombine.high %v6588_v56, %v6588_v56 }
 0x430   :  { %3384 = vmatpush2.bf16.msra.mxu1 %v5807_v6  ;;  %v5856_v55 = vld [vmem:[#allocation2 + $0x6e4] ss:$16 sps:$4 sm:$0xff]   ;;  %v5854_v59 = vld [vmem:[#allocation2 + $0x6e0] ss:$16 sps:$4 sm:$0xff]  }
 0x431   :  { %3425 = vmatpush2.bf16.msra.mxu0 %v5808_v7  ;;  %3385 = vmatprep.subr.bf16.mxu1 %v5809_v11  ;;  %v5859_v60 = vld [vmem:[#allocation2 + $0x4c4] ss:$16 sps:$4 sm:$0xff]   ;;  %v5857_v63 = vld [vmem:[#allocation2 + $0x4c0] ss:$16 sps:$4 sm:$0xff]  }
 0x432   :  { %3426 = vmatprep.subr.bf16.mxu0 %v5811_v12  ;;  %v5862_v61 = vld [vmem:[#allocation2 + $0x6c4] ss:$16 sps:$4 sm:$0xff]   ;;  %v5860_v1 = vld [vmem:[#allocation2 + $0x6c0] ss:$16 sps:$4 sm:$0xff]  }
 0x433   :  { %v5865_v2 = vld [vmem:[#allocation2 + $0x4a4] ss:$16 sps:$4 sm:$0xff]   ;;  %v5863_v4 = vld [vmem:[#allocation2 + $0x4a0] ss:$16 sps:$4 sm:$0xff]  }
 0x434   :  { %3386 = vmatpush2.bf16.msra.mxu1 %v5813_v13  ;;  %v5868_v3 = vld [vmem:[#allocation2 + $0x6a4] ss:$16 sps:$4 sm:$0xff]   ;;  %v5866_v5 = vld [vmem:[#allocation2 + $0x6a0] ss:$16 sps:$4 sm:$0xff]  }
 0x435   :  { %3427 = vmatpush2.bf16.msra.mxu0 %v5814_v16  ;;  %3387 = vmatprep.subr.bf16.mxu1 %v5815_v17  ;;  %v5871_v6 = vld [vmem:[#allocation2 + $0x484] ss:$16 sps:$4 sm:$0xff]   ;;  %v5869_v8 = vld [vmem:[#allocation2 + $0x480] ss:$16 sps:$4 sm:$0xff]  }
 0x436   :  { %3428 = vmatprep.subr.bf16.mxu0 %v5817_v18  ;;  %v5874_v7 = vld [vmem:[#allocation2 + $0x684] ss:$16 sps:$4 sm:$0xff]   ;;  %v5872_v9 = vld [vmem:[#allocation2 + $0x680] ss:$16 sps:$4 sm:$0xff]  }
 0x437   :  { %v5877_v11 = vld [vmem:[#allocation2 + $0x464] ss:$16 sps:$4 sm:$0xff]   ;;  %v5875_v13 = vld [vmem:[#allocation2 + $0x460] ss:$16 sps:$4 sm:$0xff]  }
 0x438   :  { %3388 = vmatpush2.bf16.msra.mxu1 %v5819_v19  ;;  %v5880_v12 = vld [vmem:[#allocation2 + $0x664] ss:$16 sps:$4 sm:$0xff]   ;;  %v5878_v14 = vld [vmem:[#allocation2 + $0x660] ss:$16 sps:$4 sm:$0xff]  }
 0x439   :  { %3429 = vmatpush2.bf16.msra.mxu0 %v5820_v20  ;;  %3389 = vmatprep.subr.bf16.mxu1 %v5821_v22  ;;  %v5883_v16 = vld [vmem:[#allocation2 + $0x444] ss:$16 sps:$4 sm:$0xff]   ;;  %v5881_v18 = vld [vmem:[#allocation2 + $0x440] ss:$16 sps:$4 sm:$0xff]  }
 0x43a   :  { %3430 = vmatprep.subr.bf16.mxu0 %v5823_v23  ;;  %v5886_v17 = vld [vmem:[#allocation2 + $0x644] ss:$16 sps:$4 sm:$0xff]   ;;  %v5884_v19 = vld [vmem:[#allocation2 + $0x640] ss:$16 sps:$4 sm:$0xff]  }
 0x43b   :  { %v5889_v20 = vld [vmem:[#allocation2 + $0x424] ss:$16 sps:$4 sm:$0xff]   ;;  %v5887_v23 = vld [vmem:[#allocation2 + $0x420] ss:$16 sps:$4 sm:$0xff]  }
 0x43c   :  { %3390 = vmatpush2.bf16.msra.mxu1 %v5825_v25  ;;  %v5892_v22 = vld [vmem:[#allocation2 + $0x624] ss:$16 sps:$4 sm:$0xff]   ;;  %v5890_v24 = vld [vmem:[#allocation2 + $0x620] ss:$16 sps:$4 sm:$0xff]  }
 0x43d   :  { %3431 = vmatpush2.bf16.msra.mxu0 %v5826_v27  ;;  %3391 = vmatprep.subr.bf16.mxu1 %v5827_v28  ;;  %v5895_v25 = vld [vmem:[#allocation2 + $0x404] ss:$16 sps:$4 sm:$0xff]   ;;  %v5893_v27 = vld [vmem:[#allocation2 + $0x400] ss:$16 sps:$4 sm:$0xff]  }
 0x43e   :  { %3432 = vmatprep.subr.bf16.mxu0 %v5829_v29  ;;  %v5898_v26 = vld [vmem:[#allocation2 + $0x604] ss:$16 sps:$4 sm:$0xff]   ;;  %v5896_v28 = vld [vmem:[#allocation2 + $0x600] ss:$16 sps:$4 sm:$0xff]  }
 0x43f   :  { %v5901_v29 = vld [vmem:[#allocation2 + $0x5e4] ss:$16 sps:$4 sm:$0xff]   ;;  %v5905_v39 = vld [vmem:[#allocation2 + $0x5c0] ss:$16 sps:$4 sm:$0xff]  }
 0x440   :  { %3392 = vmatpush2.bf16.msra.mxu1 %v5831_v32  ;;  %v5904_v30 = vld [vmem:[#allocation2 + $0x7e4] ss:$16 sps:$4 sm:$0xff]   ;;  %v5899_v32 = vld [vmem:[#allocation2 + $0x5e0] ss:$16 sps:$4 sm:$0xff]  }
 0x441   :  { %3433 = vmatpush2.bf16.msra.mxu0 %v5832_v34  ;;  %3393 = vmatprep.subr.bf16.mxu1 %v5833_v35  ;;  %v5902_v34 = vld [vmem:[#allocation2 + $0x7e0] ss:$16 sps:$4 sm:$0xff]   ;;  %v5907_v35 = vld [vmem:[#allocation2 + $0x5c4] ss:$16 sps:$4 sm:$0xff]  }
 0x442   :  { %3434 = vmatprep.subr.bf16.mxu0 %v5835_v36  ;;  %v5910_v36 = vld [vmem:[#allocation2 + $0x7c4] ss:$16 sps:$4 sm:$0xff]   ;;  %v5920_v50 = vld [vmem:[#allocation2 + $0x780] ss:$16 sps:$4 sm:$0xff]  }
 0x443   :  { %v4165_v38 = vld [vmem:[#allocation8 + $0x378] sm:$0xff] }
 0x444   :  { %3394 = vmatpush2.bf16.msra.mxu1 %v5837_v40  ;;  %v5908_v40 = vld [vmem:[#allocation2 + $0x7c0] ss:$16 sps:$4 sm:$0xff]  }
 0x445   :  { %3435 = vmatpush2.bf16.msra.mxu0 %v5838_v42  ;;  %3395 = vmatprep.subr.bf16.mxu1 %v5839_v43  ;;  %v5913_v42 = vld [vmem:[#allocation2 + $0x5a4] ss:$16 sps:$4 sm:$0xff]  }
 0x446   :  { %3436 = vmatprep.subr.bf16.mxu0 %v5841_v44  ;;  %v5916_v43 = vld [vmem:[#allocation2 + $0x7a4] ss:$16 sps:$4 sm:$0xff]   ;;  %v5911_v44 = vld [vmem:[#allocation2 + $0x5a0] ss:$16 sps:$4 sm:$0xff]  }
 0x448   :  { %3396 = vmatpush2.bf16.msra.mxu1 %v5843_v46  ;;  %v5914_v46 = vld [vmem:[#allocation2 + $0x7a0] ss:$16 sps:$4 sm:$0xff]  }
 0x449   :  { %3437 = vmatpush2.bf16.msra.mxu0 %v5844_v47  ;;  %3397 = vmatprep.subr.bf16.mxu1 %v5845_v48  ;;  %v5919_v47 = vld [vmem:[#allocation2 + $0x584] ss:$16 sps:$4 sm:$0xff]  }
 0x44a   :  { %3438 = vmatprep.subr.bf16.mxu0 %v5847_v49  ;;  %v5922_v48 = vld [vmem:[#allocation2 + $0x784] ss:$16 sps:$4 sm:$0xff]   ;;  %v5917_v49 = vld [vmem:[#allocation2 + $0x580] ss:$16 sps:$4 sm:$0xff]  }
 0x44c   :  { %3398 = vmatpush2.bf16.msra.mxu1 %v5849_v51  ;;  %v5925_v51 = vld [vmem:[#allocation2 + $0x564] ss:$16 sps:$4 sm:$0xff]  }
 0x44d   :  { %3439 = vmatpush2.bf16.msra.mxu0 %v5850_v53  ;;  %3449 = vmatprep.subr.bf16.mxu1 %v5853_v54  ;;  %v5928_v53 = vld [vmem:[#allocation2 + $0x764] ss:$16 sps:$4 sm:$0xff]   ;;  %v5923_v54 = vld [vmem:[#allocation2 + $0x560] ss:$16 sps:$4 sm:$0xff]  }
 0x44e   :  { %3490 = vmatprep.subr.bf16.mxu0 %v5856_v55  ;;  %v5926_v55 = vld [vmem:[#allocation2 + $0x760] ss:$16 sps:$4 sm:$0xff]  }
 0x44f   :  { %3400 = vmatmul.mubr.bf16.vlgmr.msra.gmra.mxu1 %v6585_v52 }
 0x450   :  { %3441 = vmatmul.mubr.bf16.vlgmr.msra.gmra.mxu0 %v6592_v57  ;;  %3450 = vmatpush1.bf16.msra.mxu1 %v5851_v58  ;;  %v5931_v58 = vld [vmem:[#allocation2 + $0x544] ss:$16 sps:$4 sm:$0xff]  }
 0x451   :  { %3491 = vmatpush1.bf16.msra.mxu0 %v5854_v59  ;;  %3451 = vmatprep.subr.bf16.mxu1 %v5859_v60  ;;  %v5934_v59 = vld [vmem:[#allocation2 + $0x744] ss:$16 sps:$4 sm:$0xff]   ;;  %v5929_v60 = vld [vmem:[#allocation2 + $0x540] ss:$16 sps:$4 sm:$0xff]  }
 0x452   :  { %3492 = vmatprep.subr.bf16.mxu0 %v5862_v61  ;;  %3481 = vmatprep.mubr.bf16.mxu1 %v6588_v56  ;;  %v5932_v61 = vld [vmem:[#allocation2 + $0x740] ss:$16 sps:$4 sm:$0xff]  }
 0x453   :  { %3522 = vmatprep.mubr.bf16.mxu0 %v6596_v62 }
 0x454   :  { %3452 = vmatpush1.bf16.msra.mxu1 %v5857_v63  ;;  %v5937_v63 = vld [vmem:[#allocation2 + $0x524] ss:$16 sps:$4 sm:$0xff]  }
 0x455   :  { %3493 = vmatpush1.bf16.msra.mxu0 %v5860_v1  ;;  %3453 = vmatprep.subr.bf16.mxu1 %v5865_v2  ;;  %v5940_v1 = vld [vmem:[#allocation2 + $0x724] ss:$16 sps:$4 sm:$0xff]   ;;  %v5935_v2 = vld [vmem:[#allocation2 + $0x520] ss:$16 sps:$4 sm:$0xff]  }
 0x456   :  { %3494 = vmatprep.subr.bf16.mxu0 %v5868_v3  ;;  %v5938_v3 = vld [vmem:[#allocation2 + $0x720] ss:$16 sps:$4 sm:$0xff]  }
 0x458   :  { %3454 = vmatpush1.bf16.msra.mxu1 %v5863_v4  ;;  %v5943_v4 = vld [vmem:[#allocation2 + $0x504] ss:$16 sps:$4 sm:$0xff]  }
 0x459   :  { %3495 = vmatpush1.bf16.msra.mxu0 %v5866_v5  ;;  %3455 = vmatprep.subr.bf16.mxu1 %v5871_v6  ;;  %v5946_v5 = vld [vmem:[#allocation2 + $0x704] ss:$16 sps:$4 sm:$0xff]   ;;  %v5941_v6 = vld [vmem:[#allocation2 + $0x500] ss:$16 sps:$4 sm:$0xff]  }
 0x45a   :  { %3496 = vmatprep.subr.bf16.mxu0 %v5874_v7  ;;  %v6604_v7 = vrot.slane %v6580_v45, %v6564_v21  ;;  %v6613_v45 = vld.sshfl [vmem:[%s6743_s0 + $0x8] sm:$0x33 pattern:$0x75316420] }
 0x45c   :  { %3456 = vmatpush1.bf16.msra.mxu1 %v5869_v8  ;;  %v5944_v8 = vld [vmem:[#allocation2 + $0x700] ss:$16 sps:$4 sm:$0xff]  }
 0x45d   :  { %3497 = vmatpush1.bf16.msra.mxu0 %v5872_v9  ;;  %3457 = vmatprep.subr.bf16.mxu1 %v5877_v11  ;;  %v5950_v9 = vld [vmem:[#allocation2 + $0x8e4] ss:$16 sps:$4 sm:$0xff]  }
 0x45e   :  { %3498 = vmatprep.subr.bf16.mxu0 %v5880_v12  ;;  %v5953_v11 = vld [vmem:[#allocation2 + $0xae4] ss:$16 sps:$4 sm:$0xff]   ;;  %v5948_v12 = vld [vmem:[#allocation2 + $0x8e0] ss:$16 sps:$4 sm:$0xff]  }
 0x460   :  { %3458 = vmatpush1.bf16.msra.mxu1 %v5875_v13  ;;  %v6608_v13 = vcombine.high %v6604_v7, %v6604_v7 }
 0x461   :  { %3499 = vmatpush1.bf16.msra.mxu0 %v5878_v14  ;;  %3459 = vmatprep.subr.bf16.mxu1 %v5883_v16  ;;  %v5951_v14 = vld [vmem:[#allocation2 + $0xae0] ss:$16 sps:$4 sm:$0xff]   ;;  %v5956_v16 = vld [vmem:[#allocation2 + $0x8c4] ss:$16 sps:$4 sm:$0xff]  }
 0x462   :  { %3500 = vmatprep.subr.bf16.mxu0 %v5886_v17  ;;  %v5959_v17 = vld [vmem:[#allocation2 + $0xac4] ss:$16 sps:$4 sm:$0xff]  }
 0x464   :  { %3460 = vmatpush1.bf16.msra.mxu1 %v5881_v18  ;;  %v1418_v18 = vcombine.high %v6613_v45, %v6613_v45 }
 0x465   :  { %3501 = vmatpush1.bf16.msra.mxu0 %v5884_v19  ;;  %3461 = vmatprep.subr.bf16.mxu1 %v5889_v20  ;;  %v5954_v19 = vld [vmem:[#allocation2 + $0x8c0] ss:$16 sps:$4 sm:$0xff]  }
 0x466   :  { %3502 = vmatprep.subr.bf16.mxu0 %v5892_v22  ;;  %v6620_v20 = vrot.slane %v1418_v18, %v6564_v21  ;;  %v5957_v22 = vld [vmem:[#allocation2 + $0xac0] ss:$16 sps:$4 sm:$0xff]  }
 0x467   :  { %v6023_v18 = vld [vmem:[#allocation2 + $0xb60] ss:$16 sps:$4 sm:$0xff]  }
 0x468   :  { %3462 = vmatpush1.bf16.msra.mxu1 %v5887_v23  ;;  %v5962_v23 = vld [vmem:[#allocation2 + $0x8a4] ss:$16 sps:$4 sm:$0xff]  }
 0x469   :  { %3503 = vmatpush1.bf16.msra.mxu0 %v5890_v24  ;;  %3463 = vmatprep.subr.bf16.mxu1 %v5895_v25  ;;  %v5965_v24 = vld [vmem:[#allocation2 + $0xaa4] ss:$16 sps:$4 sm:$0xff]   ;;  %v6624_v25 = vcombine.high %v6620_v20, %v6620_v20 }
 0x46a   :  { %3504 = vmatprep.subr.bf16.mxu0 %v5898_v26  ;;  %v5960_v26 = vld [vmem:[#allocation2 + $0x8a0] ss:$16 sps:$4 sm:$0xff]  }
 0x46c   :  { %3464 = vmatpush1.bf16.msra.mxu1 %v5893_v27  ;;  %v5963_v27 = vld [vmem:[#allocation2 + $0xaa0] ss:$16 sps:$4 sm:$0xff]  }
 0x46d   :  { %3505 = vmatpush1.bf16.msra.mxu0 %v5896_v28  ;;  %3465 = vmatprep.subr.bf16.mxu1 %v5901_v29  ;;  %v5968_v28 = vld [vmem:[#allocation2 + $0x884] ss:$16 sps:$4 sm:$0xff]  }
 0x46e   :  { %3506 = vmatprep.subr.bf16.mxu0 %v5904_v30  ;;  %v5971_v29 = vld [vmem:[#allocation2 + $0xa84] ss:$16 sps:$4 sm:$0xff]   ;;  %v5966_v30 = vld [vmem:[#allocation2 + $0x880] ss:$16 sps:$4 sm:$0xff]  }
 0x470   :  { %3466 = vmatpush2.bf16.msra.mxu1 %v5899_v32  ;;  %v5969_v32 = vld [vmem:[#allocation2 + $0xa80] ss:$16 sps:$4 sm:$0xff]  }
 0x471   :  { %3507 = vmatpush2.bf16.msra.mxu0 %v5902_v34  ;;  %3467 = vmatprep.subr.bf16.mxu1 %v5907_v35  ;;  %v5974_v34 = vld [vmem:[#allocation2 + $0x864] ss:$16 sps:$4 sm:$0xff]  }
 0x472   :  { %3508 = vmatprep.subr.bf16.mxu0 %v5910_v36  ;;  %v5977_v35 = vld [vmem:[#allocation2 + $0xa64] ss:$16 sps:$4 sm:$0xff]   ;;  %v5972_v36 = vld [vmem:[#allocation2 + $0x860] ss:$16 sps:$4 sm:$0xff]  }
 0x474   :  { %3468 = vmatpush2.bf16.msra.mxu1 %v5905_v39  ;;  %v5975_v39 = vld [vmem:[#allocation2 + $0xa60] ss:$16 sps:$4 sm:$0xff]  }
 0x475   :  { %3509 = vmatpush2.bf16.msra.mxu0 %v5908_v40  ;;  %3469 = vmatprep.subr.bf16.mxu1 %v5913_v42  ;;  %v5980_v40 = vld [vmem:[#allocation2 + $0x844] ss:$16 sps:$4 sm:$0xff]  }
 0x476   :  { %3510 = vmatprep.subr.bf16.mxu0 %v5916_v43  ;;  %v5983_v42 = vld [vmem:[#allocation2 + $0xa44] ss:$16 sps:$4 sm:$0xff]   ;;  %v5978_v43 = vld [vmem:[#allocation2 + $0x840] ss:$16 sps:$4 sm:$0xff]  }
 0x478   :  { %3470 = vmatpush2.bf16.msra.mxu1 %v5911_v44  ;;  %v5981_v44 = vld [vmem:[#allocation2 + $0xa40] ss:$16 sps:$4 sm:$0xff]  }
 0x479   :  { %3511 = vmatpush2.bf16.msra.mxu0 %v5914_v46  ;;  %3471 = vmatprep.subr.bf16.mxu1 %v5919_v47  ;;  %v5986_v46 = vld [vmem:[#allocation2 + $0x824] ss:$16 sps:$4 sm:$0xff]  }
 0x47a   :  { %3512 = vmatprep.subr.bf16.mxu0 %v5922_v48  ;;  %v5989_v47 = vld [vmem:[#allocation2 + $0xa24] ss:$16 sps:$4 sm:$0xff]   ;;  %v5984_v48 = vld [vmem:[#allocation2 + $0x820] ss:$16 sps:$4 sm:$0xff]  }
 0x47c   :  { %3472 = vmatpush2.bf16.msra.mxu1 %v5917_v49  ;;  %v5987_v49 = vld [vmem:[#allocation2 + $0xa20] ss:$16 sps:$4 sm:$0xff]  }
 0x47d   :  { %3513 = vmatpush2.bf16.msra.mxu0 %v5920_v50  ;;  %3473 = vmatprep.subr.bf16.mxu1 %v5925_v51  ;;  %v5992_v50 = vld [vmem:[#allocation2 + $0x804] ss:$16 sps:$4 sm:$0xff]  }
 0x47e   :  { %3514 = vmatprep.subr.bf16.mxu0 %v5928_v53  ;;  %v5995_v51 = vld [vmem:[#allocation2 + $0xa04] ss:$16 sps:$4 sm:$0xff]   ;;  %v5990_v53 = vld [vmem:[#allocation2 + $0x800] ss:$16 sps:$4 sm:$0xff]  }
 0x480   :  { %3474 = vmatpush2.bf16.msra.mxu1 %v5923_v54  ;;  %v5993_v54 = vld [vmem:[#allocation2 + $0xa00] ss:$16 sps:$4 sm:$0xff]  }
 0x481   :  { %3515 = vmatpush2.bf16.msra.mxu0 %v5926_v55  ;;  %3475 = vmatprep.subr.bf16.mxu1 %v5931_v58  ;;  %v5998_v55 = vld [vmem:[#allocation2 + $0x9e4] ss:$16 sps:$4 sm:$0xff]  }
 0x482   :  { %3516 = vmatprep.subr.bf16.mxu0 %v5934_v59  ;;  %v6001_v58 = vld [vmem:[#allocation2 + $0xbe4] ss:$16 sps:$4 sm:$0xff]   ;;  %v5996_v59 = vld [vmem:[#allocation2 + $0x9e0] ss:$16 sps:$4 sm:$0xff]  }
 0x484   :  { %3476 = vmatpush2.bf16.msra.mxu1 %v5929_v60  ;;  %v5999_v60 = vld [vmem:[#allocation2 + $0xbe0] ss:$16 sps:$4 sm:$0xff]  }
 0x485   :  { %3517 = vmatpush2.bf16.msra.mxu0 %v5932_v61  ;;  %3477 = vmatprep.subr.bf16.mxu1 %v5937_v63  ;;  %v6004_v61 = vld [vmem:[#allocation2 + $0x9c4] ss:$16 sps:$4 sm:$0xff]  }
 0x486   :  { %3518 = vmatprep.subr.bf16.mxu0 %v5940_v1  ;;  %v6007_v63 = vld [vmem:[#allocation2 + $0xbc4] ss:$16 sps:$4 sm:$0xff]   ;;  %v6002_v1 = vld [vmem:[#allocation2 + $0x9c0] ss:$16 sps:$4 sm:$0xff]  }
 0x488   :  { %3478 = vmatpush2.bf16.msra.mxu1 %v5935_v2  ;;  %v6005_v2 = vld [vmem:[#allocation2 + $0xbc0] ss:$16 sps:$4 sm:$0xff]  }
 0x489   :  { %3519 = vmatpush2.bf16.msra.mxu0 %v5938_v3  ;;  %3479 = vmatprep.subr.bf16.mxu1 %v5943_v4  ;;  %v6010_v3 = vld [vmem:[#allocation2 + $0x9a4] ss:$16 sps:$4 sm:$0xff]  }
 0x48a   :  { %3520 = vmatprep.subr.bf16.mxu0 %v5946_v5  ;;  %v6013_v4 = vld [vmem:[#allocation2 + $0xba4] ss:$16 sps:$4 sm:$0xff]   ;;  %v6008_v5 = vld [vmem:[#allocation2 + $0x9a0] ss:$16 sps:$4 sm:$0xff]  }
 0x48c   :  { %3480 = vmatpush2.bf16.msra.mxu1 %v5941_v6  ;;  %v6011_v6 = vld [vmem:[#allocation2 + $0xba0] ss:$16 sps:$4 sm:$0xff]  }
 0x48d   :  { %3521 = vmatpush2.bf16.msra.mxu0 %v5944_v8  ;;  %3531 = vmatprep.subr.bf16.mxu1 %v5950_v9  ;;  %v6016_v8 = vld [vmem:[#allocation2 + $0x984] ss:$16 sps:$4 sm:$0xff]  }
 0x48e   :  { %3572 = vmatprep.subr.bf16.mxu0 %v5953_v11  ;;  %v6019_v9 = vld [vmem:[#allocation2 + $0xb84] ss:$16 sps:$4 sm:$0xff]   ;;  %v6014_v11 = vld [vmem:[#allocation2 + $0x980] ss:$16 sps:$4 sm:$0xff]  }
 0x48f   :  { %3482 = vmatmul.mubr.bf16.vlgmr.msra.gmra.mxu1 %v6604_v7 }
 0x490   :  { %3523 = vmatmul.mubr.bf16.vlgmr.msra.gmra.mxu0 %v6608_v13  ;;  %3532 = vmatpush1.bf16.msra.mxu1 %v5948_v12  ;;  %v6017_v12 = vld [vmem:[#allocation2 + $0xb80] ss:$16 sps:$4 sm:$0xff]  }
 0x491   :  { %3573 = vmatpush1.bf16.msra.mxu0 %v5951_v14  ;;  %3533 = vmatprep.subr.bf16.mxu1 %v5956_v16  ;;  %v6022_v14 = vld [vmem:[#allocation2 + $0x964] ss:$16 sps:$4 sm:$0xff]  }
 0x492   :  { %3574 = vmatprep.subr.bf16.mxu0 %v5959_v17  ;;  %3563 = vmatprep.mubr.bf16.mxu1 %v6620_v20  ;;  %v6025_v16 = vld [vmem:[#allocation2 + $0xb64] ss:$16 sps:$4 sm:$0xff]   ;;  %v6020_v17 = vld [vmem:[#allocation2 + $0x960] ss:$16 sps:$4 sm:$0xff]  }
 0x493   :  { %3604 = vmatprep.mubr.bf16.mxu0 %v6624_v25 }
 0x494   :  { %3534 = vmatpush1.bf16.msra.mxu1 %v5954_v19  ;;  %v6028_v19 = vld [vmem:[#allocation2 + $0x944] ss:$16 sps:$4 sm:$0xff]  }
 0x495   :  { %3575 = vmatpush1.bf16.msra.mxu0 %v5957_v22  ;;  %3535 = vmatprep.subr.bf16.mxu1 %v5962_v23  ;;  %v6031_v22 = vld [vmem:[#allocation2 + $0xb44] ss:$16 sps:$4 sm:$0xff]   ;;  %v6026_v23 = vld [vmem:[#allocation2 + $0x940] ss:$16 sps:$4 sm:$0xff]  }
 0x496   :  { %3576 = vmatprep.subr.bf16.mxu0 %v5965_v24  ;;  %v6029_v24 = vld [vmem:[#allocation2 + $0xb40] ss:$16 sps:$4 sm:$0xff]  }
 0x498   :  { %3536 = vmatpush1.bf16.msra.mxu1 %v5960_v26  ;;  %v6034_v26 = vld [vmem:[#allocation2 + $0x924] ss:$16 sps:$4 sm:$0xff]  }
 0x499   :  { %3577 = vmatpush1.bf16.msra.mxu0 %v5963_v27  ;;  %3537 = vmatprep.subr.bf16.mxu1 %v5968_v28  ;;  %v6037_v27 = vld [vmem:[#allocation2 + $0xb24] ss:$16 sps:$4 sm:$0xff]   ;;  %v6032_v28 = vld [vmem:[#allocation2 + $0x920] ss:$16 sps:$4 sm:$0xff]  }
 0x49a   :  { %3578 = vmatprep.subr.bf16.mxu0 %v5971_v29  ;;  %v6035_v29 = vld [vmem:[#allocation2 + $0xb20] ss:$16 sps:$4 sm:$0xff]  }
 0x49c   :  { %3538 = vmatpush1.bf16.msra.mxu1 %v5966_v30  ;;  %v6040_v30 = vld [vmem:[#allocation2 + $0x904] ss:$16 sps:$4 sm:$0xff]  }
 0x49d   :  { %3579 = vmatpush1.bf16.msra.mxu0 %v5969_v32  ;;  %3539 = vmatprep.subr.bf16.mxu1 %v5974_v34  ;;  %v6043_v32 = vld [vmem:[#allocation2 + $0xb04] ss:$16 sps:$4 sm:$0xff]   ;;  %v6038_v34 = vld [vmem:[#allocation2 + $0x900] ss:$16 sps:$4 sm:$0xff]  }
 0x49e   :  { %3580 = vmatprep.subr.bf16.mxu0 %v5977_v35  ;;  %v6630_v35 = vrot.slane %v6613_v45, %v6564_v21  ;;  %v6055_v21 = vld [vmem:[#allocation2 + $0x2cc] ss:$16 sps:$4 sm:$0xff]   ;;  %v6050_v45 = vld [vmem:[#allocation2 + $0xc8] ss:$16 sps:$4 sm:$0xff]  }
 0x4a0   :  { %3540 = vmatpush1.bf16.msra.mxu1 %v5972_v36  ;;  %v6041_v36 = vld [vmem:[#allocation2 + $0xb00] ss:$16 sps:$4 sm:$0xff]  }
 0x4a1   :  { %3581 = vmatpush1.bf16.msra.mxu0 %v5975_v39  ;;  %3541 = vmatprep.subr.bf16.mxu1 %v5980_v40  ;;  %v6046_v39 = vld [vmem:[#allocation2 + $0xec] ss:$16 sps:$4 sm:$0xff]  }
 0x4a2   :  { %3582 = vmatprep.subr.bf16.mxu0 %v5983_v42  ;;  %v6049_v40 = vld [vmem:[#allocation2 + $0x2ec] ss:$16 sps:$4 sm:$0xff]   ;;  %v6634_v42 = vcombine.high %v6630_v35, %v6630_v35 }
 0x4a4   :  { %3542 = vmatpush1.bf16.msra.mxu1 %v5978_v43  ;;  %v6044_v43 = vld [vmem:[#allocation2 + $0xe8] ss:$16 sps:$4 sm:$0xff]  }
 0x4a5   :  { %3583 = vmatpush1.bf16.msra.mxu0 %v5981_v44  ;;  %3543 = vmatprep.subr.bf16.mxu1 %v5986_v46  ;;  %v6047_v44 = vld [vmem:[#allocation2 + $0x2e8] ss:$16 sps:$4 sm:$0xff]   ;;  %v6052_v46 = vld [vmem:[#allocation2 + $0xcc] ss:$16 sps:$4 sm:$0xff]  }
 0x4a6   :  { %3584 = vmatprep.subr.bf16.mxu0 %v5989_v47  ;;  %v6053_v47 = vld [vmem:[#allocation2 + $0x2c8] ss:$16 sps:$4 sm:$0xff]  }
 0x4a8   :  { %3544 = vmatpush1.bf16.msra.mxu1 %v5984_v48  ;;  %v6058_v48 = vld [vmem:[#allocation2 + $0xac] ss:$16 sps:$4 sm:$0xff]  }
 0x4a9   :  { %3585 = vmatpush1.bf16.msra.mxu0 %v5987_v49  ;;  %3545 = vmatprep.subr.bf16.mxu1 %v5992_v50  ;;  %v6061_v49 = vld [vmem:[#allocation2 + $0x2ac] ss:$16 sps:$4 sm:$0xff]   ;;  %v6056_v50 = vld [vmem:[#allocation2 + $0xa8] ss:$16 sps:$4 sm:$0xff]  }
 0x4aa   :  { %3586 = vmatprep.subr.bf16.mxu0 %v5995_v51  ;;  %v6059_v51 = vld [vmem:[#allocation2 + $0x2a8] ss:$16 sps:$4 sm:$0xff]  }
 0x4ac   :  { %3546 = vmatpush1.bf16.msra.mxu1 %v5990_v53  ;;  %v6064_v53 = vld [vmem:[#allocation2 + $0x8c] ss:$16 sps:$4 sm:$0xff]  }
 0x4ad   :  { %3587 = vmatpush1.bf16.msra.mxu0 %v5993_v54  ;;  %3547 = vmatprep.subr.bf16.mxu1 %v5998_v55  ;;  %v6067_v54 = vld [vmem:[#allocation2 + $0x28c] ss:$16 sps:$4 sm:$0xff]   ;;  %v6062_v55 = vld [vmem:[#allocation2 + $0x88] ss:$16 sps:$4 sm:$0xff]  }
 0x4ae   :  { %3588 = vmatprep.subr.bf16.mxu0 %v6001_v58  ;;  %v6065_v58 = vld [vmem:[#allocation2 + $0x288] ss:$16 sps:$4 sm:$0xff]  }
 0x4b0   :  { %3548 = vmatpush2.bf16.msra.mxu1 %v5996_v59  ;;  %v6070_v59 = vld [vmem:[#allocation2 + $0x6c] ss:$16 sps:$4 sm:$0xff]  }
 0x4b1   :  { %3589 = vmatpush2.bf16.msra.mxu0 %v5999_v60  ;;  %3549 = vmatprep.subr.bf16.mxu1 %v6004_v61  ;;  %v6073_v60 = vld [vmem:[#allocation2 + $0x26c] ss:$16 sps:$4 sm:$0xff]   ;;  %v6068_v61 = vld [vmem:[#allocation2 + $0x68] ss:$16 sps:$4 sm:$0xff]  }
 0x4b2   :  { %3590 = vmatprep.subr.bf16.mxu0 %v6007_v63  ;;  %v6079_v63 = vld [vmem:[#allocation2 + $0x24c] ss:$16 sps:$4 sm:$0xff]  }
 0x4b4   :  { %3550 = vmatpush2.bf16.msra.mxu1 %v6002_v1  ;;  %v6074_v1 = vld [vmem:[#allocation2 + $0x48] ss:$16 sps:$4 sm:$0xff]  }
 0x4b5   :  { %3591 = vmatpush2.bf16.msra.mxu0 %v6005_v2  ;;  %3551 = vmatprep.subr.bf16.mxu1 %v6010_v3  ;;  %v6077_v2 = vld [vmem:[#allocation2 + $0x248] ss:$16 sps:$4 sm:$0xff]   ;;  %v6082_v3 = vld [vmem:[#allocation2 + $0x2c] ss:$16 sps:$4 sm:$0xff]  }
 0x4b6   :  { %3592 = vmatprep.subr.bf16.mxu0 %v6013_v4  ;;  %v6085_v4 = vld [vmem:[#allocation2 + $0x22c] ss:$16 sps:$4 sm:$0xff]  }
 0x4b8   :  { %3552 = vmatpush2.bf16.msra.mxu1 %v6008_v5  ;;  %v6080_v5 = vld [vmem:[#allocation2 + $0x28] ss:$16 sps:$4 sm:$0xff]  }
 0x4b9   :  { %3593 = vmatpush2.bf16.msra.mxu0 %v6011_v6  ;;  %3553 = vmatprep.subr.bf16.mxu1 %v6016_v8  ;;  %v6083_v6 = vld [vmem:[#allocation2 + $0x228] ss:$16 sps:$4 sm:$0xff]   ;;  %v6088_v8 = vld [vmem:[#allocation2 + $0xc] ss:$16 sps:$4 sm:$0xff]  }
 0x4ba   :  { %3594 = vmatprep.subr.bf16.mxu0 %v6019_v9  ;;  %v6091_v9 = vld [vmem:[#allocation2 + $0x20c] ss:$16 sps:$4 sm:$0xff]  }
 0x4bc   :  { %3554 = vmatpush2.bf16.msra.mxu1 %v6014_v11  ;;  %v6086_v11 = vld [vmem:[#allocation2 + $0x8] ss:$16 sps:$4 sm:$0xff]  }
 0x4bd   :  { %3595 = vmatpush2.bf16.msra.mxu0 %v6017_v12  ;;  %3555 = vmatprep.subr.bf16.mxu1 %v6022_v14  ;;  %v6089_v12 = vld [vmem:[#allocation2 + $0x208] ss:$16 sps:$4 sm:$0xff]   ;;  %v6094_v14 = vld [vmem:[#allocation2 + $0x1ec] ss:$16 sps:$4 sm:$0xff]  }
 0x4be   :  { %3596 = vmatprep.subr.bf16.mxu0 %v6025_v16  ;;  %v6097_v16 = vld [vmem:[#allocation2 + $0x3ec] ss:$16 sps:$4 sm:$0xff]  }
 0x4c0   :  { %3556 = vmatpush2.bf16.msra.mxu1 %v6020_v17  ;;  %v6092_v17 = vld [vmem:[#allocation2 + $0x1e8] ss:$16 sps:$4 sm:$0xff]  }
 0x4c1   :  { %3597 = vmatpush2.bf16.msra.mxu0 %v6023_v18  ;;  %3557 = vmatprep.subr.bf16.mxu1 %v6028_v19  ;;  %v6095_v18 = vld [vmem:[#allocation2 + $0x3e8] ss:$16 sps:$4 sm:$0xff]   ;;  %v6100_v19 = vld [vmem:[#allocation2 + $0x1cc] ss:$16 sps:$4 sm:$0xff]  }
 0x4c2   :  { %3598 = vmatprep.subr.bf16.mxu0 %v6031_v22  ;;  %v6103_v22 = vld [vmem:[#allocation2 + $0x3cc] ss:$16 sps:$4 sm:$0xff]  }
 0x4c4   :  { %3558 = vmatpush2.bf16.msra.mxu1 %v6026_v23  ;;  %v6098_v23 = vld [vmem:[#allocation2 + $0x1c8] ss:$16 sps:$4 sm:$0xff]  }
 0x4c5   :  { %3599 = vmatpush2.bf16.msra.mxu0 %v6029_v24  ;;  %3559 = vmatprep.subr.bf16.mxu1 %v6034_v26  ;;  %v6101_v24 = vld [vmem:[#allocation2 + $0x3c8] ss:$16 sps:$4 sm:$0xff]   ;;  %v6106_v26 = vld [vmem:[#allocation2 + $0x1ac] ss:$16 sps:$4 sm:$0xff]  }
 0x4c6   :  { %3600 = vmatprep.subr.bf16.mxu0 %v6037_v27  ;;  %v6109_v27 = vld [vmem:[#allocation2 + $0x3ac] ss:$16 sps:$4 sm:$0xff]  }
 0x4c8   :  { %3560 = vmatpush2.bf16.msra.mxu1 %v6032_v28  ;;  %v6104_v28 = vld [vmem:[#allocation2 + $0x1a8] ss:$16 sps:$4 sm:$0xff]  }
 0x4c9   :  { %3601 = vmatpush2.bf16.msra.mxu0 %v6035_v29  ;;  %3561 = vmatprep.subr.bf16.mxu1 %v6040_v30  ;;  %v6107_v29 = vld [vmem:[#allocation2 + $0x3a8] ss:$16 sps:$4 sm:$0xff]   ;;  %v6112_v30 = vld [vmem:[#allocation2 + $0x18c] ss:$16 sps:$4 sm:$0xff]  }
 0x4ca   :  { %3602 = vmatprep.subr.bf16.mxu0 %v6043_v32  ;;  %v6115_v32 = vld [vmem:[#allocation2 + $0x38c] ss:$16 sps:$4 sm:$0xff]  }
 0x4cc   :  { %3562 = vmatpush2.bf16.msra.mxu1 %v6038_v34  ;;  %v6110_v34 = vld [vmem:[#allocation2 + $0x188] ss:$16 sps:$4 sm:$0xff]  }
 0x4cd   :  { %3603 = vmatpush2.bf16.msra.mxu0 %v6041_v36  ;;  %3613 = vmatprep.subr.bf16.mxu1 %v6046_v39  ;;  %v6113_v36 = vld [vmem:[#allocation2 + $0x388] ss:$16 sps:$4 sm:$0xff]   ;;  %v6118_v39 = vld [vmem:[#allocation2 + $0x16c] ss:$16 sps:$4 sm:$0xff]  }
 0x4ce   :  { %3654 = vmatprep.subr.bf16.mxu0 %v6049_v40  ;;  %v6121_v40 = vld [vmem:[#allocation2 + $0x36c] ss:$16 sps:$4 sm:$0xff]  }
 0x4cf   :  { %3564 = vmatmul.mubr.bf16.vlgmr.msra.gmra.mxu1 %v6630_v35 }
 0x4d0   :  { %3605 = vmatmul.mubr.bf16.vlgmr.msra.gmra.mxu0 %v6634_v42  ;;  %3614 = vmatpush1.bf16.msra.mxu1 %v6044_v43  ;;  %v6116_v43 = vld [vmem:[#allocation2 + $0x168] ss:$16 sps:$4 sm:$0xff]  }
 0x4d1   :  { %3655 = vmatpush1.bf16.msra.mxu0 %v6047_v44  ;;  %3615 = vmatprep.subr.bf16.mxu1 %v6052_v46  ;;  %v6119_v44 = vld [vmem:[#allocation2 + $0x368] ss:$16 sps:$4 sm:$0xff]   ;;  %v6124_v46 = vld [vmem:[#allocation2 + $0x14c] ss:$16 sps:$4 sm:$0xff]  }
 0x4d2   :  { %3656 = vmatprep.subr.bf16.mxu0 %v6055_v21  ;;  %3645 = vmatprep.mubr.bf16.mxu1 %v6571_v33  ;;  %v6071_v33 = vld [vmem:[#allocation2 + $0x268] ss:$16 sps:$4 sm:$0xff]   ;;  %v6127_v21 = vld [vmem:[#allocation2 + $0x34c] ss:$16 sps:$4 sm:$0xff]  }
 0x4d3   :  { %3686 = vmatprep.mubr.bf16.mxu0 %v6575_v37  ;;  %v6076_v37 = vld [vmem:[#allocation2 + $0x4c] ss:$16 sps:$4 sm:$0xff]  }
 0x4d4   :  { %3616 = vmatpush1.bf16.msra.mxu1 %v6050_v45  ;;  %v6122_v45 = vld [vmem:[#allocation2 + $0x148] ss:$16 sps:$4 sm:$0xff]  }
 0x4d5   :  { %3657 = vmatpush1.bf16.msra.mxu0 %v6053_v47  ;;  %3617 = vmatprep.subr.bf16.mxu1 %v6058_v48  ;;  %v6125_v47 = vld [vmem:[#allocation2 + $0x348] ss:$16 sps:$4 sm:$0xff]   ;;  %v6130_v48 = vld [vmem:[#allocation2 + $0x12c] ss:$16 sps:$4 sm:$0xff]  }
 0x4d6   :  { %3658 = vmatprep.subr.bf16.mxu0 %v6061_v49  ;;  %v6133_v49 = vld [vmem:[#allocation2 + $0x32c] ss:$16 sps:$4 sm:$0xff]  }
 0x4d8   :  { %3618 = vmatpush1.bf16.msra.mxu1 %v6056_v50  ;;  %v6128_v50 = vld [vmem:[#allocation2 + $0x128] ss:$16 sps:$4 sm:$0xff]  }
 0x4d9   :  { %3659 = vmatpush1.bf16.msra.mxu0 %v6059_v51  ;;  %3619 = vmatprep.subr.bf16.mxu1 %v6064_v53  ;;  %v6131_v51 = vld [vmem:[#allocation2 + $0x328] ss:$16 sps:$4 sm:$0xff]   ;;  %v6136_v53 = vld [vmem:[#allocation2 + $0x10c] ss:$16 sps:$4 sm:$0xff]  }
 0x4da   :  { %3660 = vmatprep.subr.bf16.mxu0 %v6067_v54  ;;  %v6139_v54 = vld [vmem:[#allocation2 + $0x30c] ss:$16 sps:$4 sm:$0xff]  }
 0x4dc   :  { %3620 = vmatpush1.bf16.msra.mxu1 %v6062_v55  ;;  %v6134_v55 = vld [vmem:[#allocation2 + $0x108] ss:$16 sps:$4 sm:$0xff]  }
 0x4dd   :  { %3661 = vmatpush1.bf16.msra.mxu0 %v6065_v58  ;;  %3621 = vmatprep.subr.bf16.mxu1 %v6070_v59  ;;  %v6137_v58 = vld [vmem:[#allocation2 + $0x308] ss:$16 sps:$4 sm:$0xff]   ;;  %v6142_v59 = vld [vmem:[#allocation2 + $0x4ec] ss:$16 sps:$4 sm:$0xff]  }
 0x4de   :  { %3662 = vmatprep.subr.bf16.mxu0 %v6073_v60  ;;  %v6145_v60 = vld [vmem:[#allocation2 + $0x6ec] ss:$16 sps:$4 sm:$0xff]  }
 0x4e0   :  { %3622 = vmatpush1.bf16.msra.mxu1 %v6068_v61  ;;  %v6140_v61 = vld [vmem:[#allocation2 + $0x4e8] ss:$16 sps:$4 sm:$0xff]  }
 0x4e1   :  { %3663 = vmatpush1.bf16.msra.mxu0 %v6071_v33  ;;  %3623 = vmatprep.subr.bf16.mxu1 %v6076_v37  ;;  %v6143_v33 = vld [vmem:[#allocation2 + $0x6e8] ss:$16 sps:$4 sm:$0xff]   ;;  %v6148_v37 = vld [vmem:[#allocation2 + $0x4cc] ss:$16 sps:$4 sm:$0xff]  }
 0x4e2   :  { %3664 = vmatprep.subr.bf16.mxu0 %v6079_v63  ;;  %v6151_v63 = vld [vmem:[#allocation2 + $0x6cc] ss:$16 sps:$4 sm:$0xff]  }
 0x4e4   :  { %3624 = vmatpush1.bf16.msra.mxu1 %v6074_v1 }
 0x4e5   :  { %3665 = vmatpush1.bf16.msra.mxu0 %v6077_v2  ;;  %3625 = vmatprep.subr.bf16.mxu1 %v6082_v3 }
 0x4e6   :  { %3666 = vmatprep.subr.bf16.mxu0 %v6085_v4  ;;  %v6146_v4 = vld [vmem:[#allocation2 + $0x4c8] ss:$16 sps:$4 sm:$0xff]  }
 0x4e8   :  { %3626 = vmatpush1.bf16.msra.mxu1 %v6080_v5  ;;  %v6149_v5 = vld [vmem:[#allocation2 + $0x6c8] ss:$16 sps:$4 sm:$0xff]  }
 0x4e9   :  { %3667 = vmatpush1.bf16.msra.mxu0 %v6083_v6  ;;  %3627 = vmatprep.subr.bf16.mxu1 %v6088_v8 }
 0x4ea   :  { %3668 = vmatprep.subr.bf16.mxu0 %v6091_v9  ;;  %v6154_v9 = vld [vmem:[#allocation2 + $0x4ac] ss:$16 sps:$4 sm:$0xff]  }
 0x4ec   :  { %3628 = vmatpush1.bf16.msra.mxu1 %v6086_v11  ;;  %v6157_v11 = vld [vmem:[#allocation2 + $0x6ac] ss:$16 sps:$4 sm:$0xff]  }
 0x4ed   :  { %3669 = vmatpush1.bf16.msra.mxu0 %v6089_v12  ;;  %3629 = vmatprep.subr.bf16.mxu1 %v6094_v14  ;;  %v6152_v14 = vld [vmem:[#allocation2 + $0x4a8] ss:$16 sps:$4 sm:$0xff]  }
 0x4ee   :  { %3670 = vmatprep.subr.bf16.mxu0 %v6097_v16  ;;  %v6155_v16 = vld [vmem:[#allocation2 + $0x6a8] ss:$16 sps:$4 sm:$0xff]  }
 0x4f0   :  { %3630 = vmatpush2.bf16.msra.mxu1 %v6092_v17 }
 0x4f1   :  { %3671 = vmatpush2.bf16.msra.mxu0 %v6095_v18  ;;  %3631 = vmatprep.subr.bf16.mxu1 %v6100_v19  ;;  %v6160_v19 = vld [vmem:[#allocation2 + $0x48c] ss:$16 sps:$4 sm:$0xff]  }
 0x4f2   :  { %3672 = vmatprep.subr.bf16.mxu0 %v6103_v22  ;;  %v6163_v22 = vld [vmem:[#allocation2 + $0x68c] ss:$16 sps:$4 sm:$0xff]  }
 0x4f4   :  { %3632 = vmatpush2.bf16.msra.mxu1 %v6098_v23  ;;  %v6158_v23 = vld [vmem:[#allocation2 + $0x488] ss:$16 sps:$4 sm:$0xff]  }
 0x4f5   :  { %3673 = vmatpush2.bf16.msra.mxu0 %v6101_v24  ;;  %3633 = vmatprep.subr.bf16.mxu1 %v6106_v26  ;;  %v6161_v24 = vld [vmem:[#allocation2 + $0x688] ss:$16 sps:$4 sm:$0xff]  }
 0x4f6   :  { %3674 = vmatprep.subr.bf16.mxu0 %v6109_v27  ;;  %v6164_v26 = vld [vmem:[#allocation2 + $0x468] ss:$16 sps:$4 sm:$0xff]  }
 0x4f7   :  { %v6167_v27 = vld [vmem:[#allocation2 + $0x668] ss:$16 sps:$4 sm:$0xff]  }
 0x4f8   :  { %3634 = vmatpush2.bf16.msra.mxu1 %v6104_v28  ;;  %v6172_v28 = vld [vmem:[#allocation2 + $0x44c] ss:$16 sps:$4 sm:$0xff]  }
 0x4f9   :  { %3675 = vmatpush2.bf16.msra.mxu0 %v6107_v29  ;;  %3635 = vmatprep.subr.bf16.mxu1 %v6112_v30  ;;  %v6175_v29 = vld [vmem:[#allocation2 + $0x64c] ss:$16 sps:$4 sm:$0xff]   ;;  %v6170_v30 = vld [vmem:[#allocation2 + $0x448] ss:$16 sps:$4 sm:$0xff]  }
 0x4fa   :  { %3676 = vmatprep.subr.bf16.mxu0 %v6115_v32  ;;  %v6173_v32 = vld [vmem:[#allocation2 + $0x648] ss:$16 sps:$4 sm:$0xff]  }
 0x4fc   :  { %3636 = vmatpush2.bf16.msra.mxu1 %v6110_v34  ;;  %v6178_v34 = vld [vmem:[#allocation2 + $0x42c] ss:$16 sps:$4 sm:$0xff]  }
 0x4fd   :  { %3677 = vmatpush2.bf16.msra.mxu0 %v6113_v36  ;;  %3637 = vmatprep.subr.bf16.mxu1 %v6118_v39  ;;  %v6181_v36 = vld [vmem:[#allocation2 + $0x62c] ss:$16 sps:$4 sm:$0xff]   ;;  %v6176_v39 = vld [vmem:[#allocation2 + $0x428] ss:$16 sps:$4 sm:$0xff]  }
 0x4fe   :  { %3678 = vmatprep.subr.bf16.mxu0 %v6121_v40  ;;  %v6179_v40 = vld [vmem:[#allocation2 + $0x628] ss:$16 sps:$4 sm:$0xff]  }
 0x500   :  { %3638 = vmatpush2.bf16.msra.mxu1 %v6116_v43  ;;  %v6184_v43 = vld [vmem:[#allocation2 + $0x40c] ss:$16 sps:$4 sm:$0xff]  }
 0x501   :  { %3679 = vmatpush2.bf16.msra.mxu0 %v6119_v44  ;;  %3639 = vmatprep.subr.bf16.mxu1 %v6124_v46  ;;  %v6187_v44 = vld [vmem:[#allocation2 + $0x60c] ss:$16 sps:$4 sm:$0xff]   ;;  %v6182_v46 = vld [vmem:[#allocation2 + $0x408] ss:$16 sps:$4 sm:$0xff]  }
 0x502   :  { %3680 = vmatprep.subr.bf16.mxu0 %v6127_v21  ;;  %v6185_v21 = vld [vmem:[#allocation2 + $0x608] ss:$16 sps:$4 sm:$0xff]  }
 0x504   :  { %3640 = vmatpush2.bf16.msra.mxu1 %v6122_v45  ;;  %v6190_v45 = vld [vmem:[#allocation2 + $0x5ec] ss:$16 sps:$4 sm:$0xff]  }
 0x505   :  { %3681 = vmatpush2.bf16.msra.mxu0 %v6125_v47  ;;  %3641 = vmatprep.subr.bf16.mxu1 %v6130_v48  ;;  %v6193_v47 = vld [vmem:[#allocation2 + $0x7ec] ss:$16 sps:$4 sm:$0xff]   ;;  %v6188_v48 = vld [vmem:[#allocation2 + $0x5e8] ss:$16 sps:$4 sm:$0xff]  }
 0x506   :  { %3682 = vmatprep.subr.bf16.mxu0 %v6133_v49  ;;  %v6191_v49 = vld [vmem:[#allocation2 + $0x7e8] ss:$16 sps:$4 sm:$0xff]  }
 0x508   :  { %3642 = vmatpush2.bf16.msra.mxu1 %v6128_v50  ;;  %v6196_v50 = vld [vmem:[#allocation2 + $0x5cc] ss:$16 sps:$4 sm:$0xff]  }
 0x509   :  { %3683 = vmatpush2.bf16.msra.mxu0 %v6131_v51  ;;  %3643 = vmatprep.subr.bf16.mxu1 %v6136_v53  ;;  %v6199_v51 = vld [vmem:[#allocation2 + $0x7cc] ss:$16 sps:$4 sm:$0xff]   ;;  %v6194_v53 = vld [vmem:[#allocation2 + $0x5c8] ss:$16 sps:$4 sm:$0xff]  }
 0x50a   :  { %3684 = vmatprep.subr.bf16.mxu0 %v6139_v54  ;;  %v6197_v54 = vld [vmem:[#allocation2 + $0x7c8] ss:$16 sps:$4 sm:$0xff]  }
 0x50c   :  { %3644 = vmatpush2.bf16.msra.mxu1 %v6134_v55  ;;  %v6202_v55 = vld [vmem:[#allocation2 + $0x5ac] ss:$16 sps:$4 sm:$0xff]  }
 0x50d   :  { %3685 = vmatpush2.bf16.msra.mxu0 %v6137_v58  ;;  %3695 = vmatprep.subr.bf16.mxu1 %v6142_v59  ;;  %v6205_v58 = vld [vmem:[#allocation2 + $0x7ac] ss:$16 sps:$4 sm:$0xff]   ;;  %v6200_v59 = vld [vmem:[#allocation2 + $0x5a8] ss:$16 sps:$4 sm:$0xff]  }
 0x50e   :  { %3736 = vmatprep.subr.bf16.mxu0 %v6145_v60  ;;  %v6203_v60 = vld [vmem:[#allocation2 + $0x7a8] ss:$16 sps:$4 sm:$0xff]  }
 0x50f   :  { %v3401_v1 = vpop.f32.mrf.mxu1  ;;  %3646 = vmatmul.mubr.bf16.vlgmr.msra.gmra.mxu1 %v6585_v52 }
 0x510   :  { %v3442_v2 = vpop.f32.mrf.mxu0  ;;  %3687 = vmatmul.mubr.bf16.vlgmr.msra.gmra.mxu0 %v6592_v57  ;;  %3696 = vmatpush1.bf16.msra.mxu1 %v6140_v61  ;;  %v6208_v61 = vld [vmem:[#allocation2 + $0x58c] ss:$16 sps:$4 sm:$0xff]  }
 0x511   :  { %v6642_v3 = vadd.f32 %v3442_v2, %v3401_v1  ;;  %3737 = vmatpush1.bf16.msra.mxu0 %v6143_v33  ;;  %v3403_v6 = vpop.f32.mrf.mxu1  ;;  %3697 = vmatprep.subr.bf16.mxu1 %v6148_v37  ;;  %v6211_v33 = vld [vmem:[#allocation2 + $0x78c] ss:$16 sps:$4 sm:$0xff]   ;;  %v6206_v37 = vld [vmem:[#allocation2 + $0x588] ss:$16 sps:$4 sm:$0xff]  }
 0x512   :  { %v3444_v8 = vpop.f32.mrf.mxu0  ;;  %3738 = vmatprep.subr.bf16.mxu0 %v6151_v63  ;;  %3727 = vmatprep.mubr.bf16.mxu1 %v6588_v56  ;;  %v6166_v56 = vld [vmem:[#allocation2 + $0x46c] ss:$16 sps:$4 sm:$0xff]   ;;  %v6209_v63 = vld [vmem:[#allocation2 + $0x788] ss:$16 sps:$4 sm:$0xff]  }
 0x513   :  { %v6644_v12 = vadd.f32 %v3444_v8, %v3403_v6  ;;  %3768 = vmatprep.mubr.bf16.mxu0 %v6596_v62  ;;  %v3405_v52 = vpop.f32.mrf.mxu1  ;;  %v6169_v62 = vld [vmem:[#allocation2 + $0x66c] ss:$16 sps:$4 sm:$0xff]  }
 0x514   :  { %v3446_v57 = vpop.f32.mrf.mxu0  ;;  %3698 = vmatpush1.bf16.msra.mxu1 %v6146_v4  ;;  %v6214_v1 = vld [vmem:[#allocation2 + $0x56c] ss:$16 sps:$4 sm:$0xff]   ;;  %v6212_v4 = vld [vmem:[#allocation2 + $0x568] ss:$16 sps:$4 sm:$0xff]  }
 0x515   :  { %3739 = vmatpush1.bf16.msra.mxu0 %v6149_v5  ;;  %v3406_v17 = vpop.f32.mrf.mxu1  ;;  %3699 = vmatprep.subr.bf16.mxu1 %v6154_v9  ;;  %v6217_v2 = vld [vmem:[#allocation2 + $0x76c] ss:$16 sps:$4 sm:$0xff]   ;;  %v6215_v5 = vld [vmem:[#allocation2 + $0x768] ss:$16 sps:$4 sm:$0xff]  }
 0x516   :  { %v3447_v18 = vpop.f32.mrf.mxu0  ;;  %3740 = vmatprep.subr.bf16.mxu0 %v6157_v11  ;;  %v6220_v6 = vld [vmem:[#allocation2 + $0x54c] ss:$16 sps:$4 sm:$0xff]   ;;  %v6218_v9 = vld [vmem:[#allocation2 + $0x548] ss:$16 sps:$4 sm:$0xff]  }
 0x517   :  { %v6223_v8 = vld [vmem:[#allocation2 + $0x74c] ss:$16 sps:$4 sm:$0xff]   ;;  %v6221_v11 = vld [vmem:[#allocation2 + $0x748] ss:$16 sps:$4 sm:$0xff]  }
 0x518   :  { %3700 = vmatpush1.bf16.msra.mxu1 %v6152_v14  ;;  %v6226_v52 = vld [vmem:[#allocation2 + $0x52c] ss:$16 sps:$4 sm:$0xff]   ;;  %v6224_v14 = vld [vmem:[#allocation2 + $0x528] ss:$16 sps:$4 sm:$0xff]  }
 0x519   :  { %3741 = vmatpush1.bf16.msra.mxu0 %v6155_v16  ;;  %3701 = vmatprep.subr.bf16.mxu1 %v6160_v19  ;;  %v6229_v57 = vld [vmem:[#allocation2 + $0x72c] ss:$16 sps:$4 sm:$0xff]   ;;  %v6227_v16 = vld [vmem:[#allocation2 + $0x728] ss:$16 sps:$4 sm:$0xff]  }
 0x51a   :  { %3742 = vmatprep.subr.bf16.mxu0 %v6163_v22  ;;  %v6232_v17 = vld [vmem:[#allocation2 + $0x50c] ss:$16 sps:$4 sm:$0xff]   ;;  %v6230_v19 = vld [vmem:[#allocation2 + $0x508] ss:$16 sps:$4 sm:$0xff]  }
 0x51b   :  { %v6235_v18 = vld [vmem:[#allocation2 + $0x70c] ss:$16 sps:$4 sm:$0xff]   ;;  %v6233_v22 = vld [vmem:[#allocation2 + $0x708] ss:$16 sps:$4 sm:$0xff]  }
 0x51c   :  { %3702 = vmatpush1.bf16.msra.mxu1 %v6158_v23  ;;  %v6238_v23 = vld [vmem:[#allocation2 + $0x8ec] ss:$16 sps:$4 sm:$0xff]  }
 0x51d   :  { %3743 = vmatpush1.bf16.msra.mxu0 %v6161_v24  ;;  %3703 = vmatprep.subr.bf16.mxu1 %v6166_v56  ;;  %v6241_v24 = vld [vmem:[#allocation2 + $0xaec] ss:$16 sps:$4 sm:$0xff]   ;;  %v6236_v56 = vld [vmem:[#allocation2 + $0x8e8] ss:$16 sps:$4 sm:$0xff]  }
 0x51e   :  { %3744 = vmatprep.subr.bf16.mxu0 %v6169_v62  ;;  %v6239_v62 = vld [vmem:[#allocation2 + $0xae8] ss:$16 sps:$4 sm:$0xff]  }
 0x520   :  { %3704 = vmatpush1.bf16.msra.mxu1 %v6164_v26  ;;  %v6244_v26 = vld [vmem:[#allocation2 + $0x8cc] ss:$16 sps:$4 sm:$0xff]  }
 0x521   :  { %3745 = vmatpush1.bf16.msra.mxu0 %v6167_v27  ;;  %3705 = vmatprep.subr.bf16.mxu1 %v6172_v28  ;;  %v6247_v27 = vld [vmem:[#allocation2 + $0xacc] ss:$16 sps:$4 sm:$0xff]  }
 0x522   :  { %3746 = vmatprep.subr.bf16.mxu0 %v6175_v29 }
 0x524   :  { %3706 = vmatpush1.bf16.msra.mxu1 %v6170_v30 }
 0x525   :  { %3747 = vmatpush1.bf16.msra.mxu0 %v6173_v32  ;;  %3707 = vmatprep.subr.bf16.mxu1 %v6178_v34  ;;  %v6242_v32 = vld [vmem:[#allocation2 + $0x8c8] ss:$16 sps:$4 sm:$0xff]  }
 0x526   :  { %3748 = vmatprep.subr.bf16.mxu0 %v6181_v36  ;;  %v6245_v34 = vld [vmem:[#allocation2 + $0xac8] ss:$16 sps:$4 sm:$0xff]  }
 0x528   :  { %3708 = vmatpush1.bf16.msra.mxu1 %v6176_v39 }
 0x529   :  { %3749 = vmatpush1.bf16.msra.mxu0 %v6179_v40  ;;  %3709 = vmatprep.subr.bf16.mxu1 %v6184_v43  ;;  %v6250_v40 = vld [vmem:[#allocation2 + $0x8ac] ss:$16 sps:$4 sm:$0xff]  }
 0x52a   :  { %3750 = vmatprep.subr.bf16.mxu0 %v6187_v44  ;;  %v6253_v43 = vld [vmem:[#allocation2 + $0xaac] ss:$16 sps:$4 sm:$0xff]  }
 0x52c   :  { %3710 = vmatpush1.bf16.msra.mxu1 %v6182_v46  ;;  %v6251_v46 = vld [vmem:[#allocation2 + $0xaa8] ss:$16 sps:$4 sm:$0xff]  }
 0x52d   :  { %3751 = vmatpush1.bf16.msra.mxu0 %v6185_v21  ;;  %3711 = vmatprep.subr.bf16.mxu1 %v6190_v45 }
 0x52e   :  { %3752 = vmatprep.subr.bf16.mxu0 %v6193_v47  ;;  %v6256_v47 = vld [vmem:[#allocation2 + $0x88c] ss:$16 sps:$4 sm:$0xff]  }
 0x530   :  { %3712 = vmatpush2.bf16.msra.mxu1 %v6188_v48  ;;  %v6259_v48 = vld [vmem:[#allocation2 + $0xa8c] ss:$16 sps:$4 sm:$0xff]  }
 0x531   :  { %3753 = vmatpush2.bf16.msra.mxu0 %v6191_v49  ;;  %3713 = vmatprep.subr.bf16.mxu1 %v6196_v50  ;;  %v6254_v49 = vld [vmem:[#allocation2 + $0x888] ss:$16 sps:$4 sm:$0xff]  }
 0x532   :  { %3754 = vmatprep.subr.bf16.mxu0 %v6199_v51  ;;  %v6257_v50 = vld [vmem:[#allocation2 + $0xa88] ss:$16 sps:$4 sm:$0xff]  }
 0x533   :  { %v6260_v51 = vld [vmem:[#allocation2 + $0x868] ss:$16 sps:$4 sm:$0xff]  }
 0x534   :  { %3714 = vmatpush2.bf16.msra.mxu1 %v6194_v53  ;;  %v6263_v53 = vld [vmem:[#allocation2 + $0xa68] ss:$16 sps:$4 sm:$0xff]  }
 0x535   :  { %3755 = vmatpush2.bf16.msra.mxu0 %v6197_v54  ;;  %3715 = vmatprep.subr.bf16.mxu1 %v6202_v55  ;;  %v6268_v54 = vld [vmem:[#allocation2 + $0x84c] ss:$16 sps:$4 sm:$0xff]  }
 0x536   :  { %3756 = vmatprep.subr.bf16.mxu0 %v6205_v58  ;;  %v6271_v55 = vld [vmem:[#allocation2 + $0xa4c] ss:$16 sps:$4 sm:$0xff]   ;;  %v6266_v58 = vld [vmem:[#allocation2 + $0x848] ss:$16 sps:$4 sm:$0xff]  }
 0x538   :  { %3716 = vmatpush2.bf16.msra.mxu1 %v6200_v59  ;;  %v6269_v59 = vld [vmem:[#allocation2 + $0xa48] ss:$16 sps:$4 sm:$0xff]  }
 0x539   :  { %3757 = vmatpush2.bf16.msra.mxu0 %v6203_v60  ;;  %3717 = vmatprep.subr.bf16.mxu1 %v6208_v61  ;;  %v6274_v60 = vld [vmem:[#allocation2 + $0x82c] ss:$16 sps:$4 sm:$0xff]  }
 0x53a   :  { %3758 = vmatprep.subr.bf16.mxu0 %v6211_v33  ;;  %v6277_v61 = vld [vmem:[#allocation2 + $0xa2c] ss:$16 sps:$4 sm:$0xff]   ;;  %v6272_v33 = vld [vmem:[#allocation2 + $0x828] ss:$16 sps:$4 sm:$0xff]  }
 0x53c   :  { %3718 = vmatpush2.bf16.msra.mxu1 %v6206_v37  ;;  %v6275_v37 = vld [vmem:[#allocation2 + $0xa28] ss:$16 sps:$4 sm:$0xff]  }
 0x53d   :  { %3759 = vmatpush2.bf16.msra.mxu0 %v6209_v63  ;;  %3719 = vmatprep.subr.bf16.mxu1 %v6214_v1  ;;  %v6280_v63 = vld [vmem:[#allocation2 + $0x80c] ss:$16 sps:$4 sm:$0xff]  }
 0x53e   :  { %3760 = vmatprep.subr.bf16.mxu0 %v6217_v2  ;;  %v6283_v1 = vld [vmem:[#allocation2 + $0xa0c] ss:$16 sps:$4 sm:$0xff]   ;;  %v6278_v2 = vld [vmem:[#allocation2 + $0x808] ss:$16 sps:$4 sm:$0xff]  }
 0x540   :  { %3720 = vmatpush2.bf16.msra.mxu1 %v6212_v4  ;;  %v6281_v4 = vld [vmem:[#allocation2 + $0xa08] ss:$16 sps:$4 sm:$0xff]  }
 0x541   :  { %3761 = vmatpush2.bf16.msra.mxu0 %v6215_v5  ;;  %3721 = vmatprep.subr.bf16.mxu1 %v6220_v6  ;;  %v6286_v5 = vld [vmem:[#allocation2 + $0x9ec] ss:$16 sps:$4 sm:$0xff]  }
 0x542   :  { %3762 = vmatprep.subr.bf16.mxu0 %v6223_v8  ;;  %v6289_v6 = vld [vmem:[#allocation2 + $0xbec] ss:$16 sps:$4 sm:$0xff]   ;;  %v6284_v8 = vld [vmem:[#allocation2 + $0x9e8] ss:$16 sps:$4 sm:$0xff]  }
 0x544   :  { %3722 = vmatpush2.bf16.msra.mxu1 %v6218_v9  ;;  %v6287_v9 = vld [vmem:[#allocation2 + $0xbe8] ss:$16 sps:$4 sm:$0xff]  }
 0x545   :  { %3763 = vmatpush2.bf16.msra.mxu0 %v6221_v11  ;;  %3723 = vmatprep.subr.bf16.mxu1 %v6226_v52  ;;  %v6292_v11 = vld [vmem:[#allocation2 + $0x9cc] ss:$16 sps:$4 sm:$0xff]  }
 0x546   :  { %3764 = vmatprep.subr.bf16.mxu0 %v6229_v57  ;;  %v6295_v52 = vld [vmem:[#allocation2 + $0xbcc] ss:$16 sps:$4 sm:$0xff]   ;;  %v6290_v57 = vld [vmem:[#allocation2 + $0x9c8] ss:$16 sps:$4 sm:$0xff]  }
 0x548   :  { %3724 = vmatpush2.bf16.msra.mxu1 %v6224_v14  ;;  %v6293_v14 = vld [vmem:[#allocation2 + $0xbc8] ss:$16 sps:$4 sm:$0xff]  }
 0x549   :  { %3765 = vmatpush2.bf16.msra.mxu0 %v6227_v16  ;;  %3725 = vmatprep.subr.bf16.mxu1 %v6232_v17  ;;  %v6298_v16 = vld [vmem:[#allocation2 + $0x9ac] ss:$16 sps:$4 sm:$0xff]  }
 0x54a   :  { %3766 = vmatprep.subr.bf16.mxu0 %v6235_v18  ;;  %v6301_v17 = vld [vmem:[#allocation2 + $0xbac] ss:$16 sps:$4 sm:$0xff]   ;;  %v6296_v18 = vld [vmem:[#allocation2 + $0x9a8] ss:$16 sps:$4 sm:$0xff]  }
 0x54c   :  { %3726 = vmatpush2.bf16.msra.mxu1 %v6230_v19  ;;  %v6299_v19 = vld [vmem:[#allocation2 + $0xba8] ss:$16 sps:$4 sm:$0xff]  }
 0x54d   :  { %3767 = vmatpush2.bf16.msra.mxu0 %v6233_v22  ;;  %3777 = vmatprep.subr.bf16.mxu1 %v6238_v23  ;;  %v6304_v22 = vld [vmem:[#allocation2 + $0x98c] ss:$16 sps:$4 sm:$0xff]  }
 0x54e   :  { %3818 = vmatprep.subr.bf16.mxu0 %v6241_v24  ;;  %v6307_v23 = vld [vmem:[#allocation2 + $0xb8c] ss:$16 sps:$4 sm:$0xff]   ;;  %v6302_v24 = vld [vmem:[#allocation2 + $0x988] ss:$16 sps:$4 sm:$0xff]  }
 0x54f   :  { %v3483_v28 = vpop.f32.mrf.mxu1  ;;  %3728 = vmatmul.mubr.bf16.vlgmr.msra.gmra.mxu1 %v6604_v7 }
 0x550   :  { %v3524_v29 = vpop.f32.mrf.mxu0  ;;  %3769 = vmatmul.mubr.bf16.vlgmr.msra.gmra.mxu0 %v6608_v13  ;;  %v3484_v30 = vadd.f32 %v3483_v28, %v6642_v3  ;;  %3778 = vmatpush1.bf16.msra.mxu1 %v6236_v56  ;;  %v6248_v3 = vld [vmem:[#allocation2 + $0x8a8] ss:$16 sps:$4 sm:$0xff]  }
 0x551   :  { %3819 = vmatpush1.bf16.msra.mxu0 %v6239_v62  ;;  %v6651_v36 = vpop.f32.mrf.mxu1  ;;  %3779 = vmatprep.subr.bf16.mxu1 %v6244_v26  ;;  %v6305_v56 = vld [vmem:[#allocation2 + $0xb88] ss:$16 sps:$4 sm:$0xff]   ;;  %v6310_v62 = vld [vmem:[#allocation2 + $0x96c] ss:$16 sps:$4 sm:$0xff]  }
 0x552   :  { %v6653_v39 = vpop.f32.mrf.mxu0  ;;  %3820 = vmatprep.subr.bf16.mxu0 %v6247_v27  ;;  %v6655_v44 = vadd.f32 %v3524_v29, %v3484_v30  ;;  %3809 = vmatprep.mubr.bf16.mxu1 %v6620_v20  ;;  %v6262_v20 = vld [vmem:[#allocation2 + $0x86c] ss:$16 sps:$4 sm:$0xff]   ;;  %v6308_v27 = vld [vmem:[#allocation2 + $0x968] ss:$16 sps:$4 sm:$0xff]  }
 0x553   :  { %3850 = vmatprep.mubr.bf16.mxu0 %v6624_v25  ;;  %v3487_v7 = vpop.f32.mrf.mxu1  ;;  %v6265_v25 = vld [vmem:[#allocation2 + $0xa6c] ss:$16 sps:$4 sm:$0xff]   ;;  %v6311_v28 = vld [vmem:[#allocation2 + $0xb68] ss:$16 sps:$4 sm:$0xff]  }
 0x554   :  { %v3528_v13 = vpop.f32.mrf.mxu0  ;;  %3780 = vmatpush1.bf16.msra.mxu1 %v6242_v32  ;;  %v6313_v26 = vld [vmem:[#allocation2 + $0xb6c] ss:$16 sps:$4 sm:$0xff]   ;;  %v6314_v32 = vld [vmem:[#allocation2 + $0x948] ss:$16 sps:$4 sm:$0xff]  }
 0x555   :  { %3821 = vmatpush1.bf16.msra.mxu0 %v6245_v34  ;;  %v3488_v21 = vpop.f32.mrf.mxu1  ;;  %3781 = vmatprep.subr.bf16.mxu1 %v6250_v40  ;;  %v6316_v29 = vld [vmem:[#allocation2 + $0x94c] ss:$16 sps:$4 sm:$0xff]   ;;  %v6317_v34 = vld [vmem:[#allocation2 + $0xb48] ss:$16 sps:$4 sm:$0xff]  }
 0x556   :  { %v3529_v45 = vpop.f32.mrf.mxu0  ;;  %3822 = vmatprep.subr.bf16.mxu0 %v6253_v43  ;;  %v6319_v30 = vld [vmem:[#allocation2 + $0xb4c] ss:$16 sps:$4 sm:$0xff]   ;;  %v6320_v7 = vld [vmem:[#allocation2 + $0x928] ss:$16 sps:$4 sm:$0xff]  }
 0x557   :  { %v6322_v40 = vld [vmem:[#allocation2 + $0x92c] ss:$16 sps:$4 sm:$0xff]   ;;  %v6323_v13 = vld [vmem:[#allocation2 + $0xb28] ss:$16 sps:$4 sm:$0xff]  }
 0x558   :  { %3782 = vmatpush1.bf16.msra.mxu1 %v6248_v3  ;;  %v6325_v43 = vld [vmem:[#allocation2 + $0xb2c] ss:$16 sps:$4 sm:$0xff]   ;;  %v6326_v21 = vld [vmem:[#allocation2 + $0x908] ss:$16 sps:$4 sm:$0xff]  }
 0x559   :  { %3823 = vmatpush1.bf16.msra.mxu0 %v6251_v46  ;;  %3783 = vmatprep.subr.bf16.mxu1 %v6256_v47  ;;  %v6328_v3 = vld [vmem:[#allocation2 + $0x90c] ss:$16 sps:$4 sm:$0xff]   ;;  %v6329_v45 = vld [vmem:[#allocation2 + $0xb08] ss:$16 sps:$4 sm:$0xff]  }
 0x55a   :  { %3824 = vmatprep.subr.bf16.mxu0 %v6259_v48  ;;  %v6331_v46 = vld [vmem:[#allocation2 + $0xb0c] ss:$16 sps:$4 sm:$0xff]   ;;  %v3486_v48 = vadd.f32 %v6651_v36, %v6644_v12 }
 0x55b   :  { %v3894_v47 = vld [vmem:[#allocation8 + $0xf8] sm:$0xff]  ;;  %v3876_v36 = vld [vmem:[#allocation8 + $0x68] sm:$0xff] }
 0x55c   :  { %3784 = vmatpush1.bf16.msra.mxu1 %v6254_v49  ;;  %v3878_v49 = vld [vmem:[#allocation8 + $0x78] sm:$0xff] }
 0x55d   :  { %3825 = vmatpush1.bf16.msra.mxu0 %v6257_v50  ;;  %3785 = vmatprep.subr.bf16.mxu1 %v6262_v20  ;;  %v3893_v50 = vld [vmem:[#allocation8 + $0xf0] sm:$0xff] }
 0x55e   :  { %3826 = vmatprep.subr.bf16.mxu0 %v6265_v25 }
 0x560   :  { %3786 = vmatpush1.bf16.msra.mxu1 %v6260_v51  ;;  %v3877_v51 = vld [vmem:[#allocation8 + $0x70] sm:$0xff] }
 0x561   :  { %3827 = vmatpush1.bf16.msra.mxu0 %v6263_v53  ;;  %3787 = vmatprep.subr.bf16.mxu1 %v6268_v54  ;;  %v3527_v53 = vadd.f32 %v6653_v39, %v3486_v48  ;;  %v3892_v54 = vld [vmem:[#allocation8 + $0xe8] sm:$0xff]  ;;  %v3874_v39 = vld [vmem:[#allocation8 + $0x58] sm:$0xff]  ;;  %v3881_v48 = vld [vmem:[#allocation8 + $0x90] sm:$0xff] }
 0x562   :  { %3828 = vmatprep.subr.bf16.mxu0 %v6271_v55 }
 0x564   :  { %3788 = vmatpush1.bf16.msra.mxu1 %v6266_v58 }
 0x565   :  { %3829 = vmatpush1.bf16.msra.mxu0 %v6269_v59  ;;  %3789 = vmatprep.subr.bf16.mxu1 %v6274_v60  ;;  %v3891_v59 = vld [vmem:[#allocation8 + $0xe0] sm:$0xff] }
 0x566   :  { %3830 = vmatprep.subr.bf16.mxu0 %v6277_v61 }
 0x568   :  { %3790 = vmatpush1.bf16.msra.mxu1 %v6272_v33  ;;  %v3875_v33 = vld [vmem:[#allocation8 + $0x60] sm:$0xff] }
 0x569   :  { %3831 = vmatpush1.bf16.msra.mxu0 %v6275_v37  ;;  %3791 = vmatprep.subr.bf16.mxu1 %v6280_v63 }
 0x56a   :  { %3832 = vmatprep.subr.bf16.mxu0 %v6283_v1  ;;  %v3926_v1 = vld [vmem:[#allocation8 + $0x1f8] sm:$0xff] }
 0x56c   :  { %3792 = vmatpush1.bf16.msra.mxu1 %v6278_v2  ;;  %v3910_v2 = vld [vmem:[#allocation8 + $0x178] sm:$0xff] }
 0x56d   :  { %3833 = vmatpush1.bf16.msra.mxu0 %v6281_v4  ;;  %3793 = vmatprep.subr.bf16.mxu1 %v6286_v5  ;;  %v3889_v5 = vld [vmem:[#allocation8 + $0xd0] sm:$0xff] }
 0x56e   :  { %3834 = vmatprep.subr.bf16.mxu0 %v6289_v6  ;;  %v3925_v6 = vld [vmem:[#allocation8 + $0x1f0] sm:$0xff] }
 0x570   :  { %3794 = vmatpush2.bf16.msra.mxu1 %v6284_v8  ;;  %v3873_v8 = vld [vmem:[#allocation8 + $0x50] sm:$0xff] }
 0x571   :  { %3835 = vmatpush2.bf16.msra.mxu0 %v6287_v9  ;;  %3795 = vmatprep.subr.bf16.mxu1 %v6292_v11  ;;  %v3909_v9 = vld [vmem:[#allocation8 + $0x170] sm:$0xff]  ;;  %v3888_v11 = vld [vmem:[#allocation8 + $0xc8] sm:$0xff] }
 0x572   :  { %3836 = vmatprep.subr.bf16.mxu0 %v6295_v52  ;;  %v3924_v52 = vld [vmem:[#allocation8 + $0x1e8] sm:$0xff] }
 0x574   :  { %3796 = vmatpush2.bf16.msra.mxu1 %v6290_v57  ;;  %v3872_v57 = vld [vmem:[#allocation8 + $0x48] sm:$0xff] }
 0x575   :  { %3837 = vmatpush2.bf16.msra.mxu0 %v6293_v14  ;;  %3797 = vmatprep.subr.bf16.mxu1 %v6298_v16  ;;  %v3908_v14 = vld [vmem:[#allocation8 + $0x168] sm:$0xff]  ;;  %v3887_v16 = vld [vmem:[#allocation8 + $0xc0] sm:$0xff] }
 0x576   :  { %3838 = vmatprep.subr.bf16.mxu0 %v6301_v17  ;;  %v3923_v17 = vld [vmem:[#allocation8 + $0x1e0] sm:$0xff] }
 0x578   :  { %3798 = vmatpush2.bf16.msra.mxu1 %v6296_v18  ;;  %v3871_v18 = vld [vmem:[#allocation8 + $0x40] sm:$0xff] }
 0x579   :  { %3839 = vmatpush2.bf16.msra.mxu0 %v6299_v19  ;;  %3799 = vmatprep.subr.bf16.mxu1 %v6304_v22  ;;  %v3907_v19 = vld [vmem:[#allocation8 + $0x160] sm:$0xff]  ;;  %v3886_v22 = vld [vmem:[#allocation8 + $0xb8] sm:$0xff] }
 0x57a   :  { %3840 = vmatprep.subr.bf16.mxu0 %v6307_v23  ;;  %v3922_v23 = vld [vmem:[#allocation8 + $0x1d8] sm:$0xff] }
 0x57c   :  { %3800 = vmatpush2.bf16.msra.mxu1 %v6302_v24  ;;  %v3870_v24 = vld [vmem:[#allocation8 + $0x38] sm:$0xff] }
 0x57d   :  { %3841 = vmatpush2.bf16.msra.mxu0 %v6305_v56  ;;  %3801 = vmatprep.subr.bf16.mxu1 %v6310_v62  ;;  %v3906_v56 = vld [vmem:[#allocation8 + $0x158] sm:$0xff]  ;;  %v3885_v62 = vld [vmem:[#allocation8 + $0xb0] sm:$0xff] }
 0x57e   :  { %3842 = vmatprep.subr.bf16.mxu0 %v6313_v26  ;;  %v3921_v26 = vld [vmem:[#allocation8 + $0x1d0] sm:$0xff] }
 0x580   :  { %3802 = vmatpush2.bf16.msra.mxu1 %v6308_v27  ;;  %v3869_v27 = vld [vmem:[#allocation8 + $0x30] sm:$0xff] }
 0x581   :  { %3843 = vmatpush2.bf16.msra.mxu0 %v6311_v28  ;;  %3803 = vmatprep.subr.bf16.mxu1 %v6316_v29  ;;  %v3905_v28 = vld [vmem:[#allocation8 + $0x150] sm:$0xff]  ;;  %v3884_v29 = vld [vmem:[#allocation8 + $0xa8] sm:$0xff] }
 0x582   :  { %3844 = vmatprep.subr.bf16.mxu0 %v6319_v30  ;;  %v3920_v30 = vld [vmem:[#allocation8 + $0x1c8] sm:$0xff] }
 0x584   :  { %3804 = vmatpush2.bf16.msra.mxu1 %v6314_v32  ;;  %v3868_v32 = vld [vmem:[#allocation8 + $0x28] sm:$0xff] }
 0x585   :  { %3845 = vmatpush2.bf16.msra.mxu0 %v6317_v34  ;;  %3805 = vmatprep.subr.bf16.mxu1 %v6322_v40  ;;  %v3904_v34 = vld [vmem:[#allocation8 + $0x148] sm:$0xff]  ;;  %v3883_v40 = vld [vmem:[#allocation8 + $0xa0] sm:$0xff] }
 0x586   :  { %3846 = vmatprep.subr.bf16.mxu0 %v6325_v43  ;;  %v3919_v43 = vld [vmem:[#allocation8 + $0x1c0] sm:$0xff] }
 0x588   :  { %3806 = vmatpush2.bf16.msra.mxu1 %v6320_v7  ;;  %v3867_v7 = vld [vmem:[#allocation8 + $0x20] sm:$0xff] }
 0x589   :  { %3847 = vmatpush2.bf16.msra.mxu0 %v6323_v13  ;;  %3807 = vmatprep.subr.bf16.mxu1 %v6328_v3  ;;  %v3903_v13 = vld [vmem:[#allocation8 + $0x140] sm:$0xff]  ;;  %v3882_v3 = vld [vmem:[#allocation8 + $0x98] sm:$0xff] }
 0x58a   :  { %3848 = vmatprep.subr.bf16.mxu0 %v6331_v46  ;;  %v3918_v46 = vld [vmem:[#allocation8 + $0x1b8] sm:$0xff] }
 0x58c   :  { %3808 = vmatpush2.bf16.msra.mxu1 %v6326_v21 }
 0x58d   :  { %3849 = vmatpush2.bf16.msra.mxu0 %v6329_v45  ;;  %5417 = vmatprep.subr.mxu1 %v3894_v47  ;;  %v3866_v45 = vld [vmem:[#allocation8 + $0x18] sm:$0xff] }
 0x58e   :  { %5452 = vmatprep.subr.mxu0 %v3926_v1  ;;  %v3902_v47 = vld [vmem:[#allocation8 + $0x138] sm:$0xff]  ;;  %v3913_v1 = vld [vmem:[#allocation8 + $0x190] sm:$0xff] }
 0x58f   :  { %v6661_v20 = vpop.f32.mrf.mxu1  ;;  %3810 = vmatmul.mubr.bf16.vlgmr.msra.gmra.mxu1 %v6630_v35  ;;  %v3890_v35 = vld [vmem:[#allocation8 + $0xd8] sm:$0xff] }
 0x590   :  { %v6663_v25 = vpop.f32.mrf.mxu0  ;;  %3851 = vmatmul.mubr.bf16.vlgmr.msra.gmra.mxu0 %v6634_v42  ;;  %5418 = vmatpush3.msra.mxu1 %v3878_v49  ;;  %v3566_v21 = vadd.f32 %v6661_v20, %v6655_v44  ;;  %v3917_v49 = vld [vmem:[#allocation8 + $0x1b0] sm:$0xff]  ;;  %v3864_v44 = vld [vmem:[#allocation8 + $0x8] sm:$0xff] }
 0x591   :  { %v3567_v55 = vpop.f32.mrf.mxu1  ;;  %5419 = vmatprep.subr.mxu1 %v3893_v50  ;;  %5453 = vmatpush3.msra.mxu0 %v3910_v2  ;;  %v3865_v50 = vld [vmem:[#allocation8 + $0x10] sm:$0xff]  ;;  %v3900_v20 = vld [vmem:[#allocation8 + $0x128] sm:$0xff] }
 0x592   :  { %v3608_v12 = vpop.f32.mrf.mxu0  ;;  %v3568_v58 = vadd.f32 %v3567_v55, %v3527_v53  ;;  %5420 = vmatpush3.msra.mxu1 %v3877_v51  ;;  %5454 = vmatprep.subr.mxu0 %v3925_v6  ;;  %v3901_v51 = vld [vmem:[#allocation8 + $0x130] sm:$0xff]  ;;  %v3880_v53 = vld [vmem:[#allocation8 + $0x88] sm:$0xff]  ;;  %v3607_v55 = vadd.f32 %v6663_v25, %v3566_v21  ;;  %v3915_v25 = vld [vmem:[#allocation8 + $0x1a0] sm:$0xff] }
 0x593   :  { %v3569_v60 = vpop.f32.mrf.mxu1  ;;  %5421 = vmatprep.subr.mxu1 %v3892_v54  ;;  %5455 = vmatpush3.msra.mxu0 %v3909_v9  ;;  %v3916_v54 = vld [vmem:[#allocation8 + $0x1a8] sm:$0xff] }
 0x594   :  { %v3610_v61 = vpop.f32.mrf.mxu0  ;;  %v3609_v37 = vadd.f32 %v3608_v12, %v3568_v58  ;;  %5422 = vmatpush3.msra.mxu1 %v3876_v36  ;;  %5456 = vmatprep.subr.mxu0 %v3924_v52  ;;  %v3879_v12 = vld [vmem:[#allocation8 + $0x80] sm:$0xff]  ;;  %v3859_v58 = vmax.f32 %v3607_v55, 0.0  ;;  %v3912_v6 = vld [vmem:[#allocation8 + $0x188] sm:$0xff]  ;;  %v4082_v55 = vld [vmem:[#allocation8 + $0x350] sm:$0xff] }
 0x595   :  { %v3570_v42 = vpop.f32.mrf.mxu1  ;;  %5423 = vmatprep.subr.mxu1 %v3891_v59  ;;  %5457 = vmatpush3.msra.mxu0 %v3908_v14  ;;  %v3863_v36 = vld [vmem:[#allocation8] sm:$0xff] }
 0x596   :  { %v3611_v63 = vpop.f32.mrf.mxu0  ;;  %v3860_v4 = vmax.f32 %v3609_v37, 0.0  ;;  %5424 = vmatpush3.msra.mxu1 %v3875_v33  ;;  %5458 = vmatprep.subr.mxu0 %v3923_v17  ;;  %v3899_v61 = vld [vmem:[#allocation8 + $0x120] sm:$0xff]  ;;  %v3914_v37 = vld [vmem:[#allocation8 + $0x198] sm:$0xff] }
 0x597   :  { %5425 = vmatprep.subr.mxu1 %v3890_v35  ;;  %5459 = vmatpush3.msra.mxu0 %v3907_v19  ;;  %v3898_v63 = vld [vmem:[#allocation8 + $0x118] sm:$0xff]  ;;  %v3911_v52 = vld [vmem:[#allocation8 + $0x180] sm:$0xff] }
 0x598   :  { %5426 = vmatpush3.msra.mxu1 %v3874_v39  ;;  %3996 = vmatprep.mubr.f32.mxu1 %v3860_v4 }
 0x599   :  { %5427 = vmatprep.subr.mxu1 %v3889_v5  ;;  %5460 = vmatprep.subr.mxu0 %v3922_v23  ;;  %v3897_v5 = vld [vmem:[#allocation8 + $0x110] sm:$0xff] }
 0x59a   :  { %5428 = vmatpush3.msra.mxu1 %v3873_v8  ;;  %5461 = vmatpush3.msra.mxu0 %v3906_v56 }
 0x59b   :  { %5429 = vmatprep.subr.mxu1 %v3888_v11  ;;  %5462 = vmatprep.subr.mxu0 %v3921_v26  ;;  %v3896_v11 = vld [vmem:[#allocation8 + $0x108] sm:$0xff] }
 0x59c   :  { %5430 = vmatpush3.msra.mxu1 %v3872_v57  ;;  %5463 = vmatpush3.msra.mxu0 %v3905_v28  ;;  %v3895_v57 = vld [vmem:[#allocation8 + $0x100] sm:$0xff] }
 0x59d   :  { %5431 = vmatprep.subr.mxu1 %v3887_v16  ;;  %5464 = vmatprep.subr.mxu0 %v3920_v30 }
 0x59e   :  { %5432 = vmatpush3.msra.mxu1 %v3871_v18  ;;  %5465 = vmatpush3.msra.mxu0 %v3904_v34 }
 0x59f   :  { %5433 = vmatprep.subr.mxu1 %v3886_v22  ;;  %5466 = vmatprep.subr.mxu0 %v3919_v43 }
 0x5a0   :  { %5434 = vmatpush3.msra.mxu1 %v3870_v24  ;;  %5467 = vmatpush3.msra.mxu0 %v3903_v13 }
 0x5a1   :  { %5435 = vmatprep.subr.mxu1 %v3885_v62  ;;  %5468 = vmatprep.subr.mxu0 %v3918_v46 }
 0x5a2   :  { %5436 = vmatpush3.msra.mxu1 %v3869_v27  ;;  %5469 = vmatpush3.msra.mxu0 %v3902_v47 }
 0x5a3   :  { %5437 = vmatprep.subr.mxu1 %v3884_v29  ;;  %5470 = vmatprep.subr.mxu0 %v3917_v49  ;;  %v4246_v49 = vld [vmem:[#allocation8 + $0x3a8] sm:$0xff] }
 0x5a4   :  { %5438 = vmatpush3.msra.mxu1 %v3868_v32  ;;  %5471 = vmatpush3.msra.mxu0 %v3901_v51  ;;  %v4245_v51 = vld [vmem:[#allocation8 + $0x3a0] sm:$0xff] }
 0x5a5   :  { %5439 = vmatprep.subr.mxu1 %v3883_v40  ;;  %5472 = vmatprep.subr.mxu0 %v3916_v54  ;;  %v4244_v54 = vld [vmem:[#allocation8 + $0x398] sm:$0xff] }
 0x5a6   :  { %5440 = vmatpush3.msra.mxu1 %v3867_v7  ;;  %5473 = vmatpush3.msra.mxu0 %v3900_v20 }
 0x5a7   :  { %5441 = vmatprep.subr.mxu1 %v3882_v3  ;;  %5474 = vmatprep.subr.mxu0 %v3915_v25 }
 0x5a8   :  { %5442 = vmatpush3.msra.mxu1 %v3866_v45  ;;  %5475 = vmatpush3.msra.mxu0 %v3899_v61 }
 0x5a9   :  { %5443 = vmatprep.subr.mxu1 %v3881_v48  ;;  %5476 = vmatprep.subr.mxu0 %v3914_v37  ;;  %v4085_v48 = vld [vmem:[#allocation8 + $0x368] sm:$0xff]  ;;  %v4076_v37 = vrot.slane %v6558_v31, 4  ;;  %v5349_v31 = vld [vmem:[#allocation8 + $0x45b] ss:$0 sm:$0xff] }
 0x5aa   :  { %5444 = vmatpush3.msra.mxu1 %v3865_v50  ;;  %5477 = vmatpush3.msra.mxu0 %v3898_v63  ;;  %v4084_v50 = vld [vmem:[#allocation8 + $0x360] sm:$0xff]  ;;  %v4167_v63 = vld [vmem:[#allocation8 + $0x388] sm:$0xff] }
 0x5ab   :  { %5445 = vmatprep.subr.mxu1 %v3880_v53  ;;  %5478 = vmatprep.subr.mxu0 %v3913_v1  ;;  %v4083_v53 = vld [vmem:[#allocation8 + $0x358] sm:$0xff]  ;;  %v4166_v1 = vld [vmem:[#allocation8 + $0x380] sm:$0xff] }
 0x5ac   :  { %5446 = vmatpush3.msra.mxu1 %v3864_v44  ;;  %5479 = vmatpush3.msra.mxu0 %v3897_v5  ;;  %v4243_v44 = vld [vmem:[#allocation8 + $0x390] sm:$0xff] }
 0x5ad   :  { %5447 = vmatprep.subr.mxu1 %v3879_v12  ;;  %5480 = vmatprep.subr.mxu0 %v3912_v6 }
 0x5ae   :  { %5448 = vmatpush3.msra.mxu1 %v3863_v36  ;;  %5481 = vmatpush3.msra.mxu0 %v3896_v11 }
 0x5af   :  { %3997 = vmatmul.mubr.f32.vlgmr.msra.gmra.mxu1 %v3859_v58  ;;  %5648 = vmatprep.subr.mxu1 %v6427_v0  ;;  %v5344_v58 = vld [vmem:[#allocation8 + $0x450] ss:$0 sm:$0xff] }
 0x5b0   :  { %5656 = vmatprep.mubr.msk.f32.mxu1 %vm6428_vm0, %v6427_v0  ;;  %5482 = vmatprep.subr.mxu0 %v3911_v52  ;;  %v5345_v52 = vld [vmem:[#allocation8 + $0x459] ss:$0 sm:$0xff] }
 0x5b1   :  { %5483 = vmatpush3.msra.mxu0 %v3895_v57  ;;  %5649 = vmatpush3.msra.mxu1 %v4085_v48 }
 0x5b2   :  { %5670 = vmatprep.subr.mxu0 %v6427_v0  ;;  %5650 = vmatprep.subr.mxu1 %v6427_v0 }
 0x5b3   :  { %5651 = vmatpush3.msra.mxu1 %v4084_v50 }
 0x5b4   :  { %5652 = vmatprep.subr.mxu1 %v6427_v0 }
 0x5b5   :  { %5653 = vmatpush3.msra.mxu1 %v4083_v53  ;;  %v4684_v53 = vld [vmem:[#allocation8 + $0x400] sm:$0xff] }
 0x5b6   :  { %5654 = vmatprep.subr.mxu1 %v6427_v0 }
 0x5b7   :  { %5655 = vmatpush3.msra.mxu1 %v4082_v55  ;;  %v4682_v55 = vld [vmem:[#allocation8 + $0x3f0] sm:$0xff] }
 0x5b8   :  { %5659 = vmatprep.subr.mxu1 %v6427_v0 }
 0x5cf   :  { %v3647_v59 = vpop.f32.mrf.mxu1 }
 0x5d0   :  { %v3688_v60 = vpop.f32.mrf.mxu0 }
 0x5d1   :  { %v3689_v33 = vadd.f32 %v3688_v60, %v3647_v59  ;;  %v3649_v35 = vpop.f32.mrf.mxu1 }
 0x5d2   :  { %v3690_v42 = vpop.f32.mrf.mxu0 }
 0x5d3   :  { %v3691_v39 = vadd.f32 %v3690_v42, %v3649_v35  ;;  %v3651_v2 = vpop.f32.mrf.mxu1 }
 0x5d4   :  { %v3692_v4 = vpop.f32.mrf.mxu0 }
 0x5d5   :  { %v3652_v8 = vpop.f32.mrf.mxu1 }
 0x5d6   :  { %v3693_v9 = vpop.f32.mrf.mxu0 }
 0x5d7   :  { %v5347_v9 = vld [vmem:[#allocation8 + $0x45a] ss:$0 sm:$0xff] }
 0x60f   :  { %v3729_v14 = vpop.f32.mrf.mxu1 }
 0x610   :  { %v3770_v16 = vpop.f32.mrf.mxu0  ;;  %v3730_v17 = vadd.f32 %v3729_v14, %v3689_v33  ;;  %v4073_v33 = vrot.slane %v235_v41, 6  ;;  %v4164_v41 = vld [vmem:[#allocation8 + $0x370] sm:$0xff] }
 0x611   :  { %v3731_v18 = vpop.f32.mrf.mxu1 }
 0x612   :  { %v3772_v19 = vpop.f32.mrf.mxu0  ;;  %v3771_v22 = vadd.f32 %v3770_v16, %v3730_v17  ;;  %v3732_v26 = vadd.f32 %v3731_v18, %v3691_v39  ;;  %v4413_v17 = vand.u32 127, %v1366_v10  ;;  %v4404_v18 = vand.u32 1, %v6561_v15  ;;  %v4523_v10 = vld [vmem:[#allocation8 + $0x3c0] sm:$0xff]  ;;  %v4522_v15 = vld [vmem:[#allocation8 + $0x3b8] sm:$0xff] }
 0x613   :  { %v3733_v23 = vpop.f32.mrf.mxu1 }
 0x614   :  { %v3774_v24 = vpop.f32.mrf.mxu0  ;;  %v3773_v29 = vadd.f32 %v3772_v19, %v3732_v26  ;;  %v4418_v19 = vand.u32 1, %v4413_v17 }
 0x615   :  { %v3734_v56 = vpop.f32.mrf.mxu1 }
 0x616   :  { %v3775_v62 = vpop.f32.mrf.mxu0  ;;  %vm4426_vm7 = vcmp.eq.s32.totalorder %v4404_v18, %v4418_v19 }
 0x64f   :  { %v3811_v27 = vpop.f32.mrf.mxu1 }
 0x650   :  { %v3852_v28 = vpop.f32.mrf.mxu0  ;;  %v3812_v30 = vadd.f32 %v3811_v27, %v3771_v22 }
 0x651   :  { %v3813_v32 = vpop.f32.mrf.mxu1 }
 0x652   :  { %v3854_v34 = vpop.f32.mrf.mxu0  ;;  %v3814_v40 = vadd.f32 %v3813_v32, %v3773_v29  ;;  %v3853_v43 = vadd.f32 %v3852_v28, %v3812_v30  ;;  %v4524_v32 = vld [vmem:[#allocation8 + $0x3c8] sm:$0xff] }
 0x653   :  { %v3815_v7 = vpop.f32.mrf.mxu1 }
 0x654   :  { %v3856_v13 = vpop.f32.mrf.mxu0  ;;  %v3855_v3 = vadd.f32 %v3854_v34, %v3814_v40  ;;  %v3861_v47 = vmax.f32 %v3853_v43, 0.0 }
 0x655   :  { %v3816_v46 = vpop.f32.mrf.mxu1  ;;  %v4607_v13 = vld [vmem:[#allocation8 + $0x3e8] sm:$0xff] }
 0x656   :  { %v3857_v21 = vpop.f32.mrf.mxu0  ;;  %v3862_v45 = vmax.f32 %v3855_v3, 0.0  ;;  %v4606_v3 = vld [vmem:[#allocation8 + $0x3e0] sm:$0xff]  ;;  %v4521_v46 = vld [vmem:[#allocation8 + $0x3b0] sm:$0xff] }
 0x657   :  { %v4605_v21 = vld [vmem:[#allocation8 + $0x3d8] sm:$0xff] }
 0x658   :  { %4066 = vmatprep.mubr.f32.mxu0 %v3862_v45  ;;  %v4604_v45 = vld [vmem:[#allocation8 + $0x3d0] sm:$0xff] }
 0x659   :  { %4067 = vmatmul.mubr.f32.vlgmr.msra.gmra.mxu0 %v3861_v47 }
 0x65a   :  { %5678 = vmatprep.mubr.msk.f32.mxu0 %vm6428_vm0, %v6427_v0  ;;  %5671 = vmatpush3.msra.mxu0 %v4246_v49  ;;  %v4685_v49 = vld [vmem:[#allocation8 + $0x408] sm:$0xff] }
 0x65b   :  { %5672 = vmatprep.subr.mxu0 %v6427_v0 }
 0x65c   :  { %5673 = vmatpush3.msra.mxu0 %v4245_v51 }
 0x65d   :  { %5674 = vmatprep.subr.mxu0 %v6427_v0 }
 0x65e   :  { %5675 = vmatpush3.msra.mxu0 %v4244_v54  ;;  %v4683_v54 = vld [vmem:[#allocation8 + $0x3f8] sm:$0xff] }
 0x65f   :  { %5676 = vmatprep.subr.mxu0 %v6427_v0 }
 0x660   :  { %5677 = vmatpush3.msra.mxu0 %v4243_v44 }
 0x661   :  { %5686 = vmatprep.subr.mxu0 %v6427_v0 }
 0x66f   :  { %v5449_v20 = vpop.f32.mrf.mxu1 }
 0x671   :  { %v5450_v12 = vpop.f32.mrf.mxu1 }
 0x672   :  { %v5451_v36 = vadd.f32 %v5450_v12, %v5449_v20  ;;  %v4764_v20 = vld [vmem:[#allocation8 + $0x428] sm:$0xff]  ;;  %v4763_v12 = vld [vmem:[#allocation8 + $0x420] sm:$0xff] }
 0x674   :  { %v3999_v60 = vadd.f32 %v5451_v36, %v5344_v58  ;;  %v4762_v36 = vld [vmem:[#allocation8 + $0x418] sm:$0xff]  ;;  %v4761_v58 = vld [vmem:[#allocation8 + $0x410] sm:$0xff] }
 0x719   :  { %v5484_v25 = vpop.f32.mrf.mxu0 }
 0x71b   :  { %v5485_v59 = vpop.f32.mrf.mxu0 }
 0x71c   :  { %v5486_v61 = vadd.f32 %v5485_v59, %v5484_v25  ;;  %v4847_v25 = vld [vmem:[#allocation8 + $0x448] sm:$0xff]  ;;  %v5356_v59 = vld [vmem:[#allocation8 + $0x45c] ss:$0 sm:$0xff] }
 0x71e   :  { %v4069_v35 = vadd.f32 %v5486_v61, %v3999_v60 }
 0x720   :  { %v4079_v42 = vsel %vm4078_vm4, %v4069_v35, %v4073_v33 }
 0x721   :  { %v4081_v39 = vsel %vm4080_vm5, %v4079_v42, %v4076_v37 }
 0x722   :  { %5657 = vmatmul.mubr.msk.f32.vlgmr.msra.gmra.mxu1 %vm161_vm2, %v4081_v39  ;;  %5679 = vmatmul.mubr.msk.f32.vlgmr.msra.gmra.mxu0 %vm161_vm2, %v4081_v39 }
 0x723   :  { %5660 = vmatpush3.msra.mxu1 %v4167_v63  ;;  %5667 = vmatprep.mubr.msk.f32.mxu1 %vm6428_vm0, %v6427_v0 }
 0x724   :  { %5661 = vmatprep.subr.mxu1 %v6427_v0  ;;  %5688 = vmatprep.mubr.msk.f32.mxu0 %vm6428_vm0, %v6427_v0 }
 0x725   :  { %5662 = vmatpush3.msra.mxu1 %v4166_v1 }
 0x726   :  { %5663 = vmatprep.subr.mxu1 %v6427_v0 }
 0x727   :  { %5664 = vmatpush3.msra.mxu1 %v4165_v38 }
 0x728   :  { %5665 = vmatprep.subr.mxu1 %v6427_v0 }
 0x729   :  { %5666 = vmatpush3.msra.mxu1 %v4164_v41  ;;  %v4846_v41 = vld [vmem:[#allocation8 + $0x440] sm:$0xff] }
 0x72a   :  { %5668 = vmatmul.mubr.msk.f32.vlgmr.msra.gmra.mxu1 %vm161_vm2, %v4081_v39  ;;  %5681 = vmatprep.subr.mxu1 %v6427_v0 }
 0x72b   :  { %5683 = vmatprep.mubr.msk.f32.mxu1 %vm6428_vm0, %v6427_v0 }
 0x7e2   :  { %v4160_v2 = vpop.f32.mrf.mxu1  ;;  %v4318_v4 = vpop.f32.mrf.mxu0 }
 0x7e3   :  { %v4319_v5 = vadd.f32 %v5349_v31, %v4318_v4  ;;  %v4161_v16 = vadd.f32 %v5345_v52, %v4160_v2  ;;  %v4845_v31 = vld [vmem:[#allocation8 + $0x438] sm:$0xff]  ;;  %v4844_v2 = vld [vmem:[#allocation8 + $0x430] sm:$0xff] }
 0x7e4   :  { %v5658_v6 = vpop.f32.mrf.mxu1  ;;  %v5680_v8 = vpop.f32.mrf.mxu0  ;;  %v5359_v4 = vld [vmem:[#allocation8 + $0x45d] ss:$0 sm:$0xff] }
 0x7e5   :  { %5687 = vmatpush3.msk.msra.mxu0 %vm4446_vm6, %v4319_v5 }
 0x7e6   :  { %5702 = vmatprep.subr.mxu0 %v6427_v0 }
 0x7ea   :  { %v4239_v11 = vpop.f32.mrf.mxu1 }
 0x7eb   :  { %v4240_v57 = vadd.f32 %v5347_v9, %v4239_v11  ;;  %v5361_v11 = vld [vmem:[#allocation8 + $0x45e] ss:$0 sm:$0xff] }
 0x7ec   :  { %v5669_v14 = vpop.f32.mrf.mxu1 }
 0x7ed   :  { %5682 = vmatpush3.xpose.msk.msra.mxu1 %vm161_vm2, %v4240_v57 }
 0x7ee   :  { %5691 = vmatprep.subr.mxu1 %v6427_v0 }
 0x7f0   :  { %5684 = vmatmul.mubr.msk.f32.vlgmr.msra.gmra.mxu1 %vm161_vm2, %v4161_v16 }
 0x7f1   :  { %5699 = vmatprep.mubr.msk.f32.mxu1 %vm6428_vm0, %v6427_v0  ;;  %5692 = vmatpush3.msra.mxu1 %v4524_v32 }
 0x7f2   :  { %5693 = vmatprep.subr.mxu1 %v6427_v0 }
 0x7f3   :  { %5694 = vmatpush3.msra.mxu1 %v4523_v10 }
 0x7f4   :  { %5695 = vmatprep.subr.mxu1 %v6427_v0 }
 0x7f5   :  { %5696 = vmatpush3.msra.mxu1 %v4522_v15 }
 0x7f6   :  { %5697 = vmatprep.subr.mxu1 %v6427_v0 }
 0x7f7   :  { %5698 = vmatpush3.msra.mxu1 %v4521_v46 }
 0x7f8   :  { %5713 = vmatprep.subr.mxu1 %v6427_v0 }
 0x8b0   :  { %v4394_v22 = vpop.f32.mrf.mxu1 }
 0x8b1   :  { %v4427_v23 = vsel %vm4426_vm7, %v4394_v22, -1e+30 }
 0x8b2   :  { %v5685_v24 = vpop.f32.mrf.mxu1  ;;  %v4429_v56 = vsel %vm4428_vm8, %v4427_v23, -inf }
 0x8b3   :  { %4430 = vmax.xlane.f32.xlu0 %v4429_v56 }
 0x93c   :  { %v4431_v62 = vpop.xlane.xlu0 %4430 }
 0x93d   :  { %v4432_v26 = vsub.f32 %v4394_v22, %v4431_v62 }
 0x93f   :  { %v4433_v27 = vmul.f32 1.442695, %v4432_v26 }
 0x941   :  { %6332 = vpow2.f32 %v4433_v27 }
 0x94e   :  { %v6333_v28 = vpop.eup %6332 }
 0x94f   :  { %v4435_v29 = vsel %vm4426_vm7, %v6333_v28, 0.0 }
 0x950   :  { %v4436_v30 = vsel %vm4428_vm8, %v4435_v29, 0.0 }
 0x951   :  { %4437 = vadd.xlane.f32.xlu0 %v4436_v30 }
 0x9da   :  { %v4438_v34 = vpop.xlane.xlu0 %4437 }
 0x9db   :  { %6334 = vrcp.f32 %v4438_v34 }
 0x9e8   :  { %v6335_v40 = vpop.eup %6334 }
 0x9e9   :  { %v4440_v43 = vmul.f32 0.17677669, %v6335_v40 }
 0x9eb   :  { %v4441_v7 = vmul.f32 %v4440_v43, %v4435_v29 }
 0x9ed   :  { %5689 = vmatmul.mubr.msk.f32.vlgmr.msra.gmra.mxu0 %vm4442_vm9, %v4441_v7 }
 0x9ee   :  { %5703 = vmatpush3.msra.mxu0 %v4607_v13  ;;  %5710 = vmatprep.mubr.msk.f32.mxu0 %vm6428_vm0, %v6427_v0 }
 0x9ef   :  { %5704 = vmatprep.subr.mxu0 %v6427_v0 }
 0x9f0   :  { %5705 = vmatpush3.msra.mxu0 %v4606_v3 }
 0x9f1   :  { %5706 = vmatprep.subr.mxu0 %v6427_v0 }
 0x9f2   :  { %5707 = vmatpush3.msra.mxu0 %v4605_v21 }
 0x9f3   :  { %5708 = vmatprep.subr.mxu0 %v6427_v0 }
 0x9f4   :  { %5709 = vmatpush3.msra.mxu0 %v4604_v45 }
 0x9f5   :  { %5724 = vmatprep.subr.mxu0 %v6427_v0 }
 0xaad   :  { %v4516_v47 = vpop.f32.mrf.mxu0 }
 0xaae   :  { %v4525_v48 = vmax.f32 %v4516_v47, 0.0 }
 0xaaf   :  { %v5690_v50 = vpop.f32.mrf.mxu0 }
 0xab0   :  { %v4608_v51 = vrot.slane %v4525_v48, 2  ;;  %5700 = vmatmul.mubr.msk.f32.vlgmr.msra.gmra.mxu1 %vm161_vm2, %v4525_v48  ;;  %v4686_v44 = vrot.slane %v4525_v48, 4 }
 0xab1   :  { %5714 = vmatpush3.msra.mxu1 %v4685_v49  ;;  %5721 = vmatprep.mubr.msk.f32.mxu1 %vm6428_vm0, %v6427_v0 }
 0xab2   :  { %5715 = vmatprep.subr.mxu1 %v6427_v0  ;;  %5711 = vmatmul.mubr.msk.f32.vlgmr.msra.gmra.mxu0 %vm161_vm2, %v4608_v51 }
 0xab3   :  { %5716 = vmatpush3.msra.mxu1 %v4684_v53  ;;  %5732 = vmatprep.mubr.msk.f32.mxu0 %vm6428_vm0, %v6427_v0 }
 0xab4   :  { %5717 = vmatprep.subr.mxu1 %v6427_v0  ;;  %5725 = vmatpush3.msra.mxu0 %v4764_v20 }
 0xab5   :  { %5718 = vmatpush3.msra.mxu1 %v4683_v54  ;;  %5726 = vmatprep.subr.mxu0 %v6427_v0 }
 0xab6   :  { %5719 = vmatprep.subr.mxu1 %v6427_v0  ;;  %5727 = vmatpush3.msra.mxu0 %v4763_v12 }
 0xab7   :  { %5720 = vmatpush3.msra.mxu1 %v4682_v55  ;;  %5728 = vmatprep.subr.mxu0 %v6427_v0 }
 0xab8   :  { %5722 = vmatmul.mubr.msk.f32.vlgmr.msra.gmra.mxu1 %vm161_vm2, %v4686_v44  ;;  %5735 = vmatprep.subr.mxu1 %v6427_v0 }
 0xab9   :  { %5743 = vmatprep.mubr.msk.f32.mxu1 %vm6428_vm0, %v6427_v0  ;;  %5729 = vmatpush3.msra.mxu0 %v4762_v36 }
 0xaba   :  { %5730 = vmatprep.subr.mxu0 %v6427_v0  ;;  %5736 = vmatpush3.msra.mxu1 %v4847_v25 }
 0xabb   :  { %5731 = vmatpush3.msra.mxu0 %v4761_v58  ;;  %5737 = vmatprep.subr.mxu1 %v6427_v0 }
 0xabc   :  { %5738 = vmatpush3.msra.mxu1 %v4846_v41 }
 0xabd   :  { %5739 = vmatprep.subr.mxu1 %v6427_v0 }
 0xabe   :  { %5740 = vmatpush3.msra.mxu1 %v4845_v31 }
 0xabf   :  { %5741 = vmatprep.subr.mxu1 %v6427_v0 }
 0xac0   :  { %5742 = vmatpush3.msra.mxu1 %v4844_v2 }
 0xb70   :  { %v4595_v60 = vpop.f32.mrf.mxu1 }
 0xb71   :  { %v4603_v37 = vadd.f32 %v5356_v59, %v4595_v60 }
 0xb72   :  { %v5701_v61 = vpop.f32.mrf.mxu1  ;;  %v4677_v33 = vpop.f32.mrf.mxu0 }
 0xb73   :  { %v4681_v42 = vadd.f32 %v4677_v33, %v4603_v37 }
 0xb74   :  { %v5712_v35 = vpop.f32.mrf.mxu0 }
 0xb78   :  { %v4755_v63 = vpop.f32.mrf.mxu1 }
 0xb79   :  { %v4759_v39 = vadd.f32 %v4755_v63, %v4681_v42 }
 0xb7a   :  { %v5723_v1 = vpop.f32.mrf.mxu1 }
 0xb7b   :  { %v4760_v38 = vmax.f32 %v4759_v39, 0.0 }
 0xb7d   :  { %5733 = vmatmul.mubr.msk.f32.vlgmr.msra.gmra.mxu0 %vm161_vm2, %v4760_v38 }
 0xc3d   :  { %v4839_v5 = vpop.f32.mrf.mxu0 }
 0xc3e   :  { %v4840_v6 = vadd.f32 %v5359_v4, %v4839_v5 }
 0xc3f   :  { %v5734_v8 = vpop.f32.mrf.mxu0 }
 0xc40   :  { %v4843_v9 = vmax.f32 %v4840_v6, 0.0 }
 0xc42   :  { %5744 = vmatmul.mubr.msk.f32.vlgmr.msra.gmra.mxu1 %vm161_vm2, %v4843_v9 }
 0xd02   :  { %v4922_v52 = vpop.f32.mrf.mxu1 }
 0xd03   :  { %v4923_v57 = vadd.f32 %v5361_v11, %v4922_v52 }
 0xd04   :  { %v5745_v14 = vpop.f32.mrf.mxu1 }
 0xd05   :  { %4927 = vst.msk [vmem:[%s6749_s6] sm:$0x3] %vm4926_vm10, %v4923_v57 }
 0xd06   :  { %4932 = vsyncpa [#allocation5], 1 }
 0xd07   :  { %4933 = vsyncpa [#allocation7], 1 }
 0xd08   :  { %4934 = vsyncmov [#allocation3] }
 0xd0b   :  { %s4935_s21 = vpop.sfrf %4934 }
 0xd0c   :  { %p5363_p6 = scmp.ne.s32.totalorder %s4935_s21, 0 }
 0xd0e   :  { %4939 = shalt.err (%p5363_p6)  }

</bundles_post_ra>
